<compile_context>
chip_gen: v7x
topology: tpu7x:2x2x1
jax: 0.10.0
libtpu: 0.0.40
codegen_flags: <defaults>
</compile_context>

<pallas_src>
import functools

import jax
import jax.numpy as jnp
from jax.experimental import pallas as pl
from jax.experimental.pallas import tpu as pltpu


_VMEM = pl.BlockSpec(memory_space=pltpu.MemorySpace.VMEM)


def _round_up(x, m):
    return ((x + m - 1) // m) * m


# ------------------------------ Pallas kernel ------------------------------ #

def _encoder_kernel(x_ref, mask_ref, *rest, seq_len, batch, hidden, n_layers,
                    mxu_dtype):
    """Fused multi-layer bidirectional GRU + final Linear+tanh.

    x_ref:    (T*B, E)      mxu_dtype, time-major (row t*B+b = timestep t, batch b)
    mask_ref: (T*B, 1)      f32 validity mask (1.0 while t < len(b), else 0.0)
    per layer l (4 refs each):
      wih_l:  (E_in, 2*Gp)  mxu_dtype  [fwd gates | pad | bwd gates | pad]
      bx_l:   (1, 2*Gp)     f32        hoisted bias (bih + bhh[r,z] folded)
      whh_l:  (2H, 2*Gp)    mxu_dtype  block-diagonal recurrent weights
      bn_l:   (1, 2H)       f32        [bhh_n_fwd | bhh_n_bwd]
    lw: (2H, H) mxu_dtype, lb: (1, H) f32   (fused final Linear+tanh)
    outputs: out (T*B, 2H) f32 (zeros beyond each length), hid (B, H) f32
    scratch: gx (T*B, 2*Gp) f32, fwd/bwd slabs (T*B, H) f32
    """
    T, B, H = seq_len, batch, hidden
    G3 = 3 * H
    Gp = _round_up(G3, 128)          # per-direction gate block, 128-lane aligned

    nw = 4 * n_layers
    layer_refs = [rest[4 * l:4 * l + 4] for l in range(n_layers)]
    lw_ref, lb_ref = rest[nw], rest[nw + 1]
    out_ref, hid_ref = rest[nw + 2], rest[nw + 3]
    gx_ref, fwd_ref, bwd_ref = rest[nw + 4], rest[nw + 5], rest[nw + 6]

    h_f = h_b = None
    for l, (wih_ref, bx_ref, whh_ref, bn_ref) in enumerate(layer_refs):
        # Hoisted input-to-hidden projection for BOTH directions: fat MXU matmuls off
        # the serial critical path.  For l>0 the previous layer's fwd/bwd slabs feed
        # in directly (the concat is folded into two row-blocks of wih).
        # TODO(synk): for production-scale T, chunk this over time and interleave it
        # with the recurrence (emit_pipeline), sizing chunks for v7x's 64 MiB VMEM.
        if l == 0:
            gx_ref[...] = (
                jnp.dot(x_ref[...], wih_ref[...],
                        preferred_element_type=jnp.float32)
                + bx_ref[...])
        else:
            gx_ref[...] = (
                jnp.dot(fwd_ref[...].astype(mxu_dtype), wih_ref[0:H, :],
                        preferred_element_type=jnp.float32)
                + jnp.dot(bwd_ref[...].astype(mxu_dtype), wih_ref[H:2 * H, :],
                          preferred_element_type=jnp.float32)
                + bx_ref[...])

        whh = whh_ref[...]                       # (2H, 2*Gp) block-diagonal
        bn = bn_ref[...]
        bn_f = bn[:, 0:H]
        bn_b = bn[:, H:2 * H]

        def step(t, carry, whh=whh, bn_f=bn_f, bn_b=bn_b):
            h_f, h_b = carry
            tr = T - 1 - t
            row_f = pl.multiple_of(t * B, B)
            row_b = pl.multiple_of(tr * B, B)
            gx_f = gx_ref[pl.ds(row_f, B), pl.ds(0, Gp)]    # fwd gates, lane-aligned
            gx_b = gx_ref[pl.ds(row_b, B), pl.ds(Gp, Gp)]   # bwd gates, lane-aligned
            # ONE recurrent matmul per step for both directions (block-diag Whh);
            # carry stays f32, only the matmul operand is cast.
            h_cat = jnp.concatenate([h_f, h_b], axis=1).astype(mxu_dtype)
            gh = jnp.dot(h_cat, whh, preferred_element_type=jnp.float32)  # (B, 2*Gp)
            gh_f = gh[:, 0:Gp]
            gh_b = gh[:, Gp:2 * Gp]
            # r and z share one fused sigmoid per direction (halves EUP pushes).
            rz_f = jax.nn.sigmoid(gx_f[:, 0:2 * H] + gh_f[:, 0:2 * H])
            rz_b = jax.nn.sigmoid(gx_b[:, 0:2 * H] + gh_b[:, 0:2 * H])
            n_f = jnp.tanh(gx_f[:, 2 * H:3 * H]
                           + rz_f[:, 0:H] * (gh_f[:, 2 * H:3 * H] + bn_f))
            n_b = jnp.tanh(gx_b[:, 2 * H:3 * H]
                           + rz_b[:, 0:H] * (gh_b[:, 2 * H:3 * H] + bn_b))
            z_f = rz_f[:, H:2 * H]
            z_b = rz_b[:, H:2 * H]
            hn_f = (1.0 - z_f) * n_f + z_f * h_f
            hn_b = (1.0 - z_b) * n_b + z_b * h_b
            m_f = mask_ref[pl.ds(row_f, B), :]              # precomputed masks
            m_b = mask_ref[pl.ds(row_b, B), :]
            h_f = h_f + m_f * (hn_f - h_f)                  # freeze past the end
            h_b = h_b + m_b * (hn_b - h_b)
            fwd_ref[pl.ds(row_f, B), :] = m_f * h_f         # per-direction slabs:
            bwd_ref[pl.ds(row_b, B), :] = m_b * h_b         # no shared-row RMW stores
            return h_f, h_b

        h0 = jnp.zeros((B, H), jnp.float32)
        # TODO(synk): for large T switch to partial unroll / a time-chunked grid axis
        # with h carried in persistent scratch (vreg pressure & code size).
        h_f, h_b = jax.lax.fori_loop(0, T, step, (h0, h0), unroll=True)

    # Last layer: two large contiguous stores of the slabs into the (T*B, 2H) output,
    # plus the fused final Linear+tanh on the final fwd/bwd hidden states.
    out_ref[:, 0:H] = fwd_ref[...]
    out_ref[:, H:2 * H] = bwd_ref[...]
    h_cat = jnp.concatenate([h_f, h_b], axis=1).astype(mxu_dtype)
    hid_ref[...] = jnp.tanh(
        jnp.dot(h_cat, lw_ref[...], preferred_element_type=jnp.float32) + lb_ref[...]
    ).astype(hid_ref.dtype)


# -------------------------------- wrapper ----------------------------------- #

def encoder_forward(params, sentence, lengths, mxu_dtype=jnp.bfloat16):
    """Mirrors Encoder.forward(sentence, length) -> (output, hidden)."""
    emb_table = params["embedding"]                       # (V, E) == weight_matrix
    embedded = jnp.take(emb_table, sentence, axis=0)      # (B, T, E)
    # TODO(synk): nn.Dropout applied as inference-mode identity (no random mask).
    B, T, E = embedded.shape
    B8 = _round_up(B, 8)                                  # f32 sublane tile

    H = params["gru"][0][0][1].shape[0]
    G3 = 3 * H
    Gp = _round_up(G3, 128)
    n_layers = len(params["gru"])

    x = jnp.transpose(embedded, (1, 0, 2)).astype(jnp.float32)    # (T, B, E)
    x = jnp.pad(x, ((0, 0), (0, B8 - B), (0, 0)))                 # (T, B8, E)
    x2d = x.reshape(T * B8, E).astype(mxu_dtype)

    lens = jnp.zeros((B8,), jnp.int32).at[:B].set(jnp.asarray(lengths, jnp.int32))
    t_idx = jnp.arange(T, dtype=jnp.int32)[:, None]               # (T, 1)
    mask2d = (lens[None, :] > t_idx).astype(jnp.float32).reshape(T * B8, 1)

    inputs = [x2d, mask2d]
    for layer in params["gru"]:
        (wih_f, whh_f, bih_f, bhh_f), (wih_b, whh_b, bih_b, bhh_b) = layer
        e_in = wih_f.shape[0]

        def fold(bih, bhh):   # bih (all gates) + bhh for r,z folded into hoisted bias
            return bih + jnp.concatenate(
                [bhh[:, :2 * H], jnp.zeros((1, H), jnp.float32)], axis=1)

        wih = jnp.zeros((e_in, 2 * Gp), jnp.float32)
        wih = wih.at[:, 0:G3].set(wih_f).at[:, Gp:Gp + G3].set(wih_b)
        bx = jnp.zeros((1, 2 * Gp), jnp.float32)
        bx = bx.at[:, 0:G3].set(fold(bih_f, bhh_f)).at[:, Gp:Gp + G3].set(
            fold(bih_b, bhh_b))
        whh = jnp.zeros((2 * H, 2 * Gp), jnp.float32)             # block-diagonal
        whh = whh.at[0:H, 0:G3].set(whh_f).at[H:2 * H, Gp:Gp + G3].set(whh_b)
        bn = jnp.concatenate([bhh_f[:, 2 * H:], bhh_b[:, 2 * H:]], axis=1)
        inputs += [wih.astype(mxu_dtype), bx, whh.astype(mxu_dtype), bn]
    inputs += [params["l_w"].astype(mxu_dtype), params["l_b"]]

    kernel = functools.partial(_encoder_kernel, seq_len=T, batch=B8, hidden=H,
                               n_layers=n_layers, mxu_dtype=mxu_dtype)
    # TODO(synk): on v7x the two independent direction chains could run on the two
    # TensorCores (pl.core_map over a 2-core mesh + shared combine); the single-core
    # version here is correct on v5e/v6e/v7x and VMEM use is only a few hundred KiB.
    out2d, hid = pl.pallas_call(
        kernel,
        out_shape=(jax.ShapeDtypeStruct((T * B8, 2 * H), jnp.float32),
                   jax.ShapeDtypeStruct((B8, H), jnp.float32)),
        in_specs=[_VMEM] * len(inputs),
        out_specs=(_VMEM, _VMEM),
        scratch_shapes=[pltpu.VMEM((T * B8, 2 * Gp), jnp.float32),
                        pltpu.VMEM((T * B8, H), jnp.float32),
                        pltpu.VMEM((T * B8, H), jnp.float32)],
    )(*inputs)

    max_len = int(max(lengths))
    out3d = out2d.reshape(T, B8, 2 * H)
    output = jnp.transpose(out3d, (1, 0, 2))[:B, :max_len, :]     # (B, max_len, 2H)
    hidden = hid[:B]                                              # (B, H)
    return output, hidden


# ------------------------- deterministic parameters ------------------------- #

def init_params(key, vocab, emb_dim, hidden, layers):
    params = {}
    key, k_emb = jax.random.split(key)
    params["embedding"] = jax.random.normal(k_emb, (vocab, emb_dim), jnp.float32)

    bound = float(hidden) ** -0.5
    gru = []
    for layer in range(layers):
        in_size = emb_dim if layer == 0 else 2 * hidden
        dirs = []
        for _ in range(2):                                # forward, backward
            key, k1, k2, k3, k4 = jax.random.split(key, 5)
            wih = jax.random.uniform(k1, (in_size, 3 * hidden), jnp.float32, -bound, bound)
            whh = jax.random.uniform(k2, (hidden, 3 * hidden), jnp.float32, -bound, bound)
            bih = jax.random.uniform(k3, (1, 3 * hidden), jnp.float32, -bound, bound)
            bhh = jax.random.uniform(k4, (1, 3 * hidden), jnp.float32, -bound, bound)
            dirs.append((wih, whh, bih, bhh))
        gru.append(dirs)
    params["gru"] = gru

    lbound = float(2 * hidden) ** -0.5
    key, kw, kb = jax.random.split(key, 3)
    params["l_w"] = jax.random.uniform(kw, (2 * hidden, hidden), jnp.float32, -lbound, lbound)
    params["l_b"] = jax.random.uniform(kb, (1, hidden), jnp.float32, -lbound, lbound)
    return params


# ------------------------------ pure-JAX reference -------------------------- #

def _ref_gru_direction(x, lengths, wih, whh, bih, bhh, reverse, mxu_dtype):
    T, B, _ = x.shape
    H = whh.shape[0]
    h = jnp.zeros((B, H), jnp.float32)
    out = jnp.zeros((T, B, H), jnp.float32)
    order = range(T - 1, -1, -1) if reverse else range(T)
    lens = jnp.asarray(lengths, jnp.int32).reshape(-1, 1)
    wih_c = wih.astype(mxu_dtype)
    whh_c = whh.astype(mxu_dtype)
    for t_idx in order:
        gx = jnp.dot(x[t_idx].astype(mxu_dtype), wih_c,
                     preferred_element_type=jnp.float32) + bih
        gh = jnp.dot(h.astype(mxu_dtype), whh_c,
                     preferred_element_type=jnp.float32) + bhh
        r = jax.nn.sigmoid(gx[:, 0:H] + gh[:, 0:H])
        z = jax.nn.sigmoid(gx[:, H:2 * H] + gh[:, H:2 * H])
        n = jnp.tanh(gx[:, 2 * H:3 * H] + r * gh[:, 2 * H:3 * H])
        h_new = (1.0 - z) * n + z * h
        mask = lens > t_idx
        h = jnp.where(mask, h_new, h)
        out = out.at[t_idx].set(jnp.where(mask, h, 0.0))
    return out, h


def ref_encoder(params, sentence, lengths, mxu_dtype=jnp.float32):
    embedded = jnp.take(params["embedding"], sentence, axis=0)
    x = jnp.transpose(embedded, (1, 0, 2)).astype(jnp.float32)
    finals = []
    for layer_params in params["gru"]:
        outs, finals = [], []
        for direction, (wih, whh, bih, bhh) in enumerate(layer_params):
            out, hfin = _ref_gru_direction(x, lengths, wih, whh, bih, bhh,
                                           direction == 1, mxu_dtype)
            outs.append(out)
            finals.append(hfin)
        x = jnp.concatenate(outs, axis=-1)
    output = jnp.transpose(x, (1, 0, 2))[:, :int(max(lengths)), :]
    h_cat = jnp.concatenate(finals, axis=-1)
    hidden = jnp.tanh(
        jnp.dot(h_cat.astype(mxu_dtype), params["l_w"].astype(mxu_dtype),
                preferred_element_type=jnp.float32) + params["l_b"])
    return output, hidden


# ---------------------------------- main ------------------------------------ #

if __name__ == "__main__":
    B, T = 2, 8          # batch, max sequence length
    E, H = 32, 32        # embedding_dimension, hidden_dimension
    V = 50               # dictionary_size
    LAYERS = 2           # GRU layers (bidirectional)

    key = jax.random.PRNGKey(0)
    key, k_sent = jax.random.split(key)
    sentence = jax.random.randint(k_sent, (B, T), 0, V, dtype=jnp.int32)
    lengths = [8, 5]     # variable lengths (pack_padded_sequence semantics)

    params = init_params(key, V, E, H, LAYERS)

    # 1) f32 MXU operands: tight check of the fused kernel against the f32 reference.
    out32, hid32 = encoder_forward(params, sentence, lengths, mxu_dtype=jnp.float32)
    jax.block_until_ready((out32, hid32))
    ref_out32, ref_hid32 = ref_encoder(params, sentence, lengths, jnp.float32)
    assert out32.shape == (B, max(lengths), 2 * H) and hid32.shape == (B, H)
    assert jnp.allclose(out32, ref_out32, atol=1e-4, rtol=1e-4), "f32 output mismatch"
    assert jnp.allclose(hid32, ref_hid32, atol=1e-4, rtol=1e-4), "f32 hidden mismatch"

    # 2) bf16 MXU operands (perf-review default): checked against a numerics-matched
    #    reference that also feeds bf16 operands to its matmuls (f32 accumulation,
    #    f32 carries and element-wise math in both).
    outbf, hidbf = encoder_forward(params, sentence, lengths, mxu_dtype=jnp.bfloat16)
    jax.block_until_ready((outbf, hidbf))
    ref_outbf, ref_hidbf = ref_encoder(params, sentence, lengths, jnp.bfloat16)
    assert jnp.allclose(outbf, ref_outbf, atol=1e-3, rtol=1e-3), "bf16 output mismatch"
    assert jnp.allclose(hidbf, ref_hidbf, atol=1e-3, rtol=1e-3), "bf16 hidden mismatch"

    print("KERNEL_OK")
</pallas_src>

<mosaic_0001>
module attributes {stable_mosaic.version = 11 : i64} {
  func.func @_encoder_kernel(%arg0: memref<64x32xf32, #tpu.memory_space<vmem>>, %arg1: memref<64x1xf32, #tpu.memory_space<vmem>>, %arg2: memref<32x256xf32, #tpu.memory_space<vmem>>, %arg3: memref<1x256xf32, #tpu.memory_space<vmem>>, %arg4: memref<64x256xf32, #tpu.memory_space<vmem>>, %arg5: memref<1x64xf32, #tpu.memory_space<vmem>>, %arg6: memref<64x256xf32, #tpu.memory_space<vmem>>, %arg7: memref<1x256xf32, #tpu.memory_space<vmem>>, %arg8: memref<64x256xf32, #tpu.memory_space<vmem>>, %arg9: memref<1x64xf32, #tpu.memory_space<vmem>>, %arg10: memref<64x32xf32, #tpu.memory_space<vmem>>, %arg11: memref<1x32xf32, #tpu.memory_space<vmem>>, %arg12: memref<64x64xf32, #tpu.memory_space<vmem>>, %arg13: memref<8x32xf32, #tpu.memory_space<vmem>>, %arg14: memref<64x256xf32, #tpu.memory_space<vmem>>, %arg15: memref<64x32xf32, #tpu.memory_space<vmem>>, %arg16: memref<64x32xf32, #tpu.memory_space<vmem>>) attributes {dimension_semantics = [], scalar_prefetch = 0 : i64, scratch_operands = 3 : i64, tpu.core_type = #tpu.core_type<tc>} {
    %c0 = arith.constant 0 : index
    %c0_0 = arith.constant 0 : index
    %0 = vector.load %arg0[%c0, %c0_0] : memref<64x32xf32, #tpu.memory_space<vmem>>, vector<64x32xf32>
    %c0_1 = arith.constant 0 : index
    %c0_2 = arith.constant 0 : index
    %1 = vector.load %arg2[%c0_1, %c0_2] : memref<32x256xf32, #tpu.memory_space<vmem>>, vector<32x256xf32>
    %cst = arith.constant dense<0.000000e+00> : vector<64x256xf32>
    %2 = tpu.matmul %0, %1, %cst {dimension_numbers = #tpu.dot_dimension_numbers<[1], [0], [0], [1], [0, 0, 1, 1], [], []>} : vector<64x32xf32>, vector<32x256xf32>, vector<64x256xf32> -> vector<64x256xf32>
    %c0_3 = arith.constant 0 : index
    %c0_4 = arith.constant 0 : index
    %3 = vector.load %arg3[%c0_3, %c0_4] : memref<1x256xf32, #tpu.memory_space<vmem>>, vector<1x256xf32>
    %4 = vector.broadcast %3 : vector<1x256xf32> to vector<64x256xf32>
    %5 = arith.addf %2, %4 : vector<64x256xf32>
    %c0_5 = arith.constant 0 : index
    %c0_6 = arith.constant 0 : index
    %6 = vector.load %arg14[%c0_5, %c0_6] : memref<64x256xf32, #tpu.memory_space<vmem>>, vector<64x256xf32>
    tpu.vector_store %arg14[%c0_5, %c0_6], %5 {strides = array<i32>} : memref<64x256xf32, #tpu.memory_space<vmem>>, vector<64x256xf32>,
    %c0_7 = arith.constant 0 : index
    %c0_8 = arith.constant 0 : index
    %7 = vector.load %arg4[%c0_7, %c0_8] : memref<64x256xf32, #tpu.memory_space<vmem>>, vector<64x256xf32>
    %c0_9 = arith.constant 0 : index
    %c0_10 = arith.constant 0 : index
    %8 = vector.load %arg5[%c0_9, %c0_10] : memref<1x64xf32, #tpu.memory_space<vmem>>, vector<1x64xf32>
    %9 = vector.extract_strided_slice %8 {offsets = [0, 0], sizes = [1, 32], strides = [1, 1]} : vector<1x64xf32> to vector<1x32xf32>
    %10 = vector.extract_strided_slice %8 {offsets = [0, 32], sizes = [1, 32], strides = [1, 1]} : vector<1x64xf32> to vector<1x32xf32>
    %cst_11 = arith.constant 0.000000e+00 : f32
    %11 = vector.broadcast %cst_11 : f32 to vector<8x32xf32>
    %c0_i32 = arith.constant 0 : i32
    %c7_i32 = arith.constant 7 : i32
    %12 = arith.subi %c7_i32, %c0_i32 : i32
    %c8_i32 = arith.constant 8 : i32
    %13 = arith.muli %c0_i32, %c8_i32 : i32
    %14 = tpu.assume_multiple %13, 8 : i32
    %c8_i32_12 = arith.constant 8 : i32
    %15 = arith.muli %12, %c8_i32_12 : i32
    %16 = tpu.assume_multiple %15, 8 : i32
    %17 = arith.index_cast %14 : i32 to index
    %c0_13 = arith.constant 0 : index
    %18 = vector.load %arg14[%17, %c0_13] : memref<64x256xf32, #tpu.memory_space<vmem>>, vector<8x128xf32>
    %19 = arith.index_cast %16 : i32 to index
    %c128 = arith.constant 128 : index
    %20 = vector.load %arg14[%19, %c128] : memref<64x256xf32, #tpu.memory_space<vmem>>, vector<8x128xf32>
    %21 = tpu.concatenate %11, %11 in 1 : vector<8x32xf32>, vector<8x32xf32> -> vector<8x64xf32>
    %cst_14 = arith.constant dense<0.000000e+00> : vector<8x256xf32>
    %22 = tpu.matmul %21, %7, %cst_14 {dimension_numbers = #tpu.dot_dimension_numbers<[1], [0], [0], [1], [0, 0, 1, 1], [], []>} : vector<8x64xf32>, vector<64x256xf32>, vector<8x256xf32> -> vector<8x256xf32>
    %23 = vector.extract_strided_slice %22 {offsets = [0, 0], sizes = [8, 128], strides = [1, 1]} : vector<8x256xf32> to vector<8x128xf32>
    %24 = vector.extract_strided_slice %22 {offsets = [0, 128], sizes = [8, 128], strides = [1, 1]} : vector<8x256xf32> to vector<8x128xf32>
    %25 = vector.extract_strided_slice %18 {offsets = [0, 0], sizes = [8, 64], strides = [1, 1]} : vector<8x128xf32> to vector<8x64xf32>
    %26 = vector.extract_strided_slice %23 {offsets = [0, 0], sizes = [8, 64], strides = [1, 1]} : vector<8x128xf32> to vector<8x64xf32>
    %27 = arith.addf %25, %26 : vector<8x64xf32>
    %28 = arith.negf %27 : vector<8x64xf32>
    %29 = math.exp %28 : vector<8x64xf32>
    %cst_15 = arith.constant 1.000000e+00 : f32
    %30 = vector.broadcast %cst_15 : f32 to vector<8x64xf32>
    %31 = arith.addf %30, %29 : vector<8x64xf32>
    %32 = arith.divf %30, %31 : vector<8x64xf32>
    %33 = vector.extract_strided_slice %20 {offsets = [0, 0], sizes = [8, 64], strides = [1, 1]} : vector<8x128xf32> to vector<8x64xf32>
    %34 = vector.extract_strided_slice %24 {offsets = [0, 0], sizes = [8, 64], strides = [1, 1]} : vector<8x128xf32> to vector<8x64xf32>
    %35 = arith.addf %33, %34 : vector<8x64xf32>
    %36 = arith.negf %35 : vector<8x64xf32>
    %37 = math.exp %36 : vector<8x64xf32>
    %cst_16 = arith.constant 1.000000e+00 : f32
    %38 = vector.broadcast %cst_16 : f32 to vector<8x64xf32>
    %39 = arith.addf %38, %37 : vector<8x64xf32>
    %40 = arith.divf %38, %39 : vector<8x64xf32>
    %41 = vector.extract_strided_slice %18 {offsets = [0, 64], sizes = [8, 32], strides = [1, 1]} : vector<8x128xf32> to vector<8x32xf32>
    %42 = vector.extract_strided_slice %32 {offsets = [0, 0], sizes = [8, 32], strides = [1, 1]} : vector<8x64xf32> to vector<8x32xf32>
    %43 = vector.extract_strided_slice %23 {offsets = [0, 64], sizes = [8, 32], strides = [1, 1]} : vector<8x128xf32> to vector<8x32xf32>
    %44 = vector.broadcast %9 : vector<1x32xf32> to vector<8x32xf32>
    %45 = arith.addf %43, %44 : vector<8x32xf32>
    %46 = arith.mulf %42, %45 : vector<8x32xf32>
    %47 = arith.addf %41, %46 : vector<8x32xf32>
    %48 = math.tanh %47 : vector<8x32xf32>
    %49 = vector.extract_strided_slice %20 {offsets = [0, 64], sizes = [8, 32], strides = [1, 1]} : vector<8x128xf32> to vector<8x32xf32>
    %50 = vector.extract_strided_slice %40 {offsets = [0, 0], sizes = [8, 32], strides = [1, 1]} : vector<8x64xf32> to vector<8x32xf32>
    %51 = vector.extract_strided_slice %24 {offsets = [0, 64], sizes = [8, 32], strides = [1, 1]} : vector<8x128xf32> to vector<8x32xf32>
    %52 = vector.broadcast %10 : vector<1x32xf32> to vector<8x32xf32>
    %53 = arith.addf %51, %52 : vector<8x32xf32>
    %54 = arith.mulf %50, %53 : vector<8x32xf32>
    %55 = arith.addf %49, %54 : vector<8x32xf32>
    %56 = math.tanh %55 : vector<8x32xf32>
    %57 = vector.extract_strided_slice %32 {offsets = [0, 32], sizes = [8, 32], strides = [1, 1]} : vector<8x64xf32> to vector<8x32xf32>
    %58 = vector.extract_strided_slice %40 {offsets = [0, 32], sizes = [8, 32], strides = [1, 1]} : vector<8x64xf32> to vector<8x32xf32>
    %cst_17 = arith.constant 1.000000e+00 : f32
    %59 = vector.broadcast %cst_17 : f32 to vector<8x32xf32>
    %60 = arith.subf %59, %57 : vector<8x32xf32>
    %61 = arith.mulf %60, %48 : vector<8x32xf32>
    %62 = arith.mulf %57, %11 : vector<8x32xf32>
    %63 = arith.addf %61, %62 : vector<8x32xf32>
    %cst_18 = arith.constant 1.000000e+00 : f32
    %64 = vector.broadcast %cst_18 : f32 to vector<8x32xf32>
    %65 = arith.subf %64, %58 : vector<8x32xf32>
    %66 = arith.mulf %65, %56 : vector<8x32xf32>
    %67 = arith.mulf %58, %11 : vector<8x32xf32>
    %68 = arith.addf %66, %67 : vector<8x32xf32>
    %69 = arith.index_cast %14 : i32 to index
    %c0_19 = arith.constant 0 : index
    %70 = vector.load %arg1[%69, %c0_19] : memref<64x1xf32, #tpu.memory_space<vmem>>, vector<8x1xf32>
    %71 = arith.index_cast %16 : i32 to index
    %c0_20 = arith.constant 0 : index
    %72 = vector.load %arg1[%71, %c0_20] : memref<64x1xf32, #tpu.memory_space<vmem>>, vector<8x1xf32>
    %73 = arith.subf %63, %11 : vector<8x32xf32>
    %74 = vector.broadcast %70 : vector<8x1xf32> to vector<8x32xf32>
    %75 = arith.mulf %74, %73 : vector<8x32xf32>
    %76 = arith.addf %11, %75 : vector<8x32xf32>
    %77 = arith.subf %68, %11 : vector<8x32xf32>
    %78 = vector.broadcast %72 : vector<8x1xf32> to vector<8x32xf32>
    %79 = arith.mulf %78, %77 : vector<8x32xf32>
    %80 = arith.addf %11, %79 : vector<8x32xf32>
    %81 = vector.broadcast %70 : vector<8x1xf32> to vector<8x32xf32>
    %82 = arith.mulf %81, %76 : vector<8x32xf32>
    %83 = arith.index_cast %14 : i32 to index
    %c0_21 = arith.constant 0 : index
    %84 = vector.load %arg15[%83, %c0_21] : memref<64x32xf32, #tpu.memory_space<vmem>>, vector<8x32xf32>
    tpu.vector_store %arg15[%83, %c0_21], %82 {strides = array<i32>} : memref<64x32xf32, #tpu.memory_space<vmem>>, vector<8x32xf32>,
    %85 = vector.broadcast %72 : vector<8x1xf32> to vector<8x32xf32>
    %86 = arith.mulf %85, %80 : vector<8x32xf32>
    %87 = arith.index_cast %16 : i32 to index
    %c0_22 = arith.constant 0 : index
    %88 = vector.load %arg16[%87, %c0_22] : memref<64x32xf32, #tpu.memory_space<vmem>>, vector<8x32xf32>
    tpu.vector_store %arg16[%87, %c0_22], %86 {strides = array<i32>} : memref<64x32xf32, #tpu.memory_space<vmem>>, vector<8x32xf32>,
    %c1_i32 = arith.constant 1 : i32
    %c7_i32_23 = arith.constant 7 : i32
    %89 = arith.subi %c7_i32_23, %c1_i32 : i32
    %c8_i32_24 = arith.constant 8 : i32
    %90 = arith.muli %c1_i32, %c8_i32_24 : i32
    %91 = tpu.assume_multiple %90, 8 : i32
    %c8_i32_25 = arith.constant 8 : i32
    %92 = arith.muli %89, %c8_i32_25 : i32
    %93 = tpu.assume_multiple %92, 8 : i32
    %94 = arith.index_cast %91 : i32 to index
    %c0_26 = arith.constant 0 : index
    %95 = vector.load %arg14[%94, %c0_26] : memref<64x256xf32, #tpu.memory_space<vmem>>, vector<8x128xf32>
    %96 = arith.index_cast %93 : i32 to index
    %c128_27 = arith.constant 128 : index
    %97 = vector.load %arg14[%96, %c128_27] : memref<64x256xf32, #tpu.memory_space<vmem>>, vector<8x128xf32>
    %98 = tpu.concatenate %76, %80 in 1 : vector<8x32xf32>, vector<8x32xf32> -> vector<8x64xf32>
    %cst_28 = arith.constant dense<0.000000e+00> : vector<8x256xf32>
    %99 = tpu.matmul %98, %7, %cst_28 {dimension_numbers = #tpu.dot_dimension_numbers<[1], [0], [0], [1], [0, 0, 1, 1], [], []>} : vector<8x64xf32>, vector<64x256xf32>, vector<8x256xf32> -> vector<8x256xf32>
    %100 = vector.extract_strided_slice %99 {offsets = [0, 0], sizes = [8, 128], strides = [1, 1]} : vector<8x256xf32> to vector<8x128xf32>
    %101 = vector.extract_strided_slice %99 {offsets = [0, 128], sizes = [8, 128], strides = [1, 1]} : vector<8x256xf32> to vector<8x128xf32>
    %102 = vector.extract_strided_slice %95 {offsets = [0, 0], sizes = [8, 64], strides = [1, 1]} : vector<8x128xf32> to vector<8x64xf32>
    %103 = vector.extract_strided_slice %100 {offsets = [0, 0], sizes = [8, 64], strides = [1, 1]} : vector<8x128xf32> to vector<8x64xf32>
    %104 = arith.addf %102, %103 : vector<8x64xf32>
    %105 = arith.negf %104 : vector<8x64xf32>
    %106 = math.exp %105 : vector<8x64xf32>
    %cst_29 = arith.constant 1.000000e+00 : f32
    %107 = vector.broadcast %cst_29 : f32 to vector<8x64xf32>
    %108 = arith.addf %107, %106 : vector<8x64xf32>
    %109 = arith.divf %107, %108 : vector<8x64xf32>
    %110 = vector.extract_strided_slice %97 {offsets = [0, 0], sizes = [8, 64], strides = [1, 1]} : vector<8x128xf32> to vector<8x64xf32>
    %111 = vector.extract_strided_slice %101 {offsets = [0, 0], sizes = [8, 64], strides = [1, 1]} : vector<8x128xf32> to vector<8x64xf32>
    %112 = arith.addf %110, %111 : vector<8x64xf32>
    %113 = arith.negf %112 : vector<8x64xf32>
    %114 = math.exp %113 : vector<8x64xf32>
    %cst_30 = arith.constant 1.000000e+00 : f32
    %115 = vector.broadcast %cst_30 : f32 to vector<8x64xf32>
    %116 = arith.addf %115, %114 : vector<8x64xf32>
    %117 = arith.divf %115, %116 : vector<8x64xf32>
    %118 = vector.extract_strided_slice %95 {offsets = [0, 64], sizes = [8, 32], strides = [1, 1]} : vector<8x128xf32> to vector<8x32xf32>
    %119 = vector.extract_strided_slice %109 {offsets = [0, 0], sizes = [8, 32], strides = [1, 1]} : vector<8x64xf32> to vector<8x32xf32>
    %120 = vector.extract_strided_slice %100 {offsets = [0, 64], sizes = [8, 32], strides = [1, 1]} : vector<8x128xf32> to vector<8x32xf32>
    %121 = vector.broadcast %9 : vector<1x32xf32> to vector<8x32xf32>
    %122 = arith.addf %120, %121 : vector<8x32xf32>
    %123 = arith.mulf %119, %122 : vector<8x32xf32>
    %124 = arith.addf %118, %123 : vector<8x32xf32>
    %125 = math.tanh %124 : vector<8x32xf32>
    %126 = vector.extract_strided_slice %97 {offsets = [0, 64], sizes = [8, 32], strides = [1, 1]} : vector<8x128xf32> to vector<8x32xf32>
    %127 = vector.extract_strided_slice %117 {offsets = [0, 0], sizes = [8, 32], strides = [1, 1]} : vector<8x64xf32> to vector<8x32xf32>
    %128 = vector.extract_strided_slice %101 {offsets = [0, 64], sizes = [8, 32], strides = [1, 1]} : vector<8x128xf32> to vector<8x32xf32>
    %129 = vector.broadcast %10 : vector<1x32xf32> to vector<8x32xf32>
    %130 = arith.addf %128, %129 : vector<8x32xf32>
    %131 = arith.mulf %127, %130 : vector<8x32xf32>
    %132 = arith.addf %126, %131 : vector<8x32xf32>
    %133 = math.tanh %132 : vector<8x32xf32>
    %134 = vector.extract_strided_slice %109 {offsets = [0, 32], sizes = [8, 32], strides = [1, 1]} : vector<8x64xf32> to vector<8x32xf32>
    %135 = vector.extract_strided_slice %117 {offsets = [0, 32], sizes = [8, 32], strides = [1, 1]} : vector<8x64xf32> to vector<8x32xf32>
    %cst_31 = arith.constant 1.000000e+00 : f32
    %136 = vector.broadcast %cst_31 : f32 to vector<8x32xf32>
    %137 = arith.subf %136, %134 : vector<8x32xf32>
    %138 = arith.mulf %137, %125 : vector<8x32xf32>
    %139 = arith.mulf %134, %76 : vector<8x32xf32>
    %140 = arith.addf %138, %139 : vector<8x32xf32>
    %cst_32 = arith.constant 1.000000e+00 : f32
    %141 = vector.broadcast %cst_32 : f32 to vector<8x32xf32>
    %142 = arith.subf %141, %135 : vector<8x32xf32>
    %143 = arith.mulf %142, %133 : vector<8x32xf32>
    %144 = arith.mulf %135, %80 : vector<8x32xf32>
    %145 = arith.addf %143, %144 : vector<8x32xf32>
    %146 = arith.index_cast %91 : i32 to index
    %c0_33 = arith.constant 0 : index
    %147 = vector.load %arg1[%146, %c0_33] : memref<64x1xf32, #tpu.memory_space<vmem>>, vector<8x1xf32>
    %148 = arith.index_cast %93 : i32 to index
    %c0_34 = arith.constant 0 : index
    %149 = vector.load %arg1[%148, %c0_34] : memref<64x1xf32, #tpu.memory_space<vmem>>, vector<8x1xf32>
    %150 = arith.subf %140, %76 : vector<8x32xf32>
    %151 = vector.broadcast %147 : vector<8x1xf32> to vector<8x32xf32>
    %152 = arith.mulf %151, %150 : vector<8x32xf32>
    %153 = arith.addf %76, %152 : vector<8x32xf32>
    %154 = arith.subf %145, %80 : vector<8x32xf32>
    %155 = vector.broadcast %149 : vector<8x1xf32> to vector<8x32xf32>
    %156 = arith.mulf %155, %154 : vector<8x32xf32>
    %157 = arith.addf %80, %156 : vector<8x32xf32>
    %158 = vector.broadcast %147 : vector<8x1xf32> to vector<8x32xf32>
    %159 = arith.mulf %158, %153 : vector<8x32xf32>
    %160 = arith.index_cast %91 : i32 to index
    %c0_35 = arith.constant 0 : index
    %161 = vector.load %arg15[%160, %c0_35] : memref<64x32xf32, #tpu.memory_space<vmem>>, vector<8x32xf32>
    tpu.vector_store %arg15[%160, %c0_35], %159 {strides = array<i32>} : memref<64x32xf32, #tpu.memory_space<vmem>>, vector<8x32xf32>,
    %162 = vector.broadcast %149 : vector<8x1xf32> to vector<8x32xf32>
    %163 = arith.mulf %162, %157 : vector<8x32xf32>
    %164 = arith.index_cast %93 : i32 to index
    %c0_36 = arith.constant 0 : index
    %165 = vector.load %arg16[%164, %c0_36] : memref<64x32xf32, #tpu.memory_space<vmem>>, vector<8x32xf32>
    tpu.vector_store %arg16[%164, %c0_36], %163 {strides = array<i32>} : memref<64x32xf32, #tpu.memory_space<vmem>>, vector<8x32xf32>,
    %c2_i32 = arith.constant 2 : i32
    %c7_i32_37 = arith.constant 7 : i32
    %166 = arith.subi %c7_i32_37, %c2_i32 : i32
    %c8_i32_38 = arith.constant 8 : i32
    %167 = arith.muli %c2_i32, %c8_i32_38 : i32
    %168 = tpu.assume_multiple %167, 8 : i32
    %c8_i32_39 = arith.constant 8 : i32
    %169 = arith.muli %166, %c8_i32_39 : i32
    %170 = tpu.assume_multiple %169, 8 : i32
    %171 = arith.index_cast %168 : i32 to index
    %c0_40 = arith.constant 0 : index
    %172 = vector.load %arg14[%171, %c0_40] : memref<64x256xf32, #tpu.memory_space<vmem>>, vector<8x128xf32>
    %173 = arith.index_cast %170 : i32 to index
    %c128_41 = arith.constant 128 : index
    %174 = vector.load %arg14[%173, %c128_41] : memref<64x256xf32, #tpu.memory_space<vmem>>, vector<8x128xf32>
    %175 = tpu.concatenate %153, %157 in 1 : vector<8x32xf32>, vector<8x32xf32> -> vector<8x64xf32>
    %cst_42 = arith.constant dense<0.000000e+00> : vector<8x256xf32>
    %176 = tpu.matmul %175, %7, %cst_42 {dimension_numbers = #tpu.dot_dimension_numbers<[1], [0], [0], [1], [0, 0, 1, 1], [], []>} : vector<8x64xf32>, vector<64x256xf32>, vector<8x256xf32> -> vector<8x256xf32>
    %177 = vector.extract_strided_slice %176 {offsets = [0, 0], sizes = [8, 128], strides = [1, 1]} : vector<8x256xf32> to vector<8x128xf32>
    %178 = vector.extract_strided_slice %176 {offsets = [0, 128], sizes = [8, 128], strides = [1, 1]} : vector<8x256xf32> to vector<8x128xf32>
    %179 = vector.extract_strided_slice %172 {offsets = [0, 0], sizes = [8, 64], strides = [1, 1]} : vector<8x128xf32> to vector<8x64xf32>
    %180 = vector.extract_strided_slice %177 {offsets = [0, 0], sizes = [8, 64], strides = [1, 1]} : vector<8x128xf32> to vector<8x64xf32>
    %181 = arith.addf %179, %180 : vector<8x64xf32>
    %182 = arith.negf %181 : vector<8x64xf32>
    %183 = math.exp %182 : vector<8x64xf32>
    %cst_43 = arith.constant 1.000000e+00 : f32
    %184 = vector.broadcast %cst_43 : f32 to vector<8x64xf32>
    %185 = arith.addf %184, %183 : vector<8x64xf32>
    %186 = arith.divf %184, %185 : vector<8x64xf32>
    %187 = vector.extract_strided_slice %174 {offsets = [0, 0], sizes = [8, 64], strides = [1, 1]} : vector<8x128xf32> to vector<8x64xf32>
    %188 = vector.extract_strided_slice %178 {offsets = [0, 0], sizes = [8, 64], strides = [1, 1]} : vector<8x128xf32> to vector<8x64xf32>
    %189 = arith.addf %187, %188 : vector<8x64xf32>
    %190 = arith.negf %189 : vector<8x64xf32>
    %191 = math.exp %190 : vector<8x64xf32>
    %cst_44 = arith.constant 1.000000e+00 : f32
    %192 = vector.broadcast %cst_44 : f32 to vector<8x64xf32>
    %193 = arith.addf %192, %191 : vector<8x64xf32>
    %194 = arith.divf %192, %193 : vector<8x64xf32>
    %195 = vector.extract_strided_slice %172 {offsets = [0, 64], sizes = [8, 32], strides = [1, 1]} : vector<8x128xf32> to vector<8x32xf32>
    %196 = vector.extract_strided_slice %186 {offsets = [0, 0], sizes = [8, 32], strides = [1, 1]} : vector<8x64xf32> to vector<8x32xf32>
    %197 = vector.extract_strided_slice %177 {offsets = [0, 64], sizes = [8, 32], strides = [1, 1]} : vector<8x128xf32> to vector<8x32xf32>
    %198 = vector.broadcast %9 : vector<1x32xf32> to vector<8x32xf32>
    %199 = arith.addf %197, %198 : vector<8x32xf32>
    %200 = arith.mulf %196, %199 : vector<8x32xf32>
    %201 = arith.addf %195, %200 : vector<8x32xf32>
    %202 = math.tanh %201 : vector<8x32xf32>
    %203 = vector.extract_strided_slice %174 {offsets = [0, 64], sizes = [8, 32], strides = [1, 1]} : vector<8x128xf32> to vector<8x32xf32>
    %204 = vector.extract_strided_slice %194 {offsets = [0, 0], sizes = [8, 32], strides = [1, 1]} : vector<8x64xf32> to vector<8x32xf32>
    %205 = vector.extract_strided_slice %178 {offsets = [0, 64], sizes = [8, 32], strides = [1, 1]} : vector<8x128xf32> to vector<8x32xf32>
    %206 = vector.broadcast %10 : vector<1x32xf32> to vector<8x32xf32>
    %207 = arith.addf %205, %206 : vector<8x32xf32>
    %208 = arith.mulf %204, %207 : vector<8x32xf32>
    %209 = arith.addf %203, %208 : vector<8x32xf32>
    %210 = math.tanh %209 : vector<8x32xf32>
    %211 = vector.extract_strided_slice %186 {offsets = [0, 32], sizes = [8, 32], strides = [1, 1]} : vector<8x64xf32> to vector<8x32xf32>
    %212 = vector.extract_strided_slice %194 {offsets = [0, 32], sizes = [8, 32], strides = [1, 1]} : vector<8x64xf32> to vector<8x32xf32>
    %cst_45 = arith.constant 1.000000e+00 : f32
    %213 = vector.broadcast %cst_45 : f32 to vector<8x32xf32>
    %214 = arith.subf %213, %211 : vector<8x32xf32>
    %215 = arith.mulf %214, %202 : vector<8x32xf32>
    %216 = arith.mulf %211, %153 : vector<8x32xf32>
    %217 = arith.addf %215, %216 : vector<8x32xf32>
    %cst_46 = arith.constant 1.000000e+00 : f32
    %218 = vector.broadcast %cst_46 : f32 to vector<8x32xf32>
    %219 = arith.subf %218, %212 : vector<8x32xf32>
    %220 = arith.mulf %219, %210 : vector<8x32xf32>
    %221 = arith.mulf %212, %157 : vector<8x32xf32>
    %222 = arith.addf %220, %221 : vector<8x32xf32>
    %223 = arith.index_cast %168 : i32 to index
    %c0_47 = arith.constant 0 : index
    %224 = vector.load %arg1[%223, %c0_47] : memref<64x1xf32, #tpu.memory_space<vmem>>, vector<8x1xf32>
    %225 = arith.index_cast %170 : i32 to index
    %c0_48 = arith.constant 0 : index
    %226 = vector.load %arg1[%225, %c0_48] : memref<64x1xf32, #tpu.memory_space<vmem>>, vector<8x1xf32>
    %227 = arith.subf %217, %153 : vector<8x32xf32>
    %228 = vector.broadcast %224 : vector<8x1xf32> to vector<8x32xf32>
    %229 = arith.mulf %228, %227 : vector<8x32xf32>
    %230 = arith.addf %153, %229 : vector<8x32xf32>
    %231 = arith.subf %222, %157 : vector<8x32xf32>
    %232 = vector.broadcast %226 : vector<8x1xf32> to vector<8x32xf32>
    %233 = arith.mulf %232, %231 : vector<8x32xf32>
    %234 = arith.addf %157, %233 : vector<8x32xf32>
    %235 = vector.broadcast %224 : vector<8x1xf32> to vector<8x32xf32>
    %236 = arith.mulf %235, %230 : vector<8x32xf32>
    %237 = arith.index_cast %168 : i32 to index
    %c0_49 = arith.constant 0 : index
    %238 = vector.load %arg15[%237, %c0_49] : memref<64x32xf32, #tpu.memory_space<vmem>>, vector<8x32xf32>
    tpu.vector_store %arg15[%237, %c0_49], %236 {strides = array<i32>} : memref<64x32xf32, #tpu.memory_space<vmem>>, vector<8x32xf32>,
    %239 = vector.broadcast %226 : vector<8x1xf32> to vector<8x32xf32>
    %240 = arith.mulf %239, %234 : vector<8x32xf32>
    %241 = arith.index_cast %170 : i32 to index
    %c0_50 = arith.constant 0 : index
    %242 = vector.load %arg16[%241, %c0_50] : memref<64x32xf32, #tpu.memory_space<vmem>>, vector<8x32xf32>
    tpu.vector_store %arg16[%241, %c0_50], %240 {strides = array<i32>} : memref<64x32xf32, #tpu.memory_space<vmem>>, vector<8x32xf32>,
    %c3_i32 = arith.constant 3 : i32
    %c7_i32_51 = arith.constant 7 : i32
    %243 = arith.subi %c7_i32_51, %c3_i32 : i32
    %c8_i32_52 = arith.constant 8 : i32
    %244 = arith.muli %c3_i32, %c8_i32_52 : i32
    %245 = tpu.assume_multiple %244, 8 : i32
    %c8_i32_53 = arith.constant 8 : i32
    %246 = arith.muli %243, %c8_i32_53 : i32
    %247 = tpu.assume_multiple %246, 8 : i32
    %248 = arith.index_cast %245 : i32 to index
    %c0_54 = arith.constant 0 : index
    %249 = vector.load %arg14[%248, %c0_54] : memref<64x256xf32, #tpu.memory_space<vmem>>, vector<8x128xf32>
    %250 = arith.index_cast %247 : i32 to index
    %c128_55 = arith.constant 128 : index
    %251 = vector.load %arg14[%250, %c128_55] : memref<64x256xf32, #tpu.memory_space<vmem>>, vector<8x128xf32>
    %252 = tpu.concatenate %230, %234 in 1 : vector<8x32xf32>, vector<8x32xf32> -> vector<8x64xf32>
    %cst_56 = arith.constant dense<0.000000e+00> : vector<8x256xf32>
    %253 = tpu.matmul %252, %7, %cst_56 {dimension_numbers = #tpu.dot_dimension_numbers<[1], [0], [0], [1], [0, 0, 1, 1], [], []>} : vector<8x64xf32>, vector<64x256xf32>, vector<8x256xf32> -> vector<8x256xf32>
    %254 = vector.extract_strided_slice %253 {offsets = [0, 0], sizes = [8, 128], strides = [1, 1]} : vector<8x256xf32> to vector<8x128xf32>
    %255 = vector.extract_strided_slice %253 {offsets = [0, 128], sizes = [8, 128], strides = [1, 1]} : vector<8x256xf32> to vector<8x128xf32>
    %256 = vector.extract_strided_slice %249 {offsets = [0, 0], sizes = [8, 64], strides = [1, 1]} : vector<8x128xf32> to vector<8x64xf32>
    %257 = vector.extract_strided_slice %254 {offsets = [0, 0], sizes = [8, 64], strides = [1, 1]} : vector<8x128xf32> to vector<8x64xf32>
    %258 = arith.addf %256, %257 : vector<8x64xf32>
    %259 = arith.negf %258 : vector<8x64xf32>
    %260 = math.exp %259 : vector<8x64xf32>
    %cst_57 = arith.constant 1.000000e+00 : f32
    %261 = vector.broadcast %cst_57 : f32 to vector<8x64xf32>
    %262 = arith.addf %261, %260 : vector<8x64xf32>
    %263 = arith.divf %261, %262 : vector<8x64xf32>
    %264 = vector.extract_strided_slice %251 {offsets = [0, 0], sizes = [8, 64], strides = [1, 1]} : vector<8x128xf32> to vector<8x64xf32>
    %265 = vector.extract_strided_slice %255 {offsets = [0, 0], sizes = [8, 64], strides = [1, 1]} : vector<8x128xf32> to vector<8x64xf32>
    %266 = arith.addf %264, %265 : vector<8x64xf32>
    %267 = arith.negf %266 : vector<8x64xf32>
    %268 = math.exp %267 : vector<8x64xf32>
    %cst_58 = arith.constant 1.000000e+00 : f32
    %269 = vector.broadcast %cst_58 : f32 to vector<8x64xf32>
    %270 = arith.addf %269, %268 : vector<8x64xf32>
    %271 = arith.divf %269, %270 : vector<8x64xf32>
    %272 = vector.extract_strided_slice %249 {offsets = [0, 64], sizes = [8, 32], strides = [1, 1]} : vector<8x128xf32> to vector<8x32xf32>
    %273 = vector.extract_strided_slice %263 {offsets = [0, 0], sizes = [8, 32], strides = [1, 1]} : vector<8x64xf32> to vector<8x32xf32>
    %274 = vector.extract_strided_slice %254 {offsets = [0, 64], sizes = [8, 32], strides = [1, 1]} : vector<8x128xf32> to vector<8x32xf32>
    %275 = vector.broadcast %9 : vector<1x32xf32> to vector<8x32xf32>
    %276 = arith.addf %274, %275 : vector<8x32xf32>
    %277 = arith.mulf %273, %276 : vector<8x32xf32>
    %278 = arith.addf %272, %277 : vector<8x32xf32>
    %279 = math.tanh %278 : vector<8x32xf32>
    %280 = vector.extract_strided_slice %251 {offsets = [0, 64], sizes = [8, 32], strides = [1, 1]} : vector<8x128xf32> to vector<8x32xf32>
    %281 = vector.extract_strided_slice %271 {offsets = [0, 0], sizes = [8, 32], strides = [1, 1]} : vector<8x64xf32> to vector<8x32xf32>
    %282 = vector.extract_strided_slice %255 {offsets = [0, 64], sizes = [8, 32], strides = [1, 1]} : vector<8x128xf32> to vector<8x32xf32>
    %283 = vector.broadcast %10 : vector<1x32xf32> to vector<8x32xf32>
    %284 = arith.addf %282, %283 : vector<8x32xf32>
    %285 = arith.mulf %281, %284 : vector<8x32xf32>
    %286 = arith.addf %280, %285 : vector<8x32xf32>
    %287 = math.tanh %286 : vector<8x32xf32>
    %288 = vector.extract_strided_slice %263 {offsets = [0, 32], sizes = [8, 32], strides = [1, 1]} : vector<8x64xf32> to vector<8x32xf32>
    %289 = vector.extract_strided_slice %271 {offsets = [0, 32], sizes = [8, 32], strides = [1, 1]} : vector<8x64xf32> to vector<8x32xf32>
    %cst_59 = arith.constant 1.000000e+00 : f32
    %290 = vector.broadcast %cst_59 : f32 to vector<8x32xf32>
    %291 = arith.subf %290, %288 : vector<8x32xf32>
    %292 = arith.mulf %291, %279 : vector<8x32xf32>
    %293 = arith.mulf %288, %230 : vector<8x32xf32>
    %294 = arith.addf %292, %293 : vector<8x32xf32>
    %cst_60 = arith.constant 1.000000e+00 : f32
    %295 = vector.broadcast %cst_60 : f32 to vector<8x32xf32>
    %296 = arith.subf %295, %289 : vector<8x32xf32>
    %297 = arith.mulf %296, %287 : vector<8x32xf32>
    %298 = arith.mulf %289, %234 : vector<8x32xf32>
    %299 = arith.addf %297, %298 : vector<8x32xf32>
    %300 = arith.index_cast %245 : i32 to index
    %c0_61 = arith.constant 0 : index
    %301 = vector.load %arg1[%300, %c0_61] : memref<64x1xf32, #tpu.memory_space<vmem>>, vector<8x1xf32>
    %302 = arith.index_cast %247 : i32 to index
    %c0_62 = arith.constant 0 : index
    %303 = vector.load %arg1[%302, %c0_62] : memref<64x1xf32, #tpu.memory_space<vmem>>, vector<8x1xf32>
    %304 = arith.subf %294, %230 : vector<8x32xf32>
    %305 = vector.broadcast %301 : vector<8x1xf32> to vector<8x32xf32>
    %306 = arith.mulf %305, %304 : vector<8x32xf32>
    %307 = arith.addf %230, %306 : vector<8x32xf32>
    %308 = arith.subf %299, %234 : vector<8x32xf32>
    %309 = vector.broadcast %303 : vector<8x1xf32> to vector<8x32xf32>
    %310 = arith.mulf %309, %308 : vector<8x32xf32>
    %311 = arith.addf %234, %310 : vector<8x32xf32>
    %312 = vector.broadcast %301 : vector<8x1xf32> to vector<8x32xf32>
    %313 = arith.mulf %312, %307 : vector<8x32xf32>
    %314 = arith.index_cast %245 : i32 to index
    %c0_63 = arith.constant 0 : index
    %315 = vector.load %arg15[%314, %c0_63] : memref<64x32xf32, #tpu.memory_space<vmem>>, vector<8x32xf32>
    tpu.vector_store %arg15[%314, %c0_63], %313 {strides = array<i32>} : memref<64x32xf32, #tpu.memory_space<vmem>>, vector<8x32xf32>,
    %316 = vector.broadcast %303 : vector<8x1xf32> to vector<8x32xf32>
    %317 = arith.mulf %316, %311 : vector<8x32xf32>
    %318 = arith.index_cast %247 : i32 to index
    %c0_64 = arith.constant 0 : index
    %319 = vector.load %arg16[%318, %c0_64] : memref<64x32xf32, #tpu.memory_space<vmem>>, vector<8x32xf32>
    tpu.vector_store %arg16[%318, %c0_64], %317 {strides = array<i32>} : memref<64x32xf32, #tpu.memory_space<vmem>>, vector<8x32xf32>,
    %c4_i32 = arith.constant 4 : i32
    %c7_i32_65 = arith.constant 7 : i32
    %320 = arith.subi %c7_i32_65, %c4_i32 : i32
    %c8_i32_66 = arith.constant 8 : i32
    %321 = arith.muli %c4_i32, %c8_i32_66 : i32
    %322 = tpu.assume_multiple %321, 8 : i32
    %c8_i32_67 = arith.constant 8 : i32
    %323 = arith.muli %320, %c8_i32_67 : i32
    %324 = tpu.assume_multiple %323, 8 : i32
    %325 = arith.index_cast %322 : i32 to index
    %c0_68 = arith.constant 0 : index
    %326 = vector.load %arg14[%325, %c0_68] : memref<64x256xf32, #tpu.memory_space<vmem>>, vector<8x128xf32>
    %327 = arith.index_cast %324 : i32 to index
    %c128_69 = arith.constant 128 : index
    %328 = vector.load %arg14[%327, %c128_69] : memref<64x256xf32, #tpu.memory_space<vmem>>, vector<8x128xf32>
    %329 = tpu.concatenate %307, %311 in 1 : vector<8x32xf32>, vector<8x32xf32> -> vector<8x64xf32>
    %cst_70 = arith.constant dense<0.000000e+00> : vector<8x256xf32>
    %330 = tpu.matmul %329, %7, %cst_70 {dimension_numbers = #tpu.dot_dimension_numbers<[1], [0], [0], [1], [0, 0, 1, 1], [], []>} : vector<8x64xf32>, vector<64x256xf32>, vector<8x256xf32> -> vector<8x256xf32>
    %331 = vector.extract_strided_slice %330 {offsets = [0, 0], sizes = [8, 128], strides = [1, 1]} : vector<8x256xf32> to vector<8x128xf32>
    %332 = vector.extract_strided_slice %330 {offsets = [0, 128], sizes = [8, 128], strides = [1, 1]} : vector<8x256xf32> to vector<8x128xf32>
    %333 = vector.extract_strided_slice %326 {offsets = [0, 0], sizes = [8, 64], strides = [1, 1]} : vector<8x128xf32> to vector<8x64xf32>
    %334 = vector.extract_strided_slice %331 {offsets = [0, 0], sizes = [8, 64], strides = [1, 1]} : vector<8x128xf32> to vector<8x64xf32>
    %335 = arith.addf %333, %334 : vector<8x64xf32>
    %336 = arith.negf %335 : vector<8x64xf32>
    %337 = math.exp %336 : vector<8x64xf32>
    %cst_71 = arith.constant 1.000000e+00 : f32
    %338 = vector.broadcast %cst_71 : f32 to vector<8x64xf32>
    %339 = arith.addf %338, %337 : vector<8x64xf32>
    %340 = arith.divf %338, %339 : vector<8x64xf32>
    %341 = vector.extract_strided_slice %328 {offsets = [0, 0], sizes = [8, 64], strides = [1, 1]} : vector<8x128xf32> to vector<8x64xf32>
    %342 = vector.extract_strided_slice %332 {offsets = [0, 0], sizes = [8, 64], strides = [1, 1]} : vector<8x128xf32> to vector<8x64xf32>
    %343 = arith.addf %341, %342 : vector<8x64xf32>
    %344 = arith.negf %343 : vector<8x64xf32>
    %345 = math.exp %344 : vector<8x64xf32>
    %cst_72 = arith.constant 1.000000e+00 : f32
    %346 = vector.broadcast %cst_72 : f32 to vector<8x64xf32>
    %347 = arith.addf %346, %345 : vector<8x64xf32>
    %348 = arith.divf %346, %347 : vector<8x64xf32>
    %349 = vector.extract_strided_slice %326 {offsets = [0, 64], sizes = [8, 32], strides = [1, 1]} : vector<8x128xf32> to vector<8x32xf32>
    %350 = vector.extract_strided_slice %340 {offsets = [0, 0], sizes = [8, 32], strides = [1, 1]} : vector<8x64xf32> to vector<8x32xf32>
    %351 = vector.extract_strided_slice %331 {offsets = [0, 64], sizes = [8, 32], strides = [1, 1]} : vector<8x128xf32> to vector<8x32xf32>
    %352 = vector.broadcast %9 : vector<1x32xf32> to vector<8x32xf32>
    %353 = arith.addf %351, %352 : vector<8x32xf32>
    %354 = arith.mulf %350, %353 : vector<8x32xf32>
    %355 = arith.addf %349, %354 : vector<8x32xf32>
    %356 = math.tanh %355 : vector<8x32xf32>
    %357 = vector.extract_strided_slice %328 {offsets = [0, 64], sizes = [8, 32], strides = [1, 1]} : vector<8x128xf32> to vector<8x32xf32>
    %358 = vector.extract_strided_slice %348 {offsets = [0, 0], sizes = [8, 32], strides = [1, 1]} : vector<8x64xf32> to vector<8x32xf32>
    %359 = vector.extract_strided_slice %332 {offsets = [0, 64], sizes = [8, 32], strides = [1, 1]} : vector<8x128xf32> to vector<8x32xf32>
    %360 = vector.broadcast %10 : vector<1x32xf32> to vector<8x32xf32>
    %361 = arith.addf %359, %360 : vector<8x32xf32>
    %362 = arith.mulf %358, %361 : vector<8x32xf32>
    %363 = arith.addf %357, %362 : vector<8x32xf32>
    %364 = math.tanh %363 : vector<8x32xf32>
    %365 = vector.extract_strided_slice %340 {offsets = [0, 32], sizes = [8, 32], strides = [1, 1]} : vector<8x64xf32> to vector<8x32xf32>
    %366 = vector.extract_strided_slice %348 {offsets = [0, 32], sizes = [8, 32], strides = [1, 1]} : vector<8x64xf32> to vector<8x32xf32>
    %cst_73 = arith.constant 1.000000e+00 : f32
    %367 = vector.broadcast %cst_73 : f32 to vector<8x32xf32>
    %368 = arith.subf %367, %365 : vector<8x32xf32>
    %369 = arith.mulf %368, %356 : vector<8x32xf32>
    %370 = arith.mulf %365, %307 : vector<8x32xf32>
    %371 = arith.addf %369, %370 : vector<8x32xf32>
    %cst_74 = arith.constant 1.000000e+00 : f32
    %372 = vector.broadcast %cst_74 : f32 to vector<8x32xf32>
    %373 = arith.subf %372, %366 : vector<8x32xf32>
    %374 = arith.mulf %373, %364 : vector<8x32xf32>
    %375 = arith.mulf %366, %311 : vector<8x32xf32>
    %376 = arith.addf %374, %375 : vector<8x32xf32>
    %377 = arith.index_cast %322 : i32 to index
    %c0_75 = arith.constant 0 : index
    %378 = vector.load %arg1[%377, %c0_75] : memref<64x1xf32, #tpu.memory_space<vmem>>, vector<8x1xf32>
    %379 = arith.index_cast %324 : i32 to index
    %c0_76 = arith.constant 0 : index
    %380 = vector.load %arg1[%379, %c0_76] : memref<64x1xf32, #tpu.memory_space<vmem>>, vector<8x1xf32>
    %381 = arith.subf %371, %307 : vector<8x32xf32>
    %382 = vector.broadcast %378 : vector<8x1xf32> to vector<8x32xf32>
    %383 = arith.mulf %382, %381 : vector<8x32xf32>
    %384 = arith.addf %307, %383 : vector<8x32xf32>
    %385 = arith.subf %376, %311 : vector<8x32xf32>
    %386 = vector.broadcast %380 : vector<8x1xf32> to vector<8x32xf32>
    %387 = arith.mulf %386, %385 : vector<8x32xf32>
    %388 = arith.addf %311, %387 : vector<8x32xf32>
    %389 = vector.broadcast %378 : vector<8x1xf32> to vector<8x32xf32>
    %390 = arith.mulf %389, %384 : vector<8x32xf32>
    %391 = arith.index_cast %322 : i32 to index
    %c0_77 = arith.constant 0 : index
    %392 = vector.load %arg15[%391, %c0_77] : memref<64x32xf32, #tpu.memory_space<vmem>>, vector<8x32xf32>
    tpu.vector_store %arg15[%391, %c0_77], %390 {strides = array<i32>} : memref<64x32xf32, #tpu.memory_space<vmem>>, vector<8x32xf32>,
    %393 = vector.broadcast %380 : vector<8x1xf32> to vector<8x32xf32>
    %394 = arith.mulf %393, %388 : vector<8x32xf32>
    %395 = arith.index_cast %324 : i32 to index
    %c0_78 = arith.constant 0 : index
    %396 = vector.load %arg16[%395, %c0_78] : memref<64x32xf32, #tpu.memory_space<vmem>>, vector<8x32xf32>
    tpu.vector_store %arg16[%395, %c0_78], %394 {strides = array<i32>} : memref<64x32xf32, #tpu.memory_space<vmem>>, vector<8x32xf32>,
    %c5_i32 = arith.constant 5 : i32
    %c7_i32_79 = arith.constant 7 : i32
    %397 = arith.subi %c7_i32_79, %c5_i32 : i32
    %c8_i32_80 = arith.constant 8 : i32
    %398 = arith.muli %c5_i32, %c8_i32_80 : i32
    %399 = tpu.assume_multiple %398, 8 : i32
    %c8_i32_81 = arith.constant 8 : i32
    %400 = arith.muli %397, %c8_i32_81 : i32
    %401 = tpu.assume_multiple %400, 8 : i32
    %402 = arith.index_cast %399 : i32 to index
    %c0_82 = arith.constant 0 : index
    %403 = vector.load %arg14[%402, %c0_82] : memref<64x256xf32, #tpu.memory_space<vmem>>, vector<8x128xf32>
    %404 = arith.index_cast %401 : i32 to index
    %c128_83 = arith.constant 128 : index
    %405 = vector.load %arg14[%404, %c128_83] : memref<64x256xf32, #tpu.memory_space<vmem>>, vector<8x128xf32>
    %406 = tpu.concatenate %384, %388 in 1 : vector<8x32xf32>, vector<8x32xf32> -> vector<8x64xf32>
    %cst_84 = arith.constant dense<0.000000e+00> : vector<8x256xf32>
    %407 = tpu.matmul %406, %7, %cst_84 {dimension_numbers = #tpu.dot_dimension_numbers<[1], [0], [0], [1], [0, 0, 1, 1], [], []>} : vector<8x64xf32>, vector<64x256xf32>, vector<8x256xf32> -> vector<8x256xf32>
    %408 = vector.extract_strided_slice %407 {offsets = [0, 0], sizes = [8, 128], strides = [1, 1]} : vector<8x256xf32> to vector<8x128xf32>
    %409 = vector.extract_strided_slice %407 {offsets = [0, 128], sizes = [8, 128], strides = [1, 1]} : vector<8x256xf32> to vector<8x128xf32>
    %410 = vector.extract_strided_slice %403 {offsets = [0, 0], sizes = [8, 64], strides = [1, 1]} : vector<8x128xf32> to vector<8x64xf32>
    %411 = vector.extract_strided_slice %408 {offsets = [0, 0], sizes = [8, 64], strides = [1, 1]} : vector<8x128xf32> to vector<8x64xf32>
    %412 = arith.addf %410, %411 : vector<8x64xf32>
    %413 = arith.negf %412 : vector<8x64xf32>
    %414 = math.exp %413 : vector<8x64xf32>
    %cst_85 = arith.constant 1.000000e+00 : f32
    %415 = vector.broadcast %cst_85 : f32 to vector<8x64xf32>
    %416 = arith.addf %415, %414 : vector<8x64xf32>
    %417 = arith.divf %415, %416 : vector<8x64xf32>
    %418 = vector.extract_strided_slice %405 {offsets = [0, 0], sizes = [8, 64], strides = [1, 1]} : vector<8x128xf32> to vector<8x64xf32>
    %419 = vector.extract_strided_slice %409 {offsets = [0, 0], sizes = [8, 64], strides = [1, 1]} : vector<8x128xf32> to vector<8x64xf32>
    %420 = arith.addf %418, %419 : vector<8x64xf32>
    %421 = arith.negf %420 : vector<8x64xf32>
    %422 = math.exp %421 : vector<8x64xf32>
    %cst_86 = arith.constant 1.000000e+00 : f32
    %423 = vector.broadcast %cst_86 : f32 to vector<8x64xf32>
    %424 = arith.addf %423, %422 : vector<8x64xf32>
    %425 = arith.divf %423, %424 : vector<8x64xf32>
    %426 = vector.extract_strided_slice %403 {offsets = [0, 64], sizes = [8, 32], strides = [1, 1]} : vector<8x128xf32> to vector<8x32xf32>
    %427 = vector.extract_strided_slice %417 {offsets = [0, 0], sizes = [8, 32], strides = [1, 1]} : vector<8x64xf32> to vector<8x32xf32>
    %428 = vector.extract_strided_slice %408 {offsets = [0, 64], sizes = [8, 32], strides = [1, 1]} : vector<8x128xf32> to vector<8x32xf32>
    %429 = vector.broadcast %9 : vector<1x32xf32> to vector<8x32xf32>
    %430 = arith.addf %428, %429 : vector<8x32xf32>
    %431 = arith.mulf %427, %430 : vector<8x32xf32>
    %432 = arith.addf %426, %431 : vector<8x32xf32>
    %433 = math.tanh %432 : vector<8x32xf32>
    %434 = vector.extract_strided_slice %405 {offsets = [0, 64], sizes = [8, 32], strides = [1, 1]} : vector<8x128xf32> to vector<8x32xf32>
    %435 = vector.extract_strided_slice %425 {offsets = [0, 0], sizes = [8, 32], strides = [1, 1]} : vector<8x64xf32> to vector<8x32xf32>
    %436 = vector.extract_strided_slice %409 {offsets = [0, 64], sizes = [8, 32], strides = [1, 1]} : vector<8x128xf32> to vector<8x32xf32>
    %437 = vector.broadcast %10 : vector<1x32xf32> to vector<8x32xf32>
    %438 = arith.addf %436, %437 : vector<8x32xf32>
    %439 = arith.mulf %435, %438 : vector<8x32xf32>
    %440 = arith.addf %434, %439 : vector<8x32xf32>
    %441 = math.tanh %440 : vector<8x32xf32>
    %442 = vector.extract_strided_slice %417 {offsets = [0, 32], sizes = [8, 32], strides = [1, 1]} : vector<8x64xf32> to vector<8x32xf32>
    %443 = vector.extract_strided_slice %425 {offsets = [0, 32], sizes = [8, 32], strides = [1, 1]} : vector<8x64xf32> to vector<8x32xf32>
    %cst_87 = arith.constant 1.000000e+00 : f32
    %444 = vector.broadcast %cst_87 : f32 to vector<8x32xf32>
    %445 = arith.subf %444, %442 : vector<8x32xf32>
    %446 = arith.mulf %445, %433 : vector<8x32xf32>
    %447 = arith.mulf %442, %384 : vector<8x32xf32>
    %448 = arith.addf %446, %447 : vector<8x32xf32>
    %cst_88 = arith.constant 1.000000e+00 : f32
    %449 = vector.broadcast %cst_88 : f32 to vector<8x32xf32>
    %450 = arith.subf %449, %443 : vector<8x32xf32>
    %451 = arith.mulf %450, %441 : vector<8x32xf32>
    %452 = arith.mulf %443, %388 : vector<8x32xf32>
    %453 = arith.addf %451, %452 : vector<8x32xf32>
    %454 = arith.index_cast %399 : i32 to index
    %c0_89 = arith.constant 0 : index
    %455 = vector.load %arg1[%454, %c0_89] : memref<64x1xf32, #tpu.memory_space<vmem>>, vector<8x1xf32>
    %456 = arith.index_cast %401 : i32 to index
    %c0_90 = arith.constant 0 : index
    %457 = vector.load %arg1[%456, %c0_90] : memref<64x1xf32, #tpu.memory_space<vmem>>, vector<8x1xf32>
    %458 = arith.subf %448, %384 : vector<8x32xf32>
    %459 = vector.broadcast %455 : vector<8x1xf32> to vector<8x32xf32>
    %460 = arith.mulf %459, %458 : vector<8x32xf32>
    %461 = arith.addf %384, %460 : vector<8x32xf32>
    %462 = arith.subf %453, %388 : vector<8x32xf32>
    %463 = vector.broadcast %457 : vector<8x1xf32> to vector<8x32xf32>
    %464 = arith.mulf %463, %462 : vector<8x32xf32>
    %465 = arith.addf %388, %464 : vector<8x32xf32>
    %466 = vector.broadcast %455 : vector<8x1xf32> to vector<8x32xf32>
    %467 = arith.mulf %466, %461 : vector<8x32xf32>
    %468 = arith.index_cast %399 : i32 to index
    %c0_91 = arith.constant 0 : index
    %469 = vector.load %arg15[%468, %c0_91] : memref<64x32xf32, #tpu.memory_space<vmem>>, vector<8x32xf32>
    tpu.vector_store %arg15[%468, %c0_91], %467 {strides = array<i32>} : memref<64x32xf32, #tpu.memory_space<vmem>>, vector<8x32xf32>,
    %470 = vector.broadcast %457 : vector<8x1xf32> to vector<8x32xf32>
    %471 = arith.mulf %470, %465 : vector<8x32xf32>
    %472 = arith.index_cast %401 : i32 to index
    %c0_92 = arith.constant 0 : index
    %473 = vector.load %arg16[%472, %c0_92] : memref<64x32xf32, #tpu.memory_space<vmem>>, vector<8x32xf32>
    tpu.vector_store %arg16[%472, %c0_92], %471 {strides = array<i32>} : memref<64x32xf32, #tpu.memory_space<vmem>>, vector<8x32xf32>,
    %c6_i32 = arith.constant 6 : i32
    %c7_i32_93 = arith.constant 7 : i32
    %474 = arith.subi %c7_i32_93, %c6_i32 : i32
    %c8_i32_94 = arith.constant 8 : i32
    %475 = arith.muli %c6_i32, %c8_i32_94 : i32
    %476 = tpu.assume_multiple %475, 8 : i32
    %c8_i32_95 = arith.constant 8 : i32
    %477 = arith.muli %474, %c8_i32_95 : i32
    %478 = tpu.assume_multiple %477, 8 : i32
    %479 = arith.index_cast %476 : i32 to index
    %c0_96 = arith.constant 0 : index
    %480 = vector.load %arg14[%479, %c0_96] : memref<64x256xf32, #tpu.memory_space<vmem>>, vector<8x128xf32>
    %481 = arith.index_cast %478 : i32 to index
    %c128_97 = arith.constant 128 : index
    %482 = vector.load %arg14[%481, %c128_97] : memref<64x256xf32, #tpu.memory_space<vmem>>, vector<8x128xf32>
    %483 = tpu.concatenate %461, %465 in 1 : vector<8x32xf32>, vector<8x32xf32> -> vector<8x64xf32>
    %cst_98 = arith.constant dense<0.000000e+00> : vector<8x256xf32>
    %484 = tpu.matmul %483, %7, %cst_98 {dimension_numbers = #tpu.dot_dimension_numbers<[1], [0], [0], [1], [0, 0, 1, 1], [], []>} : vector<8x64xf32>, vector<64x256xf32>, vector<8x256xf32> -> vector<8x256xf32>
    %485 = vector.extract_strided_slice %484 {offsets = [0, 0], sizes = [8, 128], strides = [1, 1]} : vector<8x256xf32> to vector<8x128xf32>
    %486 = vector.extract_strided_slice %484 {offsets = [0, 128], sizes = [8, 128], strides = [1, 1]} : vector<8x256xf32> to vector<8x128xf32>
    %487 = vector.extract_strided_slice %480 {offsets = [0, 0], sizes = [8, 64], strides = [1, 1]} : vector<8x128xf32> to vector<8x64xf32>
    %488 = vector.extract_strided_slice %485 {offsets = [0, 0], sizes = [8, 64], strides = [1, 1]} : vector<8x128xf32> to vector<8x64xf32>
    %489 = arith.addf %487, %488 : vector<8x64xf32>
    %490 = arith.negf %489 : vector<8x64xf32>
    %491 = math.exp %490 : vector<8x64xf32>
    %cst_99 = arith.constant 1.000000e+00 : f32
    %492 = vector.broadcast %cst_99 : f32 to vector<8x64xf32>
    %493 = arith.addf %492, %491 : vector<8x64xf32>
    %494 = arith.divf %492, %493 : vector<8x64xf32>
    %495 = vector.extract_strided_slice %482 {offsets = [0, 0], sizes = [8, 64], strides = [1, 1]} : vector<8x128xf32> to vector<8x64xf32>
    %496 = vector.extract_strided_slice %486 {offsets = [0, 0], sizes = [8, 64], strides = [1, 1]} : vector<8x128xf32> to vector<8x64xf32>
    %497 = arith.addf %495, %496 : vector<8x64xf32>
    %498 = arith.negf %497 : vector<8x64xf32>
    %499 = math.exp %498 : vector<8x64xf32>
    %cst_100 = arith.constant 1.000000e+00 : f32
    %500 = vector.broadcast %cst_100 : f32 to vector<8x64xf32>
    %501 = arith.addf %500, %499 : vector<8x64xf32>
    %502 = arith.divf %500, %501 : vector<8x64xf32>
    %503 = vector.extract_strided_slice %480 {offsets = [0, 64], sizes = [8, 32], strides = [1, 1]} : vector<8x128xf32> to vector<8x32xf32>
    %504 = vector.extract_strided_slice %494 {offsets = [0, 0], sizes = [8, 32], strides = [1, 1]} : vector<8x64xf32> to vector<8x32xf32>
    %505 = vector.extract_strided_slice %485 {offsets = [0, 64], sizes = [8, 32], strides = [1, 1]} : vector<8x128xf32> to vector<8x32xf32>
    %506 = vector.broadcast %9 : vector<1x32xf32> to vector<8x32xf32>
    %507 = arith.addf %505, %506 : vector<8x32xf32>
    %508 = arith.mulf %504, %507 : vector<8x32xf32>
    %509 = arith.addf %503, %508 : vector<8x32xf32>
    %510 = math.tanh %509 : vector<8x32xf32>
    %511 = vector.extract_strided_slice %482 {offsets = [0, 64], sizes = [8, 32], strides = [1, 1]} : vector<8x128xf32> to vector<8x32xf32>
    %512 = vector.extract_strided_slice %502 {offsets = [0, 0], sizes = [8, 32], strides = [1, 1]} : vector<8x64xf32> to vector<8x32xf32>
    %513 = vector.extract_strided_slice %486 {offsets = [0, 64], sizes = [8, 32], strides = [1, 1]} : vector<8x128xf32> to vector<8x32xf32>
    %514 = vector.broadcast %10 : vector<1x32xf32> to vector<8x32xf32>
    %515 = arith.addf %513, %514 : vector<8x32xf32>
    %516 = arith.mulf %512, %515 : vector<8x32xf32>
    %517 = arith.addf %511, %516 : vector<8x32xf32>
    %518 = math.tanh %517 : vector<8x32xf32>
    %519 = vector.extract_strided_slice %494 {offsets = [0, 32], sizes = [8, 32], strides = [1, 1]} : vector<8x64xf32> to vector<8x32xf32>
    %520 = vector.extract_strided_slice %502 {offsets = [0, 32], sizes = [8, 32], strides = [1, 1]} : vector<8x64xf32> to vector<8x32xf32>
    %cst_101 = arith.constant 1.000000e+00 : f32
    %521 = vector.broadcast %cst_101 : f32 to vector<8x32xf32>
    %522 = arith.subf %521, %519 : vector<8x32xf32>
    %523 = arith.mulf %522, %510 : vector<8x32xf32>
    %524 = arith.mulf %519, %461 : vector<8x32xf32>
    %525 = arith.addf %523, %524 : vector<8x32xf32>
    %cst_102 = arith.constant 1.000000e+00 : f32
    %526 = vector.broadcast %cst_102 : f32 to vector<8x32xf32>
    %527 = arith.subf %526, %520 : vector<8x32xf32>
    %528 = arith.mulf %527, %518 : vector<8x32xf32>
    %529 = arith.mulf %520, %465 : vector<8x32xf32>
    %530 = arith.addf %528, %529 : vector<8x32xf32>
    %531 = arith.index_cast %476 : i32 to index
    %c0_103 = arith.constant 0 : index
    %532 = vector.load %arg1[%531, %c0_103] : memref<64x1xf32, #tpu.memory_space<vmem>>, vector<8x1xf32>
    %533 = arith.index_cast %478 : i32 to index
    %c0_104 = arith.constant 0 : index
    %534 = vector.load %arg1[%533, %c0_104] : memref<64x1xf32, #tpu.memory_space<vmem>>, vector<8x1xf32>
    %535 = arith.subf %525, %461 : vector<8x32xf32>
    %536 = vector.broadcast %532 : vector<8x1xf32> to vector<8x32xf32>
    %537 = arith.mulf %536, %535 : vector<8x32xf32>
    %538 = arith.addf %461, %537 : vector<8x32xf32>
    %539 = arith.subf %530, %465 : vector<8x32xf32>
    %540 = vector.broadcast %534 : vector<8x1xf32> to vector<8x32xf32>
    %541 = arith.mulf %540, %539 : vector<8x32xf32>
    %542 = arith.addf %465, %541 : vector<8x32xf32>
    %543 = vector.broadcast %532 : vector<8x1xf32> to vector<8x32xf32>
    %544 = arith.mulf %543, %538 : vector<8x32xf32>
    %545 = arith.index_cast %476 : i32 to index
    %c0_105 = arith.constant 0 : index
    %546 = vector.load %arg15[%545, %c0_105] : memref<64x32xf32, #tpu.memory_space<vmem>>, vector<8x32xf32>
    tpu.vector_store %arg15[%545, %c0_105], %544 {strides = array<i32>} : memref<64x32xf32, #tpu.memory_space<vmem>>, vector<8x32xf32>,
    %547 = vector.broadcast %534 : vector<8x1xf32> to vector<8x32xf32>
    %548 = arith.mulf %547, %542 : vector<8x32xf32>
    %549 = arith.index_cast %478 : i32 to index
    %c0_106 = arith.constant 0 : index
    %550 = vector.load %arg16[%549, %c0_106] : memref<64x32xf32, #tpu.memory_space<vmem>>, vector<8x32xf32>
    tpu.vector_store %arg16[%549, %c0_106], %548 {strides = array<i32>} : memref<64x32xf32, #tpu.memory_space<vmem>>, vector<8x32xf32>,
    %c7_i32_107 = arith.constant 7 : i32
    %c7_i32_108 = arith.constant 7 : i32
    %551 = arith.subi %c7_i32_108, %c7_i32_107 : i32
    %c8_i32_109 = arith.constant 8 : i32
    %552 = arith.muli %c7_i32_107, %c8_i32_109 : i32
    %553 = tpu.assume_multiple %552, 8 : i32
    %c8_i32_110 = arith.constant 8 : i32
    %554 = arith.muli %551, %c8_i32_110 : i32
    %555 = tpu.assume_multiple %554, 8 : i32
    %556 = arith.index_cast %553 : i32 to index
    %c0_111 = arith.constant 0 : index
    %557 = vector.load %arg14[%556, %c0_111] : memref<64x256xf32, #tpu.memory_space<vmem>>, vector<8x128xf32>
    %558 = arith.index_cast %555 : i32 to index
    %c128_112 = arith.constant 128 : index
    %559 = vector.load %arg14[%558, %c128_112] : memref<64x256xf32, #tpu.memory_space<vmem>>, vector<8x128xf32>
    %560 = tpu.concatenate %538, %542 in 1 : vector<8x32xf32>, vector<8x32xf32> -> vector<8x64xf32>
    %cst_113 = arith.constant dense<0.000000e+00> : vector<8x256xf32>
    %561 = tpu.matmul %560, %7, %cst_113 {dimension_numbers = #tpu.dot_dimension_numbers<[1], [0], [0], [1], [0, 0, 1, 1], [], []>} : vector<8x64xf32>, vector<64x256xf32>, vector<8x256xf32> -> vector<8x256xf32>
    %562 = vector.extract_strided_slice %561 {offsets = [0, 0], sizes = [8, 128], strides = [1, 1]} : vector<8x256xf32> to vector<8x128xf32>
    %563 = vector.extract_strided_slice %561 {offsets = [0, 128], sizes = [8, 128], strides = [1, 1]} : vector<8x256xf32> to vector<8x128xf32>
    %564 = vector.extract_strided_slice %557 {offsets = [0, 0], sizes = [8, 64], strides = [1, 1]} : vector<8x128xf32> to vector<8x64xf32>
    %565 = vector.extract_strided_slice %562 {offsets = [0, 0], sizes = [8, 64], strides = [1, 1]} : vector<8x128xf32> to vector<8x64xf32>
    %566 = arith.addf %564, %565 : vector<8x64xf32>
    %567 = arith.negf %566 : vector<8x64xf32>
    %568 = math.exp %567 : vector<8x64xf32>
    %cst_114 = arith.constant 1.000000e+00 : f32
    %569 = vector.broadcast %cst_114 : f32 to vector<8x64xf32>
    %570 = arith.addf %569, %568 : vector<8x64xf32>
    %571 = arith.divf %569, %570 : vector<8x64xf32>
    %572 = vector.extract_strided_slice %559 {offsets = [0, 0], sizes = [8, 64], strides = [1, 1]} : vector<8x128xf32> to vector<8x64xf32>
    %573 = vector.extract_strided_slice %563 {offsets = [0, 0], sizes = [8, 64], strides = [1, 1]} : vector<8x128xf32> to vector<8x64xf32>
    %574 = arith.addf %572, %573 : vector<8x64xf32>
    %575 = arith.negf %574 : vector<8x64xf32>
    %576 = math.exp %575 : vector<8x64xf32>
    %cst_115 = arith.constant 1.000000e+00 : f32
    %577 = vector.broadcast %cst_115 : f32 to vector<8x64xf32>
    %578 = arith.addf %577, %576 : vector<8x64xf32>
    %579 = arith.divf %577, %578 : vector<8x64xf32>
    %580 = vector.extract_strided_slice %557 {offsets = [0, 64], sizes = [8, 32], strides = [1, 1]} : vector<8x128xf32> to vector<8x32xf32>
    %581 = vector.extract_strided_slice %571 {offsets = [0, 0], sizes = [8, 32], strides = [1, 1]} : vector<8x64xf32> to vector<8x32xf32>
    %582 = vector.extract_strided_slice %562 {offsets = [0, 64], sizes = [8, 32], strides = [1, 1]} : vector<8x128xf32> to vector<8x32xf32>
    %583 = vector.broadcast %9 : vector<1x32xf32> to vector<8x32xf32>
    %584 = arith.addf %582, %583 : vector<8x32xf32>
    %585 = arith.mulf %581, %584 : vector<8x32xf32>
    %586 = arith.addf %580, %585 : vector<8x32xf32>
    %587 = math.tanh %586 : vector<8x32xf32>
    %588 = vector.extract_strided_slice %559 {offsets = [0, 64], sizes = [8, 32], strides = [1, 1]} : vector<8x128xf32> to vector<8x32xf32>
    %589 = vector.extract_strided_slice %579 {offsets = [0, 0], sizes = [8, 32], strides = [1, 1]} : vector<8x64xf32> to vector<8x32xf32>
    %590 = vector.extract_strided_slice %563 {offsets = [0, 64], sizes = [8, 32], strides = [1, 1]} : vector<8x128xf32> to vector<8x32xf32>
    %591 = vector.broadcast %10 : vector<1x32xf32> to vector<8x32xf32>
    %592 = arith.addf %590, %591 : vector<8x32xf32>
    %593 = arith.mulf %589, %592 : vector<8x32xf32>
    %594 = arith.addf %588, %593 : vector<8x32xf32>
    %595 = math.tanh %594 : vector<8x32xf32>
    %596 = vector.extract_strided_slice %571 {offsets = [0, 32], sizes = [8, 32], strides = [1, 1]} : vector<8x64xf32> to vector<8x32xf32>
    %597 = vector.extract_strided_slice %579 {offsets = [0, 32], sizes = [8, 32], strides = [1, 1]} : vector<8x64xf32> to vector<8x32xf32>
    %cst_116 = arith.constant 1.000000e+00 : f32
    %598 = vector.broadcast %cst_116 : f32 to vector<8x32xf32>
    %599 = arith.subf %598, %596 : vector<8x32xf32>
    %600 = arith.mulf %599, %587 : vector<8x32xf32>
    %601 = arith.mulf %596, %538 : vector<8x32xf32>
    %602 = arith.addf %600, %601 : vector<8x32xf32>
    %cst_117 = arith.constant 1.000000e+00 : f32
    %603 = vector.broadcast %cst_117 : f32 to vector<8x32xf32>
    %604 = arith.subf %603, %597 : vector<8x32xf32>
    %605 = arith.mulf %604, %595 : vector<8x32xf32>
    %606 = arith.mulf %597, %542 : vector<8x32xf32>
    %607 = arith.addf %605, %606 : vector<8x32xf32>
    %608 = arith.index_cast %553 : i32 to index
    %c0_118 = arith.constant 0 : index
    %609 = vector.load %arg1[%608, %c0_118] : memref<64x1xf32, #tpu.memory_space<vmem>>, vector<8x1xf32>
    %610 = arith.index_cast %555 : i32 to index
    %c0_119 = arith.constant 0 : index
    %611 = vector.load %arg1[%610, %c0_119] : memref<64x1xf32, #tpu.memory_space<vmem>>, vector<8x1xf32>
    %612 = arith.subf %602, %538 : vector<8x32xf32>
    %613 = vector.broadcast %609 : vector<8x1xf32> to vector<8x32xf32>
    %614 = arith.mulf %613, %612 : vector<8x32xf32>
    %615 = arith.addf %538, %614 : vector<8x32xf32>
    %616 = arith.subf %607, %542 : vector<8x32xf32>
    %617 = vector.broadcast %611 : vector<8x1xf32> to vector<8x32xf32>
    %618 = arith.mulf %617, %616 : vector<8x32xf32>
    %619 = arith.addf %542, %618 : vector<8x32xf32>
    %620 = vector.broadcast %609 : vector<8x1xf32> to vector<8x32xf32>
    %621 = arith.mulf %620, %615 : vector<8x32xf32>
    %622 = arith.index_cast %553 : i32 to index
    %c0_120 = arith.constant 0 : index
    %623 = vector.load %arg15[%622, %c0_120] : memref<64x32xf32, #tpu.memory_space<vmem>>, vector<8x32xf32>
    tpu.vector_store %arg15[%622, %c0_120], %621 {strides = array<i32>} : memref<64x32xf32, #tpu.memory_space<vmem>>, vector<8x32xf32>,
    %624 = vector.broadcast %611 : vector<8x1xf32> to vector<8x32xf32>
    %625 = arith.mulf %624, %619 : vector<8x32xf32>
    %626 = arith.index_cast %555 : i32 to index
    %c0_121 = arith.constant 0 : index
    %627 = vector.load %arg16[%626, %c0_121] : memref<64x32xf32, #tpu.memory_space<vmem>>, vector<8x32xf32>
    tpu.vector_store %arg16[%626, %c0_121], %625 {strides = array<i32>} : memref<64x32xf32, #tpu.memory_space<vmem>>, vector<8x32xf32>,
    %c8_i32_122 = arith.constant 8 : i32
    %c0_123 = arith.constant 0 : index
    %c0_124 = arith.constant 0 : index
    %628 = vector.load %arg15[%c0_123, %c0_124] : memref<64x32xf32, #tpu.memory_space<vmem>>, vector<64x32xf32>
    %c0_125 = arith.constant 0 : index
    %c0_126 = arith.constant 0 : index
    %629 = vector.load %arg6[%c0_125, %c0_126] : memref<64x256xf32, #tpu.memory_space<vmem>>, vector<32x256xf32>
    %cst_127 = arith.constant dense<0.000000e+00> : vector<64x256xf32>
    %630 = tpu.matmul %628, %629, %cst_127 {dimension_numbers = #tpu.dot_dimension_numbers<[1], [0], [0], [1], [0, 0, 1, 1], [], []>} : vector<64x32xf32>, vector<32x256xf32>, vector<64x256xf32> -> vector<64x256xf32>
    %c0_128 = arith.constant 0 : index
    %c0_129 = arith.constant 0 : index
    %631 = vector.load %arg16[%c0_128, %c0_129] : memref<64x32xf32, #tpu.memory_space<vmem>>, vector<64x32xf32>
    %c32 = arith.constant 32 : index
    %c0_130 = arith.constant 0 : index
    %632 = vector.load %arg6[%c32, %c0_130] : memref<64x256xf32, #tpu.memory_space<vmem>>, vector<32x256xf32>
    %cst_131 = arith.constant dense<0.000000e+00> : vector<64x256xf32>
    %633 = tpu.matmul %631, %632, %cst_131 {dimension_numbers = #tpu.dot_dimension_numbers<[1], [0], [0], [1], [0, 0, 1, 1], [], []>} : vector<64x32xf32>, vector<32x256xf32>, vector<64x256xf32> -> vector<64x256xf32>
    %634 = arith.addf %630, %633 : vector<64x256xf32>
    %c0_132 = arith.constant 0 : index
    %c0_133 = arith.constant 0 : index
    %635 = vector.load %arg7[%c0_132, %c0_133] : memref<1x256xf32, #tpu.memory_space<vmem>>, vector<1x256xf32>
    %636 = vector.broadcast %635 : vector<1x256xf32> to vector<64x256xf32>
    %637 = arith.addf %634, %636 : vector<64x256xf32>
    %c0_134 = arith.constant 0 : index
    %c0_135 = arith.constant 0 : index
    %638 = vector.load %arg14[%c0_134, %c0_135] : memref<64x256xf32, #tpu.memory_space<vmem>>, vector<64x256xf32>
    tpu.vector_store %arg14[%c0_134, %c0_135], %637 {strides = array<i32>} : memref<64x256xf32, #tpu.memory_space<vmem>>, vector<64x256xf32>,
    %c0_136 = arith.constant 0 : index
    %c0_137 = arith.constant 0 : index
    %639 = vector.load %arg8[%c0_136, %c0_137] : memref<64x256xf32, #tpu.memory_space<vmem>>, vector<64x256xf32>
    %c0_138 = arith.constant 0 : index
    %c0_139 = arith.constant 0 : index
    %640 = vector.load %arg9[%c0_138, %c0_139] : memref<1x64xf32, #tpu.memory_space<vmem>>, vector<1x64xf32>
    %641 = vector.extract_strided_slice %640 {offsets = [0, 0], sizes = [1, 32], strides = [1, 1]} : vector<1x64xf32> to vector<1x32xf32>
    %642 = vector.extract_strided_slice %640 {offsets = [0, 32], sizes = [1, 32], strides = [1, 1]} : vector<1x64xf32> to vector<1x32xf32>
    %cst_140 = arith.constant 0.000000e+00 : f32
    %643 = vector.broadcast %cst_140 : f32 to vector<8x32xf32>
    %c0_i32_141 = arith.constant 0 : i32
    %c7_i32_142 = arith.constant 7 : i32
    %644 = arith.subi %c7_i32_142, %c0_i32_141 : i32
    %c8_i32_143 = arith.constant 8 : i32
    %645 = arith.muli %c0_i32_141, %c8_i32_143 : i32
    %646 = tpu.assume_multiple %645, 8 : i32
    %c8_i32_144 = arith.constant 8 : i32
    %647 = arith.muli %644, %c8_i32_144 : i32
    %648 = tpu.assume_multiple %647, 8 : i32
    %649 = arith.index_cast %646 : i32 to index
    %c0_145 = arith.constant 0 : index
    %650 = vector.load %arg14[%649, %c0_145] : memref<64x256xf32, #tpu.memory_space<vmem>>, vector<8x128xf32>
    %651 = arith.index_cast %648 : i32 to index
    %c128_146 = arith.constant 128 : index
    %652 = vector.load %arg14[%651, %c128_146] : memref<64x256xf32, #tpu.memory_space<vmem>>, vector<8x128xf32>
    %653 = tpu.concatenate %643, %643 in 1 : vector<8x32xf32>, vector<8x32xf32> -> vector<8x64xf32>
    %cst_147 = arith.constant dense<0.000000e+00> : vector<8x256xf32>
    %654 = tpu.matmul %653, %639, %cst_147 {dimension_numbers = #tpu.dot_dimension_numbers<[1], [0], [0], [1], [0, 0, 1, 1], [], []>} : vector<8x64xf32>, vector<64x256xf32>, vector<8x256xf32> -> vector<8x256xf32>
    %655 = vector.extract_strided_slice %654 {offsets = [0, 0], sizes = [8, 128], strides = [1, 1]} : vector<8x256xf32> to vector<8x128xf32>
    %656 = vector.extract_strided_slice %654 {offsets = [0, 128], sizes = [8, 128], strides = [1, 1]} : vector<8x256xf32> to vector<8x128xf32>
    %657 = vector.extract_strided_slice %650 {offsets = [0, 0], sizes = [8, 64], strides = [1, 1]} : vector<8x128xf32> to vector<8x64xf32>
    %658 = vector.extract_strided_slice %655 {offsets = [0, 0], sizes = [8, 64], strides = [1, 1]} : vector<8x128xf32> to vector<8x64xf32>
    %659 = arith.addf %657, %658 : vector<8x64xf32>
    %660 = arith.negf %659 : vector<8x64xf32>
    %661 = math.exp %660 : vector<8x64xf32>
    %cst_148 = arith.constant 1.000000e+00 : f32
    %662 = vector.broadcast %cst_148 : f32 to vector<8x64xf32>
    %663 = arith.addf %662, %661 : vector<8x64xf32>
    %664 = arith.divf %662, %663 : vector<8x64xf32>
    %665 = vector.extract_strided_slice %652 {offsets = [0, 0], sizes = [8, 64], strides = [1, 1]} : vector<8x128xf32> to vector<8x64xf32>
    %666 = vector.extract_strided_slice %656 {offsets = [0, 0], sizes = [8, 64], strides = [1, 1]} : vector<8x128xf32> to vector<8x64xf32>
    %667 = arith.addf %665, %666 : vector<8x64xf32>
    %668 = arith.negf %667 : vector<8x64xf32>
    %669 = math.exp %668 : vector<8x64xf32>
    %cst_149 = arith.constant 1.000000e+00 : f32
    %670 = vector.broadcast %cst_149 : f32 to vector<8x64xf32>
    %671 = arith.addf %670, %669 : vector<8x64xf32>
    %672 = arith.divf %670, %671 : vector<8x64xf32>
    %673 = vector.extract_strided_slice %650 {offsets = [0, 64], sizes = [8, 32], strides = [1, 1]} : vector<8x128xf32> to vector<8x32xf32>
    %674 = vector.extract_strided_slice %664 {offsets = [0, 0], sizes = [8, 32], strides = [1, 1]} : vector<8x64xf32> to vector<8x32xf32>
    %675 = vector.extract_strided_slice %655 {offsets = [0, 64], sizes = [8, 32], strides = [1, 1]} : vector<8x128xf32> to vector<8x32xf32>
    %676 = vector.broadcast %641 : vector<1x32xf32> to vector<8x32xf32>
    %677 = arith.addf %675, %676 : vector<8x32xf32>
    %678 = arith.mulf %674, %677 : vector<8x32xf32>
    %679 = arith.addf %673, %678 : vector<8x32xf32>
    %680 = math.tanh %679 : vector<8x32xf32>
    %681 = vector.extract_strided_slice %652 {offsets = [0, 64], sizes = [8, 32], strides = [1, 1]} : vector<8x128xf32> to vector<8x32xf32>
    %682 = vector.extract_strided_slice %672 {offsets = [0, 0], sizes = [8, 32], strides = [1, 1]} : vector<8x64xf32> to vector<8x32xf32>
    %683 = vector.extract_strided_slice %656 {offsets = [0, 64], sizes = [8, 32], strides = [1, 1]} : vector<8x128xf32> to vector<8x32xf32>
    %684 = vector.broadcast %642 : vector<1x32xf32> to vector<8x32xf32>
    %685 = arith.addf %683, %684 : vector<8x32xf32>
    %686 = arith.mulf %682, %685 : vector<8x32xf32>
    %687 = arith.addf %681, %686 : vector<8x32xf32>
    %688 = math.tanh %687 : vector<8x32xf32>
    %689 = vector.extract_strided_slice %664 {offsets = [0, 32], sizes = [8, 32], strides = [1, 1]} : vector<8x64xf32> to vector<8x32xf32>
    %690 = vector.extract_strided_slice %672 {offsets = [0, 32], sizes = [8, 32], strides = [1, 1]} : vector<8x64xf32> to vector<8x32xf32>
    %cst_150 = arith.constant 1.000000e+00 : f32
    %691 = vector.broadcast %cst_150 : f32 to vector<8x32xf32>
    %692 = arith.subf %691, %689 : vector<8x32xf32>
    %693 = arith.mulf %692, %680 : vector<8x32xf32>
    %694 = arith.mulf %689, %643 : vector<8x32xf32>
    %695 = arith.addf %693, %694 : vector<8x32xf32>
    %cst_151 = arith.constant 1.000000e+00 : f32
    %696 = vector.broadcast %cst_151 : f32 to vector<8x32xf32>
    %697 = arith.subf %696, %690 : vector<8x32xf32>
    %698 = arith.mulf %697, %688 : vector<8x32xf32>
    %699 = arith.mulf %690, %643 : vector<8x32xf32>
    %700 = arith.addf %698, %699 : vector<8x32xf32>
    %701 = arith.index_cast %646 : i32 to index
    %c0_152 = arith.constant 0 : index
    %702 = vector.load %arg1[%701, %c0_152] : memref<64x1xf32, #tpu.memory_space<vmem>>, vector<8x1xf32>
    %703 = arith.index_cast %648 : i32 to index
    %c0_153 = arith.constant 0 : index
    %704 = vector.load %arg1[%703, %c0_153] : memref<64x1xf32, #tpu.memory_space<vmem>>, vector<8x1xf32>
    %705 = arith.subf %695, %643 : vector<8x32xf32>
    %706 = vector.broadcast %702 : vector<8x1xf32> to vector<8x32xf32>
    %707 = arith.mulf %706, %705 : vector<8x32xf32>
    %708 = arith.addf %643, %707 : vector<8x32xf32>
    %709 = arith.subf %700, %643 : vector<8x32xf32>
    %710 = vector.broadcast %704 : vector<8x1xf32> to vector<8x32xf32>
    %711 = arith.mulf %710, %709 : vector<8x32xf32>
    %712 = arith.addf %643, %711 : vector<8x32xf32>
    %713 = vector.broadcast %702 : vector<8x1xf32> to vector<8x32xf32>
    %714 = arith.mulf %713, %708 : vector<8x32xf32>
    %715 = arith.index_cast %646 : i32 to index
    %c0_154 = arith.constant 0 : index
    %716 = vector.load %arg15[%715, %c0_154] : memref<64x32xf32, #tpu.memory_space<vmem>>, vector<8x32xf32>
    tpu.vector_store %arg15[%715, %c0_154], %714 {strides = array<i32>} : memref<64x32xf32, #tpu.memory_space<vmem>>, vector<8x32xf32>,
    %717 = vector.broadcast %704 : vector<8x1xf32> to vector<8x32xf32>
    %718 = arith.mulf %717, %712 : vector<8x32xf32>
    %719 = arith.index_cast %648 : i32 to index
    %c0_155 = arith.constant 0 : index
    %720 = vector.load %arg16[%719, %c0_155] : memref<64x32xf32, #tpu.memory_space<vmem>>, vector<8x32xf32>
    tpu.vector_store %arg16[%719, %c0_155], %718 {strides = array<i32>} : memref<64x32xf32, #tpu.memory_space<vmem>>, vector<8x32xf32>,
    %c1_i32_156 = arith.constant 1 : i32
    %c7_i32_157 = arith.constant 7 : i32
    %721 = arith.subi %c7_i32_157, %c1_i32_156 : i32
    %c8_i32_158 = arith.constant 8 : i32
    %722 = arith.muli %c1_i32_156, %c8_i32_158 : i32
    %723 = tpu.assume_multiple %722, 8 : i32
    %c8_i32_159 = arith.constant 8 : i32
    %724 = arith.muli %721, %c8_i32_159 : i32
    %725 = tpu.assume_multiple %724, 8 : i32
    %726 = arith.index_cast %723 : i32 to index
    %c0_160 = arith.constant 0 : index
    %727 = vector.load %arg14[%726, %c0_160] : memref<64x256xf32, #tpu.memory_space<vmem>>, vector<8x128xf32>
    %728 = arith.index_cast %725 : i32 to index
    %c128_161 = arith.constant 128 : index
    %729 = vector.load %arg14[%728, %c128_161] : memref<64x256xf32, #tpu.memory_space<vmem>>, vector<8x128xf32>
    %730 = tpu.concatenate %708, %712 in 1 : vector<8x32xf32>, vector<8x32xf32> -> vector<8x64xf32>
    %cst_162 = arith.constant dense<0.000000e+00> : vector<8x256xf32>
    %731 = tpu.matmul %730, %639, %cst_162 {dimension_numbers = #tpu.dot_dimension_numbers<[1], [0], [0], [1], [0, 0, 1, 1], [], []>} : vector<8x64xf32>, vector<64x256xf32>, vector<8x256xf32> -> vector<8x256xf32>
    %732 = vector.extract_strided_slice %731 {offsets = [0, 0], sizes = [8, 128], strides = [1, 1]} : vector<8x256xf32> to vector<8x128xf32>
    %733 = vector.extract_strided_slice %731 {offsets = [0, 128], sizes = [8, 128], strides = [1, 1]} : vector<8x256xf32> to vector<8x128xf32>
    %734 = vector.extract_strided_slice %727 {offsets = [0, 0], sizes = [8, 64], strides = [1, 1]} : vector<8x128xf32> to vector<8x64xf32>
    %735 = vector.extract_strided_slice %732 {offsets = [0, 0], sizes = [8, 64], strides = [1, 1]} : vector<8x128xf32> to vector<8x64xf32>
    %736 = arith.addf %734, %735 : vector<8x64xf32>
    %737 = arith.negf %736 : vector<8x64xf32>
    %738 = math.exp %737 : vector<8x64xf32>
    %cst_163 = arith.constant 1.000000e+00 : f32
    %739 = vector.broadcast %cst_163 : f32 to vector<8x64xf32>
    %740 = arith.addf %739, %738 : vector<8x64xf32>
    %741 = arith.divf %739, %740 : vector<8x64xf32>
    %742 = vector.extract_strided_slice %729 {offsets = [0, 0], sizes = [8, 64], strides = [1, 1]} : vector<8x128xf32> to vector<8x64xf32>
    %743 = vector.extract_strided_slice %733 {offsets = [0, 0], sizes = [8, 64], strides = [1, 1]} : vector<8x128xf32> to vector<8x64xf32>
    %744 = arith.addf %742, %743 : vector<8x64xf32>
    %745 = arith.negf %744 : vector<8x64xf32>
    %746 = math.exp %745 : vector<8x64xf32>
    %cst_164 = arith.constant 1.000000e+00 : f32
    %747 = vector.broadcast %cst_164 : f32 to vector<8x64xf32>
    %748 = arith.addf %747, %746 : vector<8x64xf32>
    %749 = arith.divf %747, %748 : vector<8x64xf32>
    %750 = vector.extract_strided_slice %727 {offsets = [0, 64], sizes = [8, 32], strides = [1, 1]} : vector<8x128xf32> to vector<8x32xf32>
    %751 = vector.extract_strided_slice %741 {offsets = [0, 0], sizes = [8, 32], strides = [1, 1]} : vector<8x64xf32> to vector<8x32xf32>
    %752 = vector.extract_strided_slice %732 {offsets = [0, 64], sizes = [8, 32], strides = [1, 1]} : vector<8x128xf32> to vector<8x32xf32>
    %753 = vector.broadcast %641 : vector<1x32xf32> to vector<8x32xf32>
    %754 = arith.addf %752, %753 : vector<8x32xf32>
    %755 = arith.mulf %751, %754 : vector<8x32xf32>
    %756 = arith.addf %750, %755 : vector<8x32xf32>
    %757 = math.tanh %756 : vector<8x32xf32>
    %758 = vector.extract_strided_slice %729 {offsets = [0, 64], sizes = [8, 32], strides = [1, 1]} : vector<8x128xf32> to vector<8x32xf32>
    %759 = vector.extract_strided_slice %749 {offsets = [0, 0], sizes = [8, 32], strides = [1, 1]} : vector<8x64xf32> to vector<8x32xf32>
    %760 = vector.extract_strided_slice %733 {offsets = [0, 64], sizes = [8, 32], strides = [1, 1]} : vector<8x128xf32> to vector<8x32xf32>
    %761 = vector.broadcast %642 : vector<1x32xf32> to vector<8x32xf32>
    %762 = arith.addf %760, %761 : vector<8x32xf32>
    %763 = arith.mulf %759, %762 : vector<8x32xf32>
    %764 = arith.addf %758, %763 : vector<8x32xf32>
    %765 = math.tanh %764 : vector<8x32xf32>
    %766 = vector.extract_strided_slice %741 {offsets = [0, 32], sizes = [8, 32], strides = [1, 1]} : vector<8x64xf32> to vector<8x32xf32>
    %767 = vector.extract_strided_slice %749 {offsets = [0, 32], sizes = [8, 32], strides = [1, 1]} : vector<8x64xf32> to vector<8x32xf32>
    %cst_165 = arith.constant 1.000000e+00 : f32
    %768 = vector.broadcast %cst_165 : f32 to vector<8x32xf32>
    %769 = arith.subf %768, %766 : vector<8x32xf32>
    %770 = arith.mulf %769, %757 : vector<8x32xf32>
    %771 = arith.mulf %766, %708 : vector<8x32xf32>
    %772 = arith.addf %770, %771 : vector<8x32xf32>
    %cst_166 = arith.constant 1.000000e+00 : f32
    %773 = vector.broadcast %cst_166 : f32 to vector<8x32xf32>
    %774 = arith.subf %773, %767 : vector<8x32xf32>
    %775 = arith.mulf %774, %765 : vector<8x32xf32>
    %776 = arith.mulf %767, %712 : vector<8x32xf32>
    %777 = arith.addf %775, %776 : vector<8x32xf32>
    %778 = arith.index_cast %723 : i32 to index
    %c0_167 = arith.constant 0 : index
    %779 = vector.load %arg1[%778, %c0_167] : memref<64x1xf32, #tpu.memory_space<vmem>>, vector<8x1xf32>
    %780 = arith.index_cast %725 : i32 to index
    %c0_168 = arith.constant 0 : index
    %781 = vector.load %arg1[%780, %c0_168] : memref<64x1xf32, #tpu.memory_space<vmem>>, vector<8x1xf32>
    %782 = arith.subf %772, %708 : vector<8x32xf32>
    %783 = vector.broadcast %779 : vector<8x1xf32> to vector<8x32xf32>
    %784 = arith.mulf %783, %782 : vector<8x32xf32>
    %785 = arith.addf %708, %784 : vector<8x32xf32>
    %786 = arith.subf %777, %712 : vector<8x32xf32>
    %787 = vector.broadcast %781 : vector<8x1xf32> to vector<8x32xf32>
    %788 = arith.mulf %787, %786 : vector<8x32xf32>
    %789 = arith.addf %712, %788 : vector<8x32xf32>
    %790 = vector.broadcast %779 : vector<8x1xf32> to vector<8x32xf32>
    %791 = arith.mulf %790, %785 : vector<8x32xf32>
    %792 = arith.index_cast %723 : i32 to index
    %c0_169 = arith.constant 0 : index
    %793 = vector.load %arg15[%792, %c0_169] : memref<64x32xf32, #tpu.memory_space<vmem>>, vector<8x32xf32>
    tpu.vector_store %arg15[%792, %c0_169], %791 {strides = array<i32>} : memref<64x32xf32, #tpu.memory_space<vmem>>, vector<8x32xf32>,
    %794 = vector.broadcast %781 : vector<8x1xf32> to vector<8x32xf32>
    %795 = arith.mulf %794, %789 : vector<8x32xf32>
    %796 = arith.index_cast %725 : i32 to index
    %c0_170 = arith.constant 0 : index
    %797 = vector.load %arg16[%796, %c0_170] : memref<64x32xf32, #tpu.memory_space<vmem>>, vector<8x32xf32>
    tpu.vector_store %arg16[%796, %c0_170], %795 {strides = array<i32>} : memref<64x32xf32, #tpu.memory_space<vmem>>, vector<8x32xf32>,
    %c2_i32_171 = arith.constant 2 : i32
    %c7_i32_172 = arith.constant 7 : i32
    %798 = arith.subi %c7_i32_172, %c2_i32_171 : i32
    %c8_i32_173 = arith.constant 8 : i32
    %799 = arith.muli %c2_i32_171, %c8_i32_173 : i32
    %800 = tpu.assume_multiple %799, 8 : i32
    %c8_i32_174 = arith.constant 8 : i32
    %801 = arith.muli %798, %c8_i32_174 : i32
    %802 = tpu.assume_multiple %801, 8 : i32
    %803 = arith.index_cast %800 : i32 to index
    %c0_175 = arith.constant 0 : index
    %804 = vector.load %arg14[%803, %c0_175] : memref<64x256xf32, #tpu.memory_space<vmem>>, vector<8x128xf32>
    %805 = arith.index_cast %802 : i32 to index
    %c128_176 = arith.constant 128 : index
    %806 = vector.load %arg14[%805, %c128_176] : memref<64x256xf32, #tpu.memory_space<vmem>>, vector<8x128xf32>
    %807 = tpu.concatenate %785, %789 in 1 : vector<8x32xf32>, vector<8x32xf32> -> vector<8x64xf32>
    %cst_177 = arith.constant dense<0.000000e+00> : vector<8x256xf32>
    %808 = tpu.matmul %807, %639, %cst_177 {dimension_numbers = #tpu.dot_dimension_numbers<[1], [0], [0], [1], [0, 0, 1, 1], [], []>} : vector<8x64xf32>, vector<64x256xf32>, vector<8x256xf32> -> vector<8x256xf32>
    %809 = vector.extract_strided_slice %808 {offsets = [0, 0], sizes = [8, 128], strides = [1, 1]} : vector<8x256xf32> to vector<8x128xf32>
    %810 = vector.extract_strided_slice %808 {offsets = [0, 128], sizes = [8, 128], strides = [1, 1]} : vector<8x256xf32> to vector<8x128xf32>
    %811 = vector.extract_strided_slice %804 {offsets = [0, 0], sizes = [8, 64], strides = [1, 1]} : vector<8x128xf32> to vector<8x64xf32>
    %812 = vector.extract_strided_slice %809 {offsets = [0, 0], sizes = [8, 64], strides = [1, 1]} : vector<8x128xf32> to vector<8x64xf32>
    %813 = arith.addf %811, %812 : vector<8x64xf32>
    %814 = arith.negf %813 : vector<8x64xf32>
    %815 = math.exp %814 : vector<8x64xf32>
    %cst_178 = arith.constant 1.000000e+00 : f32
    %816 = vector.broadcast %cst_178 : f32 to vector<8x64xf32>
    %817 = arith.addf %816, %815 : vector<8x64xf32>
    %818 = arith.divf %816, %817 : vector<8x64xf32>
    %819 = vector.extract_strided_slice %806 {offsets = [0, 0], sizes = [8, 64], strides = [1, 1]} : vector<8x128xf32> to vector<8x64xf32>
    %820 = vector.extract_strided_slice %810 {offsets = [0, 0], sizes = [8, 64], strides = [1, 1]} : vector<8x128xf32> to vector<8x64xf32>
    %821 = arith.addf %819, %820 : vector<8x64xf32>
    %822 = arith.negf %821 : vector<8x64xf32>
    %823 = math.exp %822 : vector<8x64xf32>
    %cst_179 = arith.constant 1.000000e+00 : f32
    %824 = vector.broadcast %cst_179 : f32 to vector<8x64xf32>
    %825 = arith.addf %824, %823 : vector<8x64xf32>
    %826 = arith.divf %824, %825 : vector<8x64xf32>
    %827 = vector.extract_strided_slice %804 {offsets = [0, 64], sizes = [8, 32], strides = [1, 1]} : vector<8x128xf32> to vector<8x32xf32>
    %828 = vector.extract_strided_slice %818 {offsets = [0, 0], sizes = [8, 32], strides = [1, 1]} : vector<8x64xf32> to vector<8x32xf32>
    %829 = vector.extract_strided_slice %809 {offsets = [0, 64], sizes = [8, 32], strides = [1, 1]} : vector<8x128xf32> to vector<8x32xf32>
    %830 = vector.broadcast %641 : vector<1x32xf32> to vector<8x32xf32>
    %831 = arith.addf %829, %830 : vector<8x32xf32>
    %832 = arith.mulf %828, %831 : vector<8x32xf32>
    %833 = arith.addf %827, %832 : vector<8x32xf32>
    %834 = math.tanh %833 : vector<8x32xf32>
    %835 = vector.extract_strided_slice %806 {offsets = [0, 64], sizes = [8, 32], strides = [1, 1]} : vector<8x128xf32> to vector<8x32xf32>
    %836 = vector.extract_strided_slice %826 {offsets = [0, 0], sizes = [8, 32], strides = [1, 1]} : vector<8x64xf32> to vector<8x32xf32>
    %837 = vector.extract_strided_slice %810 {offsets = [0, 64], sizes = [8, 32], strides = [1, 1]} : vector<8x128xf32> to vector<8x32xf32>
    %838 = vector.broadcast %642 : vector<1x32xf32> to vector<8x32xf32>
    %839 = arith.addf %837, %838 : vector<8x32xf32>
    %840 = arith.mulf %836, %839 : vector<8x32xf32>
    %841 = arith.addf %835, %840 : vector<8x32xf32>
    %842 = math.tanh %841 : vector<8x32xf32>
    %843 = vector.extract_strided_slice %818 {offsets = [0, 32], sizes = [8, 32], strides = [1, 1]} : vector<8x64xf32> to vector<8x32xf32>
    %844 = vector.extract_strided_slice %826 {offsets = [0, 32], sizes = [8, 32], strides = [1, 1]} : vector<8x64xf32> to vector<8x32xf32>
    %cst_180 = arith.constant 1.000000e+00 : f32
    %845 = vector.broadcast %cst_180 : f32 to vector<8x32xf32>
    %846 = arith.subf %845, %843 : vector<8x32xf32>
    %847 = arith.mulf %846, %834 : vector<8x32xf32>
    %848 = arith.mulf %843, %785 : vector<8x32xf32>
    %849 = arith.addf %847, %848 : vector<8x32xf32>
    %cst_181 = arith.constant 1.000000e+00 : f32
    %850 = vector.broadcast %cst_181 : f32 to vector<8x32xf32>
    %851 = arith.subf %850, %844 : vector<8x32xf32>
    %852 = arith.mulf %851, %842 : vector<8x32xf32>
    %853 = arith.mulf %844, %789 : vector<8x32xf32>
    %854 = arith.addf %852, %853 : vector<8x32xf32>
    %855 = arith.index_cast %800 : i32 to index
    %c0_182 = arith.constant 0 : index
    %856 = vector.load %arg1[%855, %c0_182] : memref<64x1xf32, #tpu.memory_space<vmem>>, vector<8x1xf32>
    %857 = arith.index_cast %802 : i32 to index
    %c0_183 = arith.constant 0 : index
    %858 = vector.load %arg1[%857, %c0_183] : memref<64x1xf32, #tpu.memory_space<vmem>>, vector<8x1xf32>
    %859 = arith.subf %849, %785 : vector<8x32xf32>
    %860 = vector.broadcast %856 : vector<8x1xf32> to vector<8x32xf32>
    %861 = arith.mulf %860, %859 : vector<8x32xf32>
    %862 = arith.addf %785, %861 : vector<8x32xf32>
    %863 = arith.subf %854, %789 : vector<8x32xf32>
    %864 = vector.broadcast %858 : vector<8x1xf32> to vector<8x32xf32>
    %865 = arith.mulf %864, %863 : vector<8x32xf32>
    %866 = arith.addf %789, %865 : vector<8x32xf32>
    %867 = vector.broadcast %856 : vector<8x1xf32> to vector<8x32xf32>
    %868 = arith.mulf %867, %862 : vector<8x32xf32>
    %869 = arith.index_cast %800 : i32 to index
    %c0_184 = arith.constant 0 : index
    %870 = vector.load %arg15[%869, %c0_184] : memref<64x32xf32, #tpu.memory_space<vmem>>, vector<8x32xf32>
    tpu.vector_store %arg15[%869, %c0_184], %868 {strides = array<i32>} : memref<64x32xf32, #tpu.memory_space<vmem>>, vector<8x32xf32>,
    %871 = vector.broadcast %858 : vector<8x1xf32> to vector<8x32xf32>
    %872 = arith.mulf %871, %866 : vector<8x32xf32>
    %873 = arith.index_cast %802 : i32 to index
    %c0_185 = arith.constant 0 : index
    %874 = vector.load %arg16[%873, %c0_185] : memref<64x32xf32, #tpu.memory_space<vmem>>, vector<8x32xf32>
    tpu.vector_store %arg16[%873, %c0_185], %872 {strides = array<i32>} : memref<64x32xf32, #tpu.memory_space<vmem>>, vector<8x32xf32>,
    %c3_i32_186 = arith.constant 3 : i32
    %c7_i32_187 = arith.constant 7 : i32
    %875 = arith.subi %c7_i32_187, %c3_i32_186 : i32
    %c8_i32_188 = arith.constant 8 : i32
    %876 = arith.muli %c3_i32_186, %c8_i32_188 : i32
    %877 = tpu.assume_multiple %876, 8 : i32
    %c8_i32_189 = arith.constant 8 : i32
    %878 = arith.muli %875, %c8_i32_189 : i32
    %879 = tpu.assume_multiple %878, 8 : i32
    %880 = arith.index_cast %877 : i32 to index
    %c0_190 = arith.constant 0 : index
    %881 = vector.load %arg14[%880, %c0_190] : memref<64x256xf32, #tpu.memory_space<vmem>>, vector<8x128xf32>
    %882 = arith.index_cast %879 : i32 to index
    %c128_191 = arith.constant 128 : index
    %883 = vector.load %arg14[%882, %c128_191] : memref<64x256xf32, #tpu.memory_space<vmem>>, vector<8x128xf32>
    %884 = tpu.concatenate %862, %866 in 1 : vector<8x32xf32>, vector<8x32xf32> -> vector<8x64xf32>
    %cst_192 = arith.constant dense<0.000000e+00> : vector<8x256xf32>
    %885 = tpu.matmul %884, %639, %cst_192 {dimension_numbers = #tpu.dot_dimension_numbers<[1], [0], [0], [1], [0, 0, 1, 1], [], []>} : vector<8x64xf32>, vector<64x256xf32>, vector<8x256xf32> -> vector<8x256xf32>
    %886 = vector.extract_strided_slice %885 {offsets = [0, 0], sizes = [8, 128], strides = [1, 1]} : vector<8x256xf32> to vector<8x128xf32>
    %887 = vector.extract_strided_slice %885 {offsets = [0, 128], sizes = [8, 128], strides = [1, 1]} : vector<8x256xf32> to vector<8x128xf32>
    %888 = vector.extract_strided_slice %881 {offsets = [0, 0], sizes = [8, 64], strides = [1, 1]} : vector<8x128xf32> to vector<8x64xf32>
    %889 = vector.extract_strided_slice %886 {offsets = [0, 0], sizes = [8, 64], strides = [1, 1]} : vector<8x128xf32> to vector<8x64xf32>
    %890 = arith.addf %888, %889 : vector<8x64xf32>
    %891 = arith.negf %890 : vector<8x64xf32>
    %892 = math.exp %891 : vector<8x64xf32>
    %cst_193 = arith.constant 1.000000e+00 : f32
    %893 = vector.broadcast %cst_193 : f32 to vector<8x64xf32>
    %894 = arith.addf %893, %892 : vector<8x64xf32>
    %895 = arith.divf %893, %894 : vector<8x64xf32>
    %896 = vector.extract_strided_slice %883 {offsets = [0, 0], sizes = [8, 64], strides = [1, 1]} : vector<8x128xf32> to vector<8x64xf32>
    %897 = vector.extract_strided_slice %887 {offsets = [0, 0], sizes = [8, 64], strides = [1, 1]} : vector<8x128xf32> to vector<8x64xf32>
    %898 = arith.addf %896, %897 : vector<8x64xf32>
    %899 = arith.negf %898 : vector<8x64xf32>
    %900 = math.exp %899 : vector<8x64xf32>
    %cst_194 = arith.constant 1.000000e+00 : f32
    %901 = vector.broadcast %cst_194 : f32 to vector<8x64xf32>
    %902 = arith.addf %901, %900 : vector<8x64xf32>
    %903 = arith.divf %901, %902 : vector<8x64xf32>
    %904 = vector.extract_strided_slice %881 {offsets = [0, 64], sizes = [8, 32], strides = [1, 1]} : vector<8x128xf32> to vector<8x32xf32>
    %905 = vector.extract_strided_slice %895 {offsets = [0, 0], sizes = [8, 32], strides = [1, 1]} : vector<8x64xf32> to vector<8x32xf32>
    %906 = vector.extract_strided_slice %886 {offsets = [0, 64], sizes = [8, 32], strides = [1, 1]} : vector<8x128xf32> to vector<8x32xf32>
    %907 = vector.broadcast %641 : vector<1x32xf32> to vector<8x32xf32>
    %908 = arith.addf %906, %907 : vector<8x32xf32>
    %909 = arith.mulf %905, %908 : vector<8x32xf32>
    %910 = arith.addf %904, %909 : vector<8x32xf32>
    %911 = math.tanh %910 : vector<8x32xf32>
    %912 = vector.extract_strided_slice %883 {offsets = [0, 64], sizes = [8, 32], strides = [1, 1]} : vector<8x128xf32> to vector<8x32xf32>
    %913 = vector.extract_strided_slice %903 {offsets = [0, 0], sizes = [8, 32], strides = [1, 1]} : vector<8x64xf32> to vector<8x32xf32>
    %914 = vector.extract_strided_slice %887 {offsets = [0, 64], sizes = [8, 32], strides = [1, 1]} : vector<8x128xf32> to vector<8x32xf32>
    %915 = vector.broadcast %642 : vector<1x32xf32> to vector<8x32xf32>
    %916 = arith.addf %914, %915 : vector<8x32xf32>
    %917 = arith.mulf %913, %916 : vector<8x32xf32>
    %918 = arith.addf %912, %917 : vector<8x32xf32>
    %919 = math.tanh %918 : vector<8x32xf32>
    %920 = vector.extract_strided_slice %895 {offsets = [0, 32], sizes = [8, 32], strides = [1, 1]} : vector<8x64xf32> to vector<8x32xf32>
    %921 = vector.extract_strided_slice %903 {offsets = [0, 32], sizes = [8, 32], strides = [1, 1]} : vector<8x64xf32> to vector<8x32xf32>
    %cst_195 = arith.constant 1.000000e+00 : f32
    %922 = vector.broadcast %cst_195 : f32 to vector<8x32xf32>
    %923 = arith.subf %922, %920 : vector<8x32xf32>
    %924 = arith.mulf %923, %911 : vector<8x32xf32>
    %925 = arith.mulf %920, %862 : vector<8x32xf32>
    %926 = arith.addf %924, %925 : vector<8x32xf32>
    %cst_196 = arith.constant 1.000000e+00 : f32
    %927 = vector.broadcast %cst_196 : f32 to vector<8x32xf32>
    %928 = arith.subf %927, %921 : vector<8x32xf32>
    %929 = arith.mulf %928, %919 : vector<8x32xf32>
    %930 = arith.mulf %921, %866 : vector<8x32xf32>
    %931 = arith.addf %929, %930 : vector<8x32xf32>
    %932 = arith.index_cast %877 : i32 to index
    %c0_197 = arith.constant 0 : index
    %933 = vector.load %arg1[%932, %c0_197] : memref<64x1xf32, #tpu.memory_space<vmem>>, vector<8x1xf32>
    %934 = arith.index_cast %879 : i32 to index
    %c0_198 = arith.constant 0 : index
    %935 = vector.load %arg1[%934, %c0_198] : memref<64x1xf32, #tpu.memory_space<vmem>>, vector<8x1xf32>
    %936 = arith.subf %926, %862 : vector<8x32xf32>
    %937 = vector.broadcast %933 : vector<8x1xf32> to vector<8x32xf32>
    %938 = arith.mulf %937, %936 : vector<8x32xf32>
    %939 = arith.addf %862, %938 : vector<8x32xf32>
    %940 = arith.subf %931, %866 : vector<8x32xf32>
    %941 = vector.broadcast %935 : vector<8x1xf32> to vector<8x32xf32>
    %942 = arith.mulf %941, %940 : vector<8x32xf32>
    %943 = arith.addf %866, %942 : vector<8x32xf32>
    %944 = vector.broadcast %933 : vector<8x1xf32> to vector<8x32xf32>
    %945 = arith.mulf %944, %939 : vector<8x32xf32>
    %946 = arith.index_cast %877 : i32 to index
    %c0_199 = arith.constant 0 : index
    %947 = vector.load %arg15[%946, %c0_199] : memref<64x32xf32, #tpu.memory_space<vmem>>, vector<8x32xf32>
    tpu.vector_store %arg15[%946, %c0_199], %945 {strides = array<i32>} : memref<64x32xf32, #tpu.memory_space<vmem>>, vector<8x32xf32>,
    %948 = vector.broadcast %935 : vector<8x1xf32> to vector<8x32xf32>
    %949 = arith.mulf %948, %943 : vector<8x32xf32>
    %950 = arith.index_cast %879 : i32 to index
    %c0_200 = arith.constant 0 : index
    %951 = vector.load %arg16[%950, %c0_200] : memref<64x32xf32, #tpu.memory_space<vmem>>, vector<8x32xf32>
    tpu.vector_store %arg16[%950, %c0_200], %949 {strides = array<i32>} : memref<64x32xf32, #tpu.memory_space<vmem>>, vector<8x32xf32>,
    %c4_i32_201 = arith.constant 4 : i32
    %c7_i32_202 = arith.constant 7 : i32
    %952 = arith.subi %c7_i32_202, %c4_i32_201 : i32
    %c8_i32_203 = arith.constant 8 : i32
    %953 = arith.muli %c4_i32_201, %c8_i32_203 : i32
    %954 = tpu.assume_multiple %953, 8 : i32
    %c8_i32_204 = arith.constant 8 : i32
    %955 = arith.muli %952, %c8_i32_204 : i32
    %956 = tpu.assume_multiple %955, 8 : i32
    %957 = arith.index_cast %954 : i32 to index
    %c0_205 = arith.constant 0 : index
    %958 = vector.load %arg14[%957, %c0_205] : memref<64x256xf32, #tpu.memory_space<vmem>>, vector<8x128xf32>
    %959 = arith.index_cast %956 : i32 to index
    %c128_206 = arith.constant 128 : index
    %960 = vector.load %arg14[%959, %c128_206] : memref<64x256xf32, #tpu.memory_space<vmem>>, vector<8x128xf32>
    %961 = tpu.concatenate %939, %943 in 1 : vector<8x32xf32>, vector<8x32xf32> -> vector<8x64xf32>
    %cst_207 = arith.constant dense<0.000000e+00> : vector<8x256xf32>
    %962 = tpu.matmul %961, %639, %cst_207 {dimension_numbers = #tpu.dot_dimension_numbers<[1], [0], [0], [1], [0, 0, 1, 1], [], []>} : vector<8x64xf32>, vector<64x256xf32>, vector<8x256xf32> -> vector<8x256xf32>
    %963 = vector.extract_strided_slice %962 {offsets = [0, 0], sizes = [8, 128], strides = [1, 1]} : vector<8x256xf32> to vector<8x128xf32>
    %964 = vector.extract_strided_slice %962 {offsets = [0, 128], sizes = [8, 128], strides = [1, 1]} : vector<8x256xf32> to vector<8x128xf32>
    %965 = vector.extract_strided_slice %958 {offsets = [0, 0], sizes = [8, 64], strides = [1, 1]} : vector<8x128xf32> to vector<8x64xf32>
    %966 = vector.extract_strided_slice %963 {offsets = [0, 0], sizes = [8, 64], strides = [1, 1]} : vector<8x128xf32> to vector<8x64xf32>
    %967 = arith.addf %965, %966 : vector<8x64xf32>
    %968 = arith.negf %967 : vector<8x64xf32>
    %969 = math.exp %968 : vector<8x64xf32>
    %cst_208 = arith.constant 1.000000e+00 : f32
    %970 = vector.broadcast %cst_208 : f32 to vector<8x64xf32>
    %971 = arith.addf %970, %969 : vector<8x64xf32>
    %972 = arith.divf %970, %971 : vector<8x64xf32>
    %973 = vector.extract_strided_slice %960 {offsets = [0, 0], sizes = [8, 64], strides = [1, 1]} : vector<8x128xf32> to vector<8x64xf32>
    %974 = vector.extract_strided_slice %964 {offsets = [0, 0], sizes = [8, 64], strides = [1, 1]} : vector<8x128xf32> to vector<8x64xf32>
    %975 = arith.addf %973, %974 : vector<8x64xf32>
    %976 = arith.negf %975 : vector<8x64xf32>
    %977 = math.exp %976 : vector<8x64xf32>
    %cst_209 = arith.constant 1.000000e+00 : f32
    %978 = vector.broadcast %cst_209 : f32 to vector<8x64xf32>
    %979 = arith.addf %978, %977 : vector<8x64xf32>
    %980 = arith.divf %978, %979 : vector<8x64xf32>
    %981 = vector.extract_strided_slice %958 {offsets = [0, 64], sizes = [8, 32], strides = [1, 1]} : vector<8x128xf32> to vector<8x32xf32>
    %982 = vector.extract_strided_slice %972 {offsets = [0, 0], sizes = [8, 32], strides = [1, 1]} : vector<8x64xf32> to vector<8x32xf32>
    %983 = vector.extract_strided_slice %963 {offsets = [0, 64], sizes = [8, 32], strides = [1, 1]} : vector<8x128xf32> to vector<8x32xf32>
    %984 = vector.broadcast %641 : vector<1x32xf32> to vector<8x32xf32>
    %985 = arith.addf %983, %984 : vector<8x32xf32>
    %986 = arith.mulf %982, %985 : vector<8x32xf32>
    %987 = arith.addf %981, %986 : vector<8x32xf32>
    %988 = math.tanh %987 : vector<8x32xf32>
    %989 = vector.extract_strided_slice %960 {offsets = [0, 64], sizes = [8, 32], strides = [1, 1]} : vector<8x128xf32> to vector<8x32xf32>
    %990 = vector.extract_strided_slice %980 {offsets = [0, 0], sizes = [8, 32], strides = [1, 1]} : vector<8x64xf32> to vector<8x32xf32>
    %991 = vector.extract_strided_slice %964 {offsets = [0, 64], sizes = [8, 32], strides = [1, 1]} : vector<8x128xf32> to vector<8x32xf32>
    %992 = vector.broadcast %642 : vector<1x32xf32> to vector<8x32xf32>
    %993 = arith.addf %991, %992 : vector<8x32xf32>
    %994 = arith.mulf %990, %993 : vector<8x32xf32>
    %995 = arith.addf %989, %994 : vector<8x32xf32>
    %996 = math.tanh %995 : vector<8x32xf32>
    %997 = vector.extract_strided_slice %972 {offsets = [0, 32], sizes = [8, 32], strides = [1, 1]} : vector<8x64xf32> to vector<8x32xf32>
    %998 = vector.extract_strided_slice %980 {offsets = [0, 32], sizes = [8, 32], strides = [1, 1]} : vector<8x64xf32> to vector<8x32xf32>
    %cst_210 = arith.constant 1.000000e+00 : f32
    %999 = vector.broadcast %cst_210 : f32 to vector<8x32xf32>
    %1000 = arith.subf %999, %997 : vector<8x32xf32>
    %1001 = arith.mulf %1000, %988 : vector<8x32xf32>
    %1002 = arith.mulf %997, %939 : vector<8x32xf32>
    %1003 = arith.addf %1001, %1002 : vector<8x32xf32>
    %cst_211 = arith.constant 1.000000e+00 : f32
    %1004 = vector.broadcast %cst_211 : f32 to vector<8x32xf32>
    %1005 = arith.subf %1004, %998 : vector<8x32xf32>
    %1006 = arith.mulf %1005, %996 : vector<8x32xf32>
    %1007 = arith.mulf %998, %943 : vector<8x32xf32>
    %1008 = arith.addf %1006, %1007 : vector<8x32xf32>
    %1009 = arith.index_cast %954 : i32 to index
    %c0_212 = arith.constant 0 : index
    %1010 = vector.load %arg1[%1009, %c0_212] : memref<64x1xf32, #tpu.memory_space<vmem>>, vector<8x1xf32>
    %1011 = arith.index_cast %956 : i32 to index
    %c0_213 = arith.constant 0 : index
    %1012 = vector.load %arg1[%1011, %c0_213] : memref<64x1xf32, #tpu.memory_space<vmem>>, vector<8x1xf32>
    %1013 = arith.subf %1003, %939 : vector<8x32xf32>
    %1014 = vector.broadcast %1010 : vector<8x1xf32> to vector<8x32xf32>
    %1015 = arith.mulf %1014, %1013 : vector<8x32xf32>
    %1016 = arith.addf %939, %1015 : vector<8x32xf32>
    %1017 = arith.subf %1008, %943 : vector<8x32xf32>
    %1018 = vector.broadcast %1012 : vector<8x1xf32> to vector<8x32xf32>
    %1019 = arith.mulf %1018, %1017 : vector<8x32xf32>
    %1020 = arith.addf %943, %1019 : vector<8x32xf32>
    %1021 = vector.broadcast %1010 : vector<8x1xf32> to vector<8x32xf32>
    %1022 = arith.mulf %1021, %1016 : vector<8x32xf32>
    %1023 = arith.index_cast %954 : i32 to index
    %c0_214 = arith.constant 0 : index
    %1024 = vector.load %arg15[%1023, %c0_214] : memref<64x32xf32, #tpu.memory_space<vmem>>, vector<8x32xf32>
    tpu.vector_store %arg15[%1023, %c0_214], %1022 {strides = array<i32>} : memref<64x32xf32, #tpu.memory_space<vmem>>, vector<8x32xf32>,
    %1025 = vector.broadcast %1012 : vector<8x1xf32> to vector<8x32xf32>
    %1026 = arith.mulf %1025, %1020 : vector<8x32xf32>
    %1027 = arith.index_cast %956 : i32 to index
    %c0_215 = arith.constant 0 : index
    %1028 = vector.load %arg16[%1027, %c0_215] : memref<64x32xf32, #tpu.memory_space<vmem>>, vector<8x32xf32>
    tpu.vector_store %arg16[%1027, %c0_215], %1026 {strides = array<i32>} : memref<64x32xf32, #tpu.memory_space<vmem>>, vector<8x32xf32>,
    %c5_i32_216 = arith.constant 5 : i32
    %c7_i32_217 = arith.constant 7 : i32
    %1029 = arith.subi %c7_i32_217, %c5_i32_216 : i32
    %c8_i32_218 = arith.constant 8 : i32
    %1030 = arith.muli %c5_i32_216, %c8_i32_218 : i32
    %1031 = tpu.assume_multiple %1030, 8 : i32
    %c8_i32_219 = arith.constant 8 : i32
    %1032 = arith.muli %1029, %c8_i32_219 : i32
    %1033 = tpu.assume_multiple %1032, 8 : i32
    %1034 = arith.index_cast %1031 : i32 to index
    %c0_220 = arith.constant 0 : index
    %1035 = vector.load %arg14[%1034, %c0_220] : memref<64x256xf32, #tpu.memory_space<vmem>>, vector<8x128xf32>
    %1036 = arith.index_cast %1033 : i32 to index
    %c128_221 = arith.constant 128 : index
    %1037 = vector.load %arg14[%1036, %c128_221] : memref<64x256xf32, #tpu.memory_space<vmem>>, vector<8x128xf32>
    %1038 = tpu.concatenate %1016, %1020 in 1 : vector<8x32xf32>, vector<8x32xf32> -> vector<8x64xf32>
    %cst_222 = arith.constant dense<0.000000e+00> : vector<8x256xf32>
    %1039 = tpu.matmul %1038, %639, %cst_222 {dimension_numbers = #tpu.dot_dimension_numbers<[1], [0], [0], [1], [0, 0, 1, 1], [], []>} : vector<8x64xf32>, vector<64x256xf32>, vector<8x256xf32> -> vector<8x256xf32>
    %1040 = vector.extract_strided_slice %1039 {offsets = [0, 0], sizes = [8, 128], strides = [1, 1]} : vector<8x256xf32> to vector<8x128xf32>
    %1041 = vector.extract_strided_slice %1039 {offsets = [0, 128], sizes = [8, 128], strides = [1, 1]} : vector<8x256xf32> to vector<8x128xf32>
    %1042 = vector.extract_strided_slice %1035 {offsets = [0, 0], sizes = [8, 64], strides = [1, 1]} : vector<8x128xf32> to vector<8x64xf32>
    %1043 = vector.extract_strided_slice %1040 {offsets = [0, 0], sizes = [8, 64], strides = [1, 1]} : vector<8x128xf32> to vector<8x64xf32>
    %1044 = arith.addf %1042, %1043 : vector<8x64xf32>
    %1045 = arith.negf %1044 : vector<8x64xf32>
    %1046 = math.exp %1045 : vector<8x64xf32>
    %cst_223 = arith.constant 1.000000e+00 : f32
    %1047 = vector.broadcast %cst_223 : f32 to vector<8x64xf32>
    %1048 = arith.addf %1047, %1046 : vector<8x64xf32>
    %1049 = arith.divf %1047, %1048 : vector<8x64xf32>
    %1050 = vector.extract_strided_slice %1037 {offsets = [0, 0], sizes = [8, 64], strides = [1, 1]} : vector<8x128xf32> to vector<8x64xf32>
    %1051 = vector.extract_strided_slice %1041 {offsets = [0, 0], sizes = [8, 64], strides = [1, 1]} : vector<8x128xf32> to vector<8x64xf32>
    %1052 = arith.addf %1050, %1051 : vector<8x64xf32>
    %1053 = arith.negf %1052 : vector<8x64xf32>
    %1054 = math.exp %1053 : vector<8x64xf32>
    %cst_224 = arith.constant 1.000000e+00 : f32
    %1055 = vector.broadcast %cst_224 : f32 to vector<8x64xf32>
    %1056 = arith.addf %1055, %1054 : vector<8x64xf32>
    %1057 = arith.divf %1055, %1056 : vector<8x64xf32>
    %1058 = vector.extract_strided_slice %1035 {offsets = [0, 64], sizes = [8, 32], strides = [1, 1]} : vector<8x128xf32> to vector<8x32xf32>
    %1059 = vector.extract_strided_slice %1049 {offsets = [0, 0], sizes = [8, 32], strides = [1, 1]} : vector<8x64xf32> to vector<8x32xf32>
    %1060 = vector.extract_strided_slice %1040 {offsets = [0, 64], sizes = [8, 32], strides = [1, 1]} : vector<8x128xf32> to vector<8x32xf32>
    %1061 = vector.broadcast %641 : vector<1x32xf32> to vector<8x32xf32>
    %1062 = arith.addf %1060, %1061 : vector<8x32xf32>
    %1063 = arith.mulf %1059, %1062 : vector<8x32xf32>
    %1064 = arith.addf %1058, %1063 : vector<8x32xf32>
    %1065 = math.tanh %1064 : vector<8x32xf32>
    %1066 = vector.extract_strided_slice %1037 {offsets = [0, 64], sizes = [8, 32], strides = [1, 1]} : vector<8x128xf32> to vector<8x32xf32>
    %1067 = vector.extract_strided_slice %1057 {offsets = [0, 0], sizes = [8, 32], strides = [1, 1]} : vector<8x64xf32> to vector<8x32xf32>
    %1068 = vector.extract_strided_slice %1041 {offsets = [0, 64], sizes = [8, 32], strides = [1, 1]} : vector<8x128xf32> to vector<8x32xf32>
    %1069 = vector.broadcast %642 : vector<1x32xf32> to vector<8x32xf32>
    %1070 = arith.addf %1068, %1069 : vector<8x32xf32>
    %1071 = arith.mulf %1067, %1070 : vector<8x32xf32>
    %1072 = arith.addf %1066, %1071 : vector<8x32xf32>
    %1073 = math.tanh %1072 : vector<8x32xf32>
    %1074 = vector.extract_strided_slice %1049 {offsets = [0, 32], sizes = [8, 32], strides = [1, 1]} : vector<8x64xf32> to vector<8x32xf32>
    %1075 = vector.extract_strided_slice %1057 {offsets = [0, 32], sizes = [8, 32], strides = [1, 1]} : vector<8x64xf32> to vector<8x32xf32>
    %cst_225 = arith.constant 1.000000e+00 : f32
    %1076 = vector.broadcast %cst_225 : f32 to vector<8x32xf32>
    %1077 = arith.subf %1076, %1074 : vector<8x32xf32>
    %1078 = arith.mulf %1077, %1065 : vector<8x32xf32>
    %1079 = arith.mulf %1074, %1016 : vector<8x32xf32>
    %1080 = arith.addf %1078, %1079 : vector<8x32xf32>
    %cst_226 = arith.constant 1.000000e+00 : f32
    %1081 = vector.broadcast %cst_226 : f32 to vector<8x32xf32>
    %1082 = arith.subf %1081, %1075 : vector<8x32xf32>
    %1083 = arith.mulf %1082, %1073 : vector<8x32xf32>
    %1084 = arith.mulf %1075, %1020 : vector<8x32xf32>
    %1085 = arith.addf %1083, %1084 : vector<8x32xf32>
    %1086 = arith.index_cast %1031 : i32 to index
    %c0_227 = arith.constant 0 : index
    %1087 = vector.load %arg1[%1086, %c0_227] : memref<64x1xf32, #tpu.memory_space<vmem>>, vector<8x1xf32>
    %1088 = arith.index_cast %1033 : i32 to index
    %c0_228 = arith.constant 0 : index
    %1089 = vector.load %arg1[%1088, %c0_228] : memref<64x1xf32, #tpu.memory_space<vmem>>, vector<8x1xf32>
    %1090 = arith.subf %1080, %1016 : vector<8x32xf32>
    %1091 = vector.broadcast %1087 : vector<8x1xf32> to vector<8x32xf32>
    %1092 = arith.mulf %1091, %1090 : vector<8x32xf32>
    %1093 = arith.addf %1016, %1092 : vector<8x32xf32>
    %1094 = arith.subf %1085, %1020 : vector<8x32xf32>
    %1095 = vector.broadcast %1089 : vector<8x1xf32> to vector<8x32xf32>
    %1096 = arith.mulf %1095, %1094 : vector<8x32xf32>
    %1097 = arith.addf %1020, %1096 : vector<8x32xf32>
    %1098 = vector.broadcast %1087 : vector<8x1xf32> to vector<8x32xf32>
    %1099 = arith.mulf %1098, %1093 : vector<8x32xf32>
    %1100 = arith.index_cast %1031 : i32 to index
    %c0_229 = arith.constant 0 : index
    %1101 = vector.load %arg15[%1100, %c0_229] : memref<64x32xf32, #tpu.memory_space<vmem>>, vector<8x32xf32>
    tpu.vector_store %arg15[%1100, %c0_229], %1099 {strides = array<i32>} : memref<64x32xf32, #tpu.memory_space<vmem>>, vector<8x32xf32>,
    %1102 = vector.broadcast %1089 : vector<8x1xf32> to vector<8x32xf32>
    %1103 = arith.mulf %1102, %1097 : vector<8x32xf32>
    %1104 = arith.index_cast %1033 : i32 to index
    %c0_230 = arith.constant 0 : index
    %1105 = vector.load %arg16[%1104, %c0_230] : memref<64x32xf32, #tpu.memory_space<vmem>>, vector<8x32xf32>
    tpu.vector_store %arg16[%1104, %c0_230], %1103 {strides = array<i32>} : memref<64x32xf32, #tpu.memory_space<vmem>>, vector<8x32xf32>,
    %c6_i32_231 = arith.constant 6 : i32
    %c7_i32_232 = arith.constant 7 : i32
    %1106 = arith.subi %c7_i32_232, %c6_i32_231 : i32
    %c8_i32_233 = arith.constant 8 : i32
    %1107 = arith.muli %c6_i32_231, %c8_i32_233 : i32
    %1108 = tpu.assume_multiple %1107, 8 : i32
    %c8_i32_234 = arith.constant 8 : i32
    %1109 = arith.muli %1106, %c8_i32_234 : i32
    %1110 = tpu.assume_multiple %1109, 8 : i32
    %1111 = arith.index_cast %1108 : i32 to index
    %c0_235 = arith.constant 0 : index
    %1112 = vector.load %arg14[%1111, %c0_235] : memref<64x256xf32, #tpu.memory_space<vmem>>, vector<8x128xf32>
    %1113 = arith.index_cast %1110 : i32 to index
    %c128_236 = arith.constant 128 : index
    %1114 = vector.load %arg14[%1113, %c128_236] : memref<64x256xf32, #tpu.memory_space<vmem>>, vector<8x128xf32>
    %1115 = tpu.concatenate %1093, %1097 in 1 : vector<8x32xf32>, vector<8x32xf32> -> vector<8x64xf32>
    %cst_237 = arith.constant dense<0.000000e+00> : vector<8x256xf32>
    %1116 = tpu.matmul %1115, %639, %cst_237 {dimension_numbers = #tpu.dot_dimension_numbers<[1], [0], [0], [1], [0, 0, 1, 1], [], []>} : vector<8x64xf32>, vector<64x256xf32>, vector<8x256xf32> -> vector<8x256xf32>
    %1117 = vector.extract_strided_slice %1116 {offsets = [0, 0], sizes = [8, 128], strides = [1, 1]} : vector<8x256xf32> to vector<8x128xf32>
    %1118 = vector.extract_strided_slice %1116 {offsets = [0, 128], sizes = [8, 128], strides = [1, 1]} : vector<8x256xf32> to vector<8x128xf32>
    %1119 = vector.extract_strided_slice %1112 {offsets = [0, 0], sizes = [8, 64], strides = [1, 1]} : vector<8x128xf32> to vector<8x64xf32>
    %1120 = vector.extract_strided_slice %1117 {offsets = [0, 0], sizes = [8, 64], strides = [1, 1]} : vector<8x128xf32> to vector<8x64xf32>
    %1121 = arith.addf %1119, %1120 : vector<8x64xf32>
    %1122 = arith.negf %1121 : vector<8x64xf32>
    %1123 = math.exp %1122 : vector<8x64xf32>
    %cst_238 = arith.constant 1.000000e+00 : f32
    %1124 = vector.broadcast %cst_238 : f32 to vector<8x64xf32>
    %1125 = arith.addf %1124, %1123 : vector<8x64xf32>
    %1126 = arith.divf %1124, %1125 : vector<8x64xf32>
    %1127 = vector.extract_strided_slice %1114 {offsets = [0, 0], sizes = [8, 64], strides = [1, 1]} : vector<8x128xf32> to vector<8x64xf32>
    %1128 = vector.extract_strided_slice %1118 {offsets = [0, 0], sizes = [8, 64], strides = [1, 1]} : vector<8x128xf32> to vector<8x64xf32>
    %1129 = arith.addf %1127, %1128 : vector<8x64xf32>
    %1130 = arith.negf %1129 : vector<8x64xf32>
    %1131 = math.exp %1130 : vector<8x64xf32>
    %cst_239 = arith.constant 1.000000e+00 : f32
    %1132 = vector.broadcast %cst_239 : f32 to vector<8x64xf32>
    %1133 = arith.addf %1132, %1131 : vector<8x64xf32>
    %1134 = arith.divf %1132, %1133 : vector<8x64xf32>
    %1135 = vector.extract_strided_slice %1112 {offsets = [0, 64], sizes = [8, 32], strides = [1, 1]} : vector<8x128xf32> to vector<8x32xf32>
    %1136 = vector.extract_strided_slice %1126 {offsets = [0, 0], sizes = [8, 32], strides = [1, 1]} : vector<8x64xf32> to vector<8x32xf32>
    %1137 = vector.extract_strided_slice %1117 {offsets = [0, 64], sizes = [8, 32], strides = [1, 1]} : vector<8x128xf32> to vector<8x32xf32>
    %1138 = vector.broadcast %641 : vector<1x32xf32> to vector<8x32xf32>
    %1139 = arith.addf %1137, %1138 : vector<8x32xf32>
    %1140 = arith.mulf %1136, %1139 : vector<8x32xf32>
    %1141 = arith.addf %1135, %1140 : vector<8x32xf32>
    %1142 = math.tanh %1141 : vector<8x32xf32>
    %1143 = vector.extract_strided_slice %1114 {offsets = [0, 64], sizes = [8, 32], strides = [1, 1]} : vector<8x128xf32> to vector<8x32xf32>
    %1144 = vector.extract_strided_slice %1134 {offsets = [0, 0], sizes = [8, 32], strides = [1, 1]} : vector<8x64xf32> to vector<8x32xf32>
    %1145 = vector.extract_strided_slice %1118 {offsets = [0, 64], sizes = [8, 32], strides = [1, 1]} : vector<8x128xf32> to vector<8x32xf32>
    %1146 = vector.broadcast %642 : vector<1x32xf32> to vector<8x32xf32>
    %1147 = arith.addf %1145, %1146 : vector<8x32xf32>
    %1148 = arith.mulf %1144, %1147 : vector<8x32xf32>
    %1149 = arith.addf %1143, %1148 : vector<8x32xf32>
    %1150 = math.tanh %1149 : vector<8x32xf32>
    %1151 = vector.extract_strided_slice %1126 {offsets = [0, 32], sizes = [8, 32], strides = [1, 1]} : vector<8x64xf32> to vector<8x32xf32>
    %1152 = vector.extract_strided_slice %1134 {offsets = [0, 32], sizes = [8, 32], strides = [1, 1]} : vector<8x64xf32> to vector<8x32xf32>
    %cst_240 = arith.constant 1.000000e+00 : f32
    %1153 = vector.broadcast %cst_240 : f32 to vector<8x32xf32>
    %1154 = arith.subf %1153, %1151 : vector<8x32xf32>
    %1155 = arith.mulf %1154, %1142 : vector<8x32xf32>
    %1156 = arith.mulf %1151, %1093 : vector<8x32xf32>
    %1157 = arith.addf %1155, %1156 : vector<8x32xf32>
    %cst_241 = arith.constant 1.000000e+00 : f32
    %1158 = vector.broadcast %cst_241 : f32 to vector<8x32xf32>
    %1159 = arith.subf %1158, %1152 : vector<8x32xf32>
    %1160 = arith.mulf %1159, %1150 : vector<8x32xf32>
    %1161 = arith.mulf %1152, %1097 : vector<8x32xf32>
    %1162 = arith.addf %1160, %1161 : vector<8x32xf32>
    %1163 = arith.index_cast %1108 : i32 to index
    %c0_242 = arith.constant 0 : index
    %1164 = vector.load %arg1[%1163, %c0_242] : memref<64x1xf32, #tpu.memory_space<vmem>>, vector<8x1xf32>
    %1165 = arith.index_cast %1110 : i32 to index
    %c0_243 = arith.constant 0 : index
    %1166 = vector.load %arg1[%1165, %c0_243] : memref<64x1xf32, #tpu.memory_space<vmem>>, vector<8x1xf32>
    %1167 = arith.subf %1157, %1093 : vector<8x32xf32>
    %1168 = vector.broadcast %1164 : vector<8x1xf32> to vector<8x32xf32>
    %1169 = arith.mulf %1168, %1167 : vector<8x32xf32>
    %1170 = arith.addf %1093, %1169 : vector<8x32xf32>
    %1171 = arith.subf %1162, %1097 : vector<8x32xf32>
    %1172 = vector.broadcast %1166 : vector<8x1xf32> to vector<8x32xf32>
    %1173 = arith.mulf %1172, %1171 : vector<8x32xf32>
    %1174 = arith.addf %1097, %1173 : vector<8x32xf32>
    %1175 = vector.broadcast %1164 : vector<8x1xf32> to vector<8x32xf32>
    %1176 = arith.mulf %1175, %1170 : vector<8x32xf32>
    %1177 = arith.index_cast %1108 : i32 to index
    %c0_244 = arith.constant 0 : index
    %1178 = vector.load %arg15[%1177, %c0_244] : memref<64x32xf32, #tpu.memory_space<vmem>>, vector<8x32xf32>
    tpu.vector_store %arg15[%1177, %c0_244], %1176 {strides = array<i32>} : memref<64x32xf32, #tpu.memory_space<vmem>>, vector<8x32xf32>,
    %1179 = vector.broadcast %1166 : vector<8x1xf32> to vector<8x32xf32>
    %1180 = arith.mulf %1179, %1174 : vector<8x32xf32>
    %1181 = arith.index_cast %1110 : i32 to index
    %c0_245 = arith.constant 0 : index
    %1182 = vector.load %arg16[%1181, %c0_245] : memref<64x32xf32, #tpu.memory_space<vmem>>, vector<8x32xf32>
    tpu.vector_store %arg16[%1181, %c0_245], %1180 {strides = array<i32>} : memref<64x32xf32, #tpu.memory_space<vmem>>, vector<8x32xf32>,
    %c7_i32_246 = arith.constant 7 : i32
    %c7_i32_247 = arith.constant 7 : i32
    %1183 = arith.subi %c7_i32_247, %c7_i32_246 : i32
    %c8_i32_248 = arith.constant 8 : i32
    %1184 = arith.muli %c7_i32_246, %c8_i32_248 : i32
    %1185 = tpu.assume_multiple %1184, 8 : i32
    %c8_i32_249 = arith.constant 8 : i32
    %1186 = arith.muli %1183, %c8_i32_249 : i32
    %1187 = tpu.assume_multiple %1186, 8 : i32
    %1188 = arith.index_cast %1185 : i32 to index
    %c0_250 = arith.constant 0 : index
    %1189 = vector.load %arg14[%1188, %c0_250] : memref<64x256xf32, #tpu.memory_space<vmem>>, vector<8x128xf32>
    %1190 = arith.index_cast %1187 : i32 to index
    %c128_251 = arith.constant 128 : index
    %1191 = vector.load %arg14[%1190, %c128_251] : memref<64x256xf32, #tpu.memory_space<vmem>>, vector<8x128xf32>
    %1192 = tpu.concatenate %1170, %1174 in 1 : vector<8x32xf32>, vector<8x32xf32> -> vector<8x64xf32>
    %cst_252 = arith.constant dense<0.000000e+00> : vector<8x256xf32>
    %1193 = tpu.matmul %1192, %639, %cst_252 {dimension_numbers = #tpu.dot_dimension_numbers<[1], [0], [0], [1], [0, 0, 1, 1], [], []>} : vector<8x64xf32>, vector<64x256xf32>, vector<8x256xf32> -> vector<8x256xf32>
    %1194 = vector.extract_strided_slice %1193 {offsets = [0, 0], sizes = [8, 128], strides = [1, 1]} : vector<8x256xf32> to vector<8x128xf32>
    %1195 = vector.extract_strided_slice %1193 {offsets = [0, 128], sizes = [8, 128], strides = [1, 1]} : vector<8x256xf32> to vector<8x128xf32>
    %1196 = vector.extract_strided_slice %1189 {offsets = [0, 0], sizes = [8, 64], strides = [1, 1]} : vector<8x128xf32> to vector<8x64xf32>
    %1197 = vector.extract_strided_slice %1194 {offsets = [0, 0], sizes = [8, 64], strides = [1, 1]} : vector<8x128xf32> to vector<8x64xf32>
    %1198 = arith.addf %1196, %1197 : vector<8x64xf32>
    %1199 = arith.negf %1198 : vector<8x64xf32>
    %1200 = math.exp %1199 : vector<8x64xf32>
    %cst_253 = arith.constant 1.000000e+00 : f32
    %1201 = vector.broadcast %cst_253 : f32 to vector<8x64xf32>
    %1202 = arith.addf %1201, %1200 : vector<8x64xf32>
    %1203 = arith.divf %1201, %1202 : vector<8x64xf32>
    %1204 = vector.extract_strided_slice %1191 {offsets = [0, 0], sizes = [8, 64], strides = [1, 1]} : vector<8x128xf32> to vector<8x64xf32>
    %1205 = vector.extract_strided_slice %1195 {offsets = [0, 0], sizes = [8, 64], strides = [1, 1]} : vector<8x128xf32> to vector<8x64xf32>
    %1206 = arith.addf %1204, %1205 : vector<8x64xf32>
    %1207 = arith.negf %1206 : vector<8x64xf32>
    %1208 = math.exp %1207 : vector<8x64xf32>
    %cst_254 = arith.constant 1.000000e+00 : f32
    %1209 = vector.broadcast %cst_254 : f32 to vector<8x64xf32>
    %1210 = arith.addf %1209, %1208 : vector<8x64xf32>
    %1211 = arith.divf %1209, %1210 : vector<8x64xf32>
    %1212 = vector.extract_strided_slice %1189 {offsets = [0, 64], sizes = [8, 32], strides = [1, 1]} : vector<8x128xf32> to vector<8x32xf32>
    %1213 = vector.extract_strided_slice %1203 {offsets = [0, 0], sizes = [8, 32], strides = [1, 1]} : vector<8x64xf32> to vector<8x32xf32>
    %1214 = vector.extract_strided_slice %1194 {offsets = [0, 64], sizes = [8, 32], strides = [1, 1]} : vector<8x128xf32> to vector<8x32xf32>
    %1215 = vector.broadcast %641 : vector<1x32xf32> to vector<8x32xf32>
    %1216 = arith.addf %1214, %1215 : vector<8x32xf32>
    %1217 = arith.mulf %1213, %1216 : vector<8x32xf32>
    %1218 = arith.addf %1212, %1217 : vector<8x32xf32>
    %1219 = math.tanh %1218 : vector<8x32xf32>
    %1220 = vector.extract_strided_slice %1191 {offsets = [0, 64], sizes = [8, 32], strides = [1, 1]} : vector<8x128xf32> to vector<8x32xf32>
    %1221 = vector.extract_strided_slice %1211 {offsets = [0, 0], sizes = [8, 32], strides = [1, 1]} : vector<8x64xf32> to vector<8x32xf32>
    %1222 = vector.extract_strided_slice %1195 {offsets = [0, 64], sizes = [8, 32], strides = [1, 1]} : vector<8x128xf32> to vector<8x32xf32>
    %1223 = vector.broadcast %642 : vector<1x32xf32> to vector<8x32xf32>
    %1224 = arith.addf %1222, %1223 : vector<8x32xf32>
    %1225 = arith.mulf %1221, %1224 : vector<8x32xf32>
    %1226 = arith.addf %1220, %1225 : vector<8x32xf32>
    %1227 = math.tanh %1226 : vector<8x32xf32>
    %1228 = vector.extract_strided_slice %1203 {offsets = [0, 32], sizes = [8, 32], strides = [1, 1]} : vector<8x64xf32> to vector<8x32xf32>
    %1229 = vector.extract_strided_slice %1211 {offsets = [0, 32], sizes = [8, 32], strides = [1, 1]} : vector<8x64xf32> to vector<8x32xf32>
    %cst_255 = arith.constant 1.000000e+00 : f32
    %1230 = vector.broadcast %cst_255 : f32 to vector<8x32xf32>
    %1231 = arith.subf %1230, %1228 : vector<8x32xf32>
    %1232 = arith.mulf %1231, %1219 : vector<8x32xf32>
    %1233 = arith.mulf %1228, %1170 : vector<8x32xf32>
    %1234 = arith.addf %1232, %1233 : vector<8x32xf32>
    %cst_256 = arith.constant 1.000000e+00 : f32
    %1235 = vector.broadcast %cst_256 : f32 to vector<8x32xf32>
    %1236 = arith.subf %1235, %1229 : vector<8x32xf32>
    %1237 = arith.mulf %1236, %1227 : vector<8x32xf32>
    %1238 = arith.mulf %1229, %1174 : vector<8x32xf32>
    %1239 = arith.addf %1237, %1238 : vector<8x32xf32>
    %1240 = arith.index_cast %1185 : i32 to index
    %c0_257 = arith.constant 0 : index
    %1241 = vector.load %arg1[%1240, %c0_257] : memref<64x1xf32, #tpu.memory_space<vmem>>, vector<8x1xf32>
    %1242 = arith.index_cast %1187 : i32 to index
    %c0_258 = arith.constant 0 : index
    %1243 = vector.load %arg1[%1242, %c0_258] : memref<64x1xf32, #tpu.memory_space<vmem>>, vector<8x1xf32>
    %1244 = arith.subf %1234, %1170 : vector<8x32xf32>
    %1245 = vector.broadcast %1241 : vector<8x1xf32> to vector<8x32xf32>
    %1246 = arith.mulf %1245, %1244 : vector<8x32xf32>
    %1247 = arith.addf %1170, %1246 : vector<8x32xf32>
    %1248 = arith.subf %1239, %1174 : vector<8x32xf32>
    %1249 = vector.broadcast %1243 : vector<8x1xf32> to vector<8x32xf32>
    %1250 = arith.mulf %1249, %1248 : vector<8x32xf32>
    %1251 = arith.addf %1174, %1250 : vector<8x32xf32>
    %1252 = vector.broadcast %1241 : vector<8x1xf32> to vector<8x32xf32>
    %1253 = arith.mulf %1252, %1247 : vector<8x32xf32>
    %1254 = arith.index_cast %1185 : i32 to index
    %c0_259 = arith.constant 0 : index
    %1255 = vector.load %arg15[%1254, %c0_259] : memref<64x32xf32, #tpu.memory_space<vmem>>, vector<8x32xf32>
    tpu.vector_store %arg15[%1254, %c0_259], %1253 {strides = array<i32>} : memref<64x32xf32, #tpu.memory_space<vmem>>, vector<8x32xf32>,
    %1256 = vector.broadcast %1243 : vector<8x1xf32> to vector<8x32xf32>
    %1257 = arith.mulf %1256, %1251 : vector<8x32xf32>
    %1258 = arith.index_cast %1187 : i32 to index
    %c0_260 = arith.constant 0 : index
    %1259 = vector.load %arg16[%1258, %c0_260] : memref<64x32xf32, #tpu.memory_space<vmem>>, vector<8x32xf32>
    tpu.vector_store %arg16[%1258, %c0_260], %1257 {strides = array<i32>} : memref<64x32xf32, #tpu.memory_space<vmem>>, vector<8x32xf32>,
    %c8_i32_261 = arith.constant 8 : i32
    %c0_262 = arith.constant 0 : index
    %c0_263 = arith.constant 0 : index
    %1260 = vector.load %arg15[%c0_262, %c0_263] : memref<64x32xf32, #tpu.memory_space<vmem>>, vector<64x32xf32>
    %c0_264 = arith.constant 0 : index
    %c0_265 = arith.constant 0 : index
    %1261 = vector.load %arg12[%c0_264, %c0_265] : memref<64x64xf32, #tpu.memory_space<vmem>>, vector<64x32xf32>
    tpu.vector_store %arg12[%c0_264, %c0_265], %1260 {strides = array<i32>} : memref<64x64xf32, #tpu.memory_space<vmem>>, vector<64x32xf32>,
    %c0_266 = arith.constant 0 : index
    %c0_267 = arith.constant 0 : index
    %1262 = vector.load %arg16[%c0_266, %c0_267] : memref<64x32xf32, #tpu.memory_space<vmem>>, vector<64x32xf32>
    %c0_268 = arith.constant 0 : index
    %c32_269 = arith.constant 32 : index
    %1263 = vector.load %arg12[%c0_268, %c32_269] : memref<64x64xf32, #tpu.memory_space<vmem>>, vector<64x32xf32>
    tpu.vector_store %arg12[%c0_268, %c32_269], %1262 {strides = array<i32>} : memref<64x64xf32, #tpu.memory_space<vmem>>, vector<64x32xf32>,
    %1264 = tpu.concatenate %1247, %1251 in 1 : vector<8x32xf32>, vector<8x32xf32> -> vector<8x64xf32>
    %c0_270 = arith.constant 0 : index
    %c0_271 = arith.constant 0 : index
    %1265 = vector.load %arg10[%c0_270, %c0_271] : memref<64x32xf32, #tpu.memory_space<vmem>>, vector<64x32xf32>
    %cst_272 = arith.constant dense<0.000000e+00> : vector<8x32xf32>
    %1266 = tpu.matmul %1264, %1265, %cst_272 {dimension_numbers = #tpu.dot_dimension_numbers<[1], [0], [0], [1], [0, 0, 1, 1], [], []>} : vector<8x64xf32>, vector<64x32xf32>, vector<8x32xf32> -> vector<8x32xf32>
    %c0_273 = arith.constant 0 : index
    %c0_274 = arith.constant 0 : index
    %1267 = vector.load %arg11[%c0_273, %c0_274] : memref<1x32xf32, #tpu.memory_space<vmem>>, vector<1x32xf32>
    %1268 = vector.broadcast %1267 : vector<1x32xf32> to vector<8x32xf32>
    %1269 = arith.addf %1266, %1268 : vector<8x32xf32>
    %1270 = math.tanh %1269 : vector<8x32xf32>
    %c0_275 = arith.constant 0 : index
    %c0_276 = arith.constant 0 : index
    %1271 = vector.load %arg13[%c0_275, %c0_276] : memref<8x32xf32, #tpu.memory_space<vmem>>, vector<8x32xf32>
    tpu.vector_store %arg13[%c0_275, %c0_276], %1270 {strides = array<i32>} : memref<8x32xf32, #tpu.memory_space<vmem>>, vector<8x32xf32>,
    return
  }
}

</mosaic_0001>

<bundles_post_ra>
// kernel: tpu_custom_call.1
= control target key start
LH: loop header
LB: loop body
LE: loop exit
PB: predicated region body
PF: predicated region fallthrough
CT: control target
= control target key end

     0   :  { %19 = vsyncpa [#allocation6], 0  ;;  %s5784_s0 = inlined_call_operand.vmem [shape: f32[64,32], index: 0, kind: input, shape index: {}]   ;;  %s5785_s1 = inlined_call_operand.vmem [shape: f32[64,1], index: 1, kind: input, shape index: {}]   ;;  %s5786_s2 = inlined_call_operand.hbm [shape: f32[32,256], index: 2, kind: input, shape index: {}]   ;;  %s5787_s3 = inlined_call_operand.vmem [shape: f32[1,256], index: 3, kind: input, shape index: {}]   ;;  %s5788_s4 = inlined_call_operand.vmem [shape: f32[64,256], index: 4, kind: input, shape index: {}]   ;;  %s5789_s5 = inlined_call_operand.hbm [shape: f32[1,64], index: 5, kind: input, shape index: {}]   ;;  %s5790_s6 = inlined_call_operand.vmem [shape: f32[64,256], index: 6, kind: input, shape index: {}]   ;;  %s5791_s7 = inlined_call_operand.hbm [shape: f32[1,256], index: 7, kind: input, shape index: {}]   ;;  %s5792_s8 = inlined_call_operand.hbm [shape: f32[64,256], index: 8, kind: input, shape index: {}]   ;;  %s5793_s9 = inlined_call_operand.hbm [shape: f32[1,64], index: 9, kind: input, shape index: {}]   ;;  %s5794_s10 = inlined_call_operand.vmem [shape: f32[64,32], index: 10, kind: input, shape index: {}]   ;;  %s5795_s11 = inlined_call_operand.vmem [shape: f32[1,32], index: 11, kind: input, shape index: {}]   ;;  %s5796_s12 = inlined_call_operand.hbm [shape: f32[64,64], index: 12, kind: output, shape index: {0}]   ;;  %s5797_s13 = inlined_call_operand.hbm [shape: f32[8,32], index: 13, kind: output, shape index: {1}]  }
   0x1   :  { %20 = vsyncpa [#allocation9], 0 }
   0x2   :  { %21 = vsyncpa [#allocation12], 0 }
   0x3   :  { %22 = vsyncpa [#allocation7], 0 }
   0x4   :  { %23 = vsyncpa [#allocation16], 0  ;;  %s4380_s25 = smov [#allocation8]   ;;  %s4216_s29 = scalar_lea.hbm %s5789_s5, 16 }
   0x5   :  { %s50_s26 = sshll.u32 %s4380_s25, 4  ;;  %p4217_p0 = scmp.ne.s32.totalorder %s5789_s5, %s4216_s29  ;;  %s51_s26 = int_to_ptr.vmem [resolvable:$true] %s50_s26 }
   0x6   :  { %p4220_p1 = scmp.lt.u32.totalorder %s4216_s29, %s5789_s5 }
   0x8   :  { %p4222_p2 = pnand %p4220_p1, %p4217_p0 }
   0xa   :  { %4225 = shalt.err (!%p4222_p2)
}
   0xb   :  { %s4226_s17 = scalar_lea.vmem %s51_s26, 16  ;;  %s4230_s18 = scalar_lea.vmem %s51_s26, 32 }
   0xc   :  { %p4227_p3 = scmp.ne.s32.totalorder %s51_s26, %s4226_s17  ;;  %p4231_p4 = scmp.lt.s32.totalorder %s51_s26, %s51_s26 }
   0xd   :  { %p4232_p5 = scmp.lt.s32.totalorder %s4230_s18, %s4226_s17 }
   0xf   :  { %p4233_p6 = por %p4232_p5, %p4231_p4 }
  0x11   :  { %p4234_p7 = pnand %p4233_p6, %p4227_p3 }
  0x13   :  { %4237 = shalt.err (!%p4234_p7)
}
  0x14   :  { %53 = dma.hbm_to_vmem [thread:$0]  %s5789_s5, 16, %s51_s26, [#allocation9]  }
  0x15   :  { %s4381_s21 = smov [#allocation11]   ;;  %s4382_s23 = smov [#allocation5]  }
  0x16   :  { %s71_s22 = sshll.u32 %s4381_s21, 4  ;;  %s33_s24 = sshll.u32 %s4382_s23, 4  ;;  %s72_s22 = int_to_ptr.vmem [resolvable:$true] %s71_s22  ;;  %s34_s24 = int_to_ptr.vmem [resolvable:$true] %s33_s24 }
  0x17   :  { %s4238_s28 = scalar_lea.hbm %s5792_s8, 2048 }
  0x18   :  { %p4239_p8 = scmp.ne.s32.totalorder %s5792_s8, %s4238_s28  ;;  %p4242_p9 = scmp.lt.u32.totalorder %s4238_s28, %s5792_s8 }
  0x1a   :  { %p4244_p10 = pnand %p4242_p9, %p4239_p8 }
  0x1c   :  { %4247 = shalt.err (!%p4244_p10)
}
  0x1d   :  { %s4248_s5 = scalar_lea.vmem %s72_s22, 2048  ;;  %p4253_p12 = scmp.lt.s32.totalorder %s72_s22, %s72_s22 }
  0x1e   :  { %p4249_p11 = scmp.ne.s32.totalorder %s72_s22, %s4248_s5  ;;  %p4254_p13 = scmp.lt.s32.totalorder %s4248_s5, %s4248_s5 }
  0x20   :  { %p4255_p0 = por %p4254_p13, %p4253_p12 }
  0x22   :  { %p4256_p1 = pnand %p4255_p0, %p4249_p11 }
  0x24   :  { %4259 = shalt.err (!%p4256_p1)
}
  0x25   :  { %s4383_s26 = smov 256   ;;  %s4384_s16 = smov 16  }
  0x26   :  { %77 = dma.hbm_to_vmem [thread:$0]  %s5792_s8, 2048, %s72_s22, [#allocation12], %s4383_s26, %s4383_s26, %s4384_s16  }
  0x27   :  { %s4260_s21 = scalar_lea.hbm %s5786_s2, 1024 }
  0x28   :  { %p4261_p2 = scmp.ne.s32.totalorder %s5786_s2, %s4260_s21  ;;  %p4264_p3 = scmp.lt.u32.totalorder %s4260_s21, %s5786_s2 }
  0x2a   :  { %p4266_p4 = pnand %p4264_p3, %p4261_p2 }
  0x2c   :  { %4269 = shalt.err (!%p4266_p4)
}
  0x2d   :  { %s4270_s29 = scalar_lea.vmem %s34_s24, 1024  ;;  %p4275_p6 = scmp.lt.s32.totalorder %s34_s24, %s34_s24 }
  0x2e   :  { %p4271_p5 = scmp.ne.s32.totalorder %s34_s24, %s4270_s29  ;;  %p4276_p7 = scmp.lt.s32.totalorder %s4270_s29, %s4270_s29 }
  0x30   :  { %p4277_p8 = por %p4276_p7, %p4275_p6 }
  0x32   :  { %p4278_p9 = pnand %p4277_p8, %p4271_p5 }
  0x34   :  { %4281 = shalt.err (!%p4278_p9)
}
  0x35   :  { %39 = dma.hbm_to_vmem [thread:$0]  %s5786_s2, 1024, %s34_s24, [#allocation6], %s4383_s26, %s4383_s26, %s4384_s16  }
  0x36   :  { %s4385_s30 = smov [#allocation10]   ;;  %s4386_s15 = smov [#allocation13]  }
  0x37   :  { %s62_s14 = sshll.u32 %s4385_s30, 4  ;;  %s84_s5 = sshll.u32 %s4386_s15, 4  ;;  %s63_s14 = int_to_ptr.vmem [resolvable:$true] %s62_s14  ;;  %s85_s5 = int_to_ptr.vmem [resolvable:$true] %s84_s5 }
  0x38   :  { %s4282_s19 = scalar_lea.hbm %s5791_s7, 32 }
  0x39   :  { %p4283_p10 = scmp.ne.s32.totalorder %s5791_s7, %s4282_s19  ;;  %p4286_p11 = scmp.lt.u32.totalorder %s4282_s19, %s5791_s7 }
  0x3b   :  { %p4288_p12 = pnand %p4286_p11, %p4283_p10 }
  0x3d   :  { %4291 = shalt.err (!%p4288_p12)
}
  0x3e   :  { %s4292_s2 = scalar_lea.vmem %s63_s14, 32  ;;  %p4297_p0 = scmp.lt.s32.totalorder %s63_s14, %s63_s14 }
  0x3f   :  { %p4293_p13 = scmp.ne.s32.totalorder %s63_s14, %s4292_s2  ;;  %p4298_p1 = scmp.lt.s32.totalorder %s4292_s2, %s4292_s2 }
  0x41   :  { %p4299_p2 = por %p4298_p1, %p4297_p0 }
  0x43   :  { %p4300_p3 = pnand %p4299_p2, %p4293_p13 }
  0x45   :  { %4303 = shalt.err (!%p4300_p3)
}
  0x46   :  { %65 = dma.hbm_to_vmem [thread:$0]  %s5791_s7, 32, %s63_s14, [#allocation9]  }
  0x47   :  { %s4304_s28 = scalar_lea.hbm %s5793_s9, 16 }
  0x48   :  { %p4305_p4 = scmp.ne.s32.totalorder %s5793_s9, %s4304_s28  ;;  %p4308_p5 = scmp.lt.u32.totalorder %s4304_s28, %s5793_s9 }
  0x4a   :  { %p4310_p6 = pnand %p4308_p5, %p4305_p4 }
  0x4c   :  { %4313 = shalt.err (!%p4310_p6)
}
  0x4d   :  { %s4314_s15 = scalar_lea.vmem %s85_s5, 16  ;;  %s4318_s17 = scalar_lea.vmem %s85_s5, 32 }
  0x4e   :  { %p4315_p7 = scmp.ne.s32.totalorder %s85_s5, %s4314_s15  ;;  %p4319_p8 = scmp.lt.s32.totalorder %s85_s5, %s85_s5 }
  0x4f   :  { %p4320_p9 = scmp.lt.s32.totalorder %s4318_s17, %s4314_s15 }
  0x51   :  { %p4321_p10 = por %p4320_p9, %p4319_p8 }
  0x53   :  { %p4322_p11 = pnand %p4321_p10, %p4315_p7 }
  0x55   :  { %4325 = shalt.err (!%p4322_p11)
}
  0x56   :  { %87 = dma.hbm_to_vmem [thread:$0]  %s5793_s9, 16, %s85_s5, [#allocation12]  }
  0x57   :  { %4370 = dma.done.wait [#allocation6], 1024  }
  0x58   :  { %4371 = vsyncadd [#allocation6], 4294966272 }
  0x59   :  { %4372 = dma.done.wait [#allocation9], 48  }
  0x5a   :  { %4373 = vsyncadd [#allocation9], 4294967248 }
  0x5b   :  { %4374 = dma.done.wait [#allocation12], 2064  }
  0x5c   :  { %4375 = vsyncadd [#allocation12], 4294965232  ;;  %v4387_v0 = vmov 0.0   ;;  %v116_v1 = vld [vmem:[#allocation5 + $0x8] sm:$0xff]  ;;  %v118_v2 = vld [vmem:[#allocation5 + $0x18] sm:$0xff]  ;;  %vm135_vm0 = vcmask 261120   ;;  %v125_v46 = vlaneseq }
  0x5d   :  { %224 = vmatprep.mubr.f32.mxu0 %v4387_v0  ;;  %382 = vmatprep.mubr.f32.mxu1 %v4387_v0  ;;  %v290_v3 = vld [vmem:[%s5788_s4 + $0x8] sm:$0xff]  ;;  %v3694_v4 = vpack.c.bf16 %v118_v2, %v116_v1  ;;  %v292_v5 = vld [vmem:[%s5788_s4 + $0x18] sm:$0xff]  ;;  %v115_v6 = vld [vmem:[#allocation5] sm:$0xff]  ;;  %s4388_s27 = smov 64   ;;  %v4390_v61 = vmov 0   ;;  %s4391_s25 = smov 96  }
  0x5e   :  { %v117_v7 = vld [vmem:[#allocation5 + $0x10] sm:$0xff]  ;;  %v4536_v8 = vpack.c.bf16 %v292_v5, %v290_v3  ;;  %v289_v10 = vld [vmem:[%s5788_s4] sm:$0xff]  ;;  %v120_v12 = vld [vmem:[#allocation5 + $0x28] sm:$0xff]  ;;  %v4664_v47 = vshrl.u32 %v125_v46, 7  ;;  %4020 = vset.pattern.permute.xlu0 %v4390_v61  ;;  %4021 = vset.pattern.permute.xlu1 %v4390_v61  ;;  %vm314_vm1 = vcmask 523264   ;;  %vm4393_vm2 = vmmov 0  }
  0x5f   :  { %v3696_v9 = vpack.c.bf16 %v117_v7, %v115_v6  ;;  %v291_v11 = vld [vmem:[%s5788_s4 + $0x10] sm:$0xff]  ;;  %3695 = vmatprep.subr.bf16.mxu0 %v3694_v4  ;;  %v122_v14 = vld [vmem:[#allocation5 + $0x38] sm:$0xff]  ;;  %v294_v15 = vld [vmem:[%s5788_s4 + $0x28] sm:$0xff]  ;;  %vm3420_vm3 = vcmask 523520  }
  0x60   :  { %v4544_v13 = vpack.c.bf16 %v291_v11, %v289_v10  ;;  %v296_v16 = vld [vmem:[%s5788_s4 + $0x38] sm:$0xff]  ;;  %3703 = vmatprep.subr.bf16.mxu1 %v4536_v8  ;;  %v3698_v17 = vpack.c.bf16 %v122_v14, %v120_v12  ;;  %v119_v19 = vld [vmem:[#allocation5 + $0x20] sm:$0xff]  ;;  %v121_v20 = vld [vmem:[#allocation5 + $0x30] sm:$0xff]  ;;  %v131_v48 = vsub.s32 1, %v4664_v47  ;;  %v127_v50 = vsub.s32 0, %v4664_v47 }
  0x61   :  { %3697 = vmatpush1.bf16.msra.mxu0 %v3696_v9  ;;  %v4553_v18 = vpack.c.bf16 %v296_v16, %v294_v15  ;;  %v293_v21 = vld [vmem:[%s5788_s4 + $0x20] sm:$0xff]  ;;  %v3700_v22 = vpack.c.bf16 %v121_v20, %v119_v19  ;;  %v295_v23 = vld [vmem:[%s5788_s4 + $0x30] sm:$0xff]  ;;  %v298_v24 = vld [vmem:[%s5788_s4 + $0x48] sm:$0xff] }
  0x62   :  { %3705 = vmatpush1.bf16.msra.mxu1 %v4544_v13  ;;  %3699 = vmatprep.subr.bf16.mxu0 %v3698_v17  ;;  %v4566_v25 = vpack.c.bf16 %v295_v23, %v293_v21  ;;  %v300_v26 = vld [vmem:[%s5788_s4 + $0x58] sm:$0xff]  ;;  %v297_v27 = vld [vmem:[%s5788_s4 + $0x40] sm:$0xff]  ;;  %v299_v28 = vld [vmem:[%s5788_s4 + $0x50] sm:$0xff] }
  0x63   :  { %3707 = vmatprep.subr.bf16.mxu1 %v4553_v18  ;;  %v4577_v29 = vpack.c.bf16 %v300_v26, %v298_v24  ;;  %v302_v30 = vld [vmem:[%s5788_s4 + $0x68] sm:$0xff]  ;;  %v304_v31 = vld [vmem:[%s5788_s4 + $0x78] sm:$0xff]  ;;  %v107_v32 = vld [vmem:[%s5784_s0] sm:$0xff]  ;;  %v4589_v33 = vpack.c.bf16 %v299_v28, %v297_v27 }
  0x64   :  { %v4593_v34 = vpack.c.bf16 %v304_v31, %v302_v30  ;;  %v301_v35 = vld [vmem:[%s5788_s4 + $0x60] sm:$0xff]  ;;  %v303_v36 = vld [vmem:[%s5788_s4 + $0x70] sm:$0xff]  ;;  %v108_v38 = vld [vmem:[%s5784_s0 + $0x8] sm:$0xff]  ;;  %s4389_s4 = smov 32  }
  0x65   :  { %3701 = vmatpush1.bf16.msra.mxu0 %v3700_v22  ;;  %v3574_v37 = vld [vmem:[#allocation8] ss:$0 sm:$0xff]  ;;  %v4609_v39 = vpack.c.bf16 %v303_v36, %v301_v35  ;;  %v109_v40 = vld [vmem:[%s5784_s0 + $0x10] sm:$0xff]  ;;  %v110_v41 = vld [vmem:[%s5784_s0 + $0x18] sm:$0xff] }
  0x66   :  { %3709 = vmatpush1.bf16.msra.mxu1 %v4566_v25  ;;  %3735 = vmatprep.subr.bf16.mxu0 %v4536_v8  ;;  %v111_v42 = vld [vmem:[%s5784_s0 + $0x20] sm:$0xff]  ;;  %v112_v43 = vld [vmem:[%s5784_s0 + $0x28] sm:$0xff]  ;;  %v113_v44 = vld [vmem:[%s5784_s0 + $0x30] sm:$0xff] }
  0x67   :  { %3711 = vmatprep.subr.bf16.mxu1 %v4577_v29  ;;  %408 = vrot.lane.b32.xlu0 %v3574_v37, %s4388_s27  ;;  %v114_v45 = vld [vmem:[%s5784_s0 + $0x38] sm:$0xff]  ;;  %v123_v49 = vld [vmem:[%s5787_s3] sm:$0x3] }
  0x68   :  { %3564 = vmatmul.mubr.msk.f32.vlgmr.msra.gmra.mrb[0].mxu0 %vm135_vm0, %v107_v32  ;;  %v132_v52 = vrot.slane %v123_v49, %v131_v48  ;;  %v128_v55 = vrot.slane %v123_v49, %v127_v50 }
  0x69   :  { %230 = vmatprep.mubr.f32.mxu0 %v4387_v0  ;;  %3737 = vmatpush1.bf16.msra.mxu0 %v4544_v13 }
  0x6a   :  { %3713 = vmatpush1.bf16.msra.mxu1 %v4589_v33  ;;  %3739 = vmatprep.subr.bf16.mxu0 %v4553_v18 }
  0x6b   :  { %3715 = vmatprep.subr.bf16.mxu1 %v4593_v34  ;;  %423 = vrot.lane.b32.xlu0 %v3574_v37, %s4389_s4 }
  0x6c   :  { %3565 = vmatmul.mubr.msk.f32.gmra.mrb[2].mxu0 %vm135_vm0, %v108_v38 }
  0x6d   :  { %236 = vmatprep.mubr.f32.mxu0 %v4387_v0  ;;  %3741 = vmatpush1.bf16.msra.mxu0 %v4566_v25 }
  0x6e   :  { %3717 = vmatpush1.bf16.msra.mxu1 %v4609_v39  ;;  %3743 = vmatprep.subr.bf16.mxu0 %v4577_v29 }
  0x6f   :  { %3719 = vmatprep.subr.bf16.mxu1 %v4536_v8 }
  0x70   :  { %3566 = vmatmul.mubr.msk.f32.gmra.mrb[4].mxu0 %vm135_vm0, %v109_v40 }
  0x71   :  { %383 = vmatmul.mubr.f32.vlgmr.msra.gmra.mrb[0].mxu1 %v4387_v0  ;;  %242 = vmatprep.mubr.f32.mxu0 %v4387_v0 }
  0x72   :  { %3721 = vmatpush1.bf16.msra.mxu1 %v4544_v13  ;;  %564 = vmatprep.mubr.f32.mxu1 %v4387_v0 }
  0x73   :  { %3723 = vmatprep.subr.bf16.mxu1 %v4553_v18  ;;  %3745 = vmatpush1.bf16.msra.mxu0 %v4589_v33 }
  0x74   :  { %3567 = vmatmul.mubr.msk.f32.gmra.mrb[6].mxu0 %vm135_vm0, %v110_v41  ;;  %3747 = vmatprep.subr.bf16.mxu0 %v4593_v34 }
  0x75   :  { %248 = vmatprep.mubr.f32.mxu0 %v4387_v0 }
  0x76   :  { %3725 = vmatpush1.bf16.msra.mxu1 %v4566_v25 }
  0x77   :  { %3727 = vmatprep.subr.bf16.mxu1 %v4577_v29  ;;  %3749 = vmatpush1.bf16.msra.mxu0 %v4609_v39 }
  0x78   :  { %3568 = vmatmul.mubr.msk.f32.gmra.mrb[8].mxu0 %vm135_vm0, %v111_v42  ;;  %3767 = vmatprep.subr.bf16.mxu0 %v4536_v8 }
  0x79   :  { %254 = vmatprep.mubr.f32.mxu0 %v4387_v0 }
  0x7a   :  { %3729 = vmatpush1.bf16.msra.mxu1 %v4589_v33 }
  0x7b   :  { %3731 = vmatprep.subr.bf16.mxu1 %v4593_v34 }
  0x7c   :  { %3569 = vmatmul.mubr.msk.f32.gmra.mrb[10].mxu0 %vm135_vm0, %v112_v43 }
  0x7d   :  { %260 = vmatprep.mubr.f32.mxu0 %v4387_v0 }
  0x7e   :  { %3733 = vmatpush1.bf16.msra.mxu1 %v4609_v39 }
  0x7f   :  { %3751 = vmatprep.subr.bf16.mxu1 %v4536_v8 }
  0x80   :  { %3570 = vmatmul.mubr.msk.f32.gmra.mrb[12].mxu0 %vm135_vm0, %v113_v44 }
  0x81   :  { %266 = vmatprep.mubr.f32.mxu0 %v4387_v0 }
  0x84   :  { %3571 = vmatmul.mubr.msk.f32.gmra.mrb[14].mxu0 %vm135_vm0, %v114_v45 }
  0x85   :  { %739 = vmatprep.mubr.f32.mxu0 %v4387_v0 }
  0xd9   :  { %v4677_v57 = vpop.permute.xlu0 %408 }
  0xdd   :  { %v4688_v6 = vpop.permute.xlu0 %423 }
 0x13b   :  { %v226_v51 = vpop.f32.mrb[0].mxu0 }
 0x13c   :  { %v228_v53 = vpop.f32.mrb[1].mxu0  ;;  %v227_v32 = vadd.f32 %v226_v51, %v128_v55 }
 0x13d   :  { %v4673_v54 = vadd.f32 %v228_v53, %v132_v52 }
 0x13f   :  { %v232_v56 = vpop.f32.mrb[2].mxu0 }
 0x140   :  { %v4679_v58 = vadd.f32 %v232_v56, %v128_v55  ;;  %v234_v59 = vpop.f32.mrb[3].mxu0 }
 0x141   :  { %v4681_v60 = vadd.f32 %v234_v59, %v132_v52 }
 0x143   :  { %v238_v62 = vpop.f32.mrb[4].mxu0 }
 0x144   :  { %v384_v63 = vpop.f32.mrb[0].mxu1  ;;  %v4683_v1 = vadd.f32 %v238_v62, %v128_v55  ;;  %v240_v2 = vpop.f32.mrb[5].mxu0 }
 0x145   :  { %v386_v3 = vpop.f32.mrb[1].mxu1  ;;  %v411_v4 = vadd.f32 %v4677_v57, %v384_v63  ;;  %v4686_v5 = vadd.f32 %v240_v2, %v132_v52  ;;  %v389_v35 = vadd.f32 %v384_v63, %v227_v32  ;;  %v4723_v2 = vld [vmem:[%s5785_s1 + $0x38] sm:$0xff] }
 0x146   :  { %v426_v11 = vadd.f32 %v4688_v6, %v386_v3 }
 0x147   :  { %413 = vrot.lane.b32.xlu1 %v411_v4, %s4388_s27  ;;  %v244_v7 = vpop.f32.mrb[6].mxu0  ;;  %v3572_v37 = vmul.f32 -1.442695, %v389_v35 }
 0x148   :  { %v4691_v9 = vadd.f32 %v244_v7, %v128_v55  ;;  %v246_v10 = vpop.f32.mrb[7].mxu0 }
 0x149   :  { %v4694_v12 = vadd.f32 %v246_v10, %v132_v52  ;;  %4022 = vpow2.f32 %v3572_v37 }
 0x14b   :  { %428 = vrot.lane.b32.xlu1 %v426_v11, %s4388_s27  ;;  %v250_v14 = vpop.f32.mrb[8].mxu0 }
 0x14c   :  { %v4697_v15 = vadd.f32 %v250_v14, %v128_v55  ;;  %v252_v16 = vpop.f32.mrb[9].mxu0 }
 0x14d   :  { %v4699_v17 = vadd.f32 %v252_v16, %v132_v52 }
 0x14f   :  { %v256_v19 = vpop.f32.mrb[10].mxu0 }
 0x150   :  { %v4701_v20 = vadd.f32 %v256_v19, %v128_v55  ;;  %v258_v21 = vpop.f32.mrb[11].mxu0 }
 0x151   :  { %v4703_v22 = vadd.f32 %v258_v21, %v132_v52 }
 0x153   :  { %v262_v23 = vpop.f32.mrb[12].mxu0  ;;  %v4023_v41 = vpop.eup %4022 }
 0x154   :  { %v4705_v24 = vadd.f32 %v262_v23, %v128_v55  ;;  %v264_v26 = vpop.f32.mrb[13].mxu0  ;;  %v393_v42 = vadd.f32 1.0, %v4023_v41 }
 0x155   :  { %v4707_v27 = vadd.f32 %v264_v26, %v132_v52 }
 0x157   :  { %v268_v28 = vpop.f32.mrb[14].mxu0 }
 0x158   :  { %v4709_v30 = vadd.f32 %v268_v28, %v128_v55  ;;  %v270_v31 = vpop.f32.mrb[15].mxu0 }
 0x159   :  { %v271_v36 = vadd.f32 %v270_v31, %v132_v52  ;;  %v4715_v52 = vld [vmem:[%s5785_s1] sm:$0xff] }
 0x15b   :  { %v396_v38 = vadd.f32 %v386_v3, %v271_v36 }
 0x15d   :  { %v3573_v40 = vmul.f32 -1.442695, %v396_v38 }
 0x15f   :  { %4024 = vpow2.f32 %v3573_v40 }
 0x160   :  { %4026 = vrcp.f32 %v393_v42 }
 0x169   :  { %v4025_v43 = vpop.eup %4024 }
 0x16a   :  { %v400_v44 = vadd.f32 1.0, %v4025_v43  ;;  %v4027_v45 = vpop.eup %4026 }
 0x16b   :  { %v438_v4 = vsub.f32 1.0, %v4027_v45  ;;  %v444_v10 = vmul.f32 0.0, %v4027_v45 }
 0x16c   :  { %4028 = vrcp.f32 %v400_v44 }
 0x176   :  { %v4029_v53 = vpop.eup %4028 }
 0x177   :  { %v446_v23 = vsub.f32 1.0, %v4029_v53  ;;  %v452_v28 = vmul.f32 0.0, %v4029_v53 }
 0x1b9   :  { %v414_v46 = vpop.permute.xlu1 %413 }
 0x1ba   :  { %v416_v49 = vmul.f32 %v4027_v45, %v414_v46 }
 0x1bc   :  { %418 = vrot.lane.b32.xlu0 %v416_v49, %s4388_s27 }
 0x1bd   :  { %v429_v51 = vpop.permute.xlu1 %428 }
 0x1be   :  { %v431_v55 = vmul.f32 %v4029_v53, %v429_v51 }
 0x1c0   :  { %433 = vrot.lane.b32.xlu1 %v431_v55, %s4388_s27  ;;  %459 = vperm.xlu0 %4020, %v4715_v52  }
 0x22e   :  { %v419_v56 = vpop.permute.xlu0 %418 }
 0x22f   :  { %v421_v59 = vadd.f32 %v419_v56, %v227_v32 }
 0x231   :  { %4030 = vtanh.f32 %v421_v59 }
 0x232   :  { %v434_v61 = vpop.permute.xlu1 %433 }
 0x233   :  { %v436_v62 = vadd.f32 %v434_v61, %v271_v36 }
 0x235   :  { %4032 = vtanh.f32 %v436_v62 }
 0x23b   :  { %v4031_v63 = vpop.eup %4030 }
 0x23c   :  { %440 = vrot.lane.b32.xlu1 %v4031_v63, %s4391_s25 }
 0x23f   :  { %v4033_v3 = vpop.eup %4032  ;;  %v4727_v16 = vpop.permute.xlu0 %459 }
 0x240   :  { %448 = vrot.lane.b32.xlu0 %v4033_v3, %s4391_s25  ;;  %466 = vperm.xlu1 %4021, %v4723_v2  }
 0x2ae   :  { %v441_v7 = vpop.permute.xlu1 %440 }
 0x2af   :  { %v443_v11 = vmul.f32 %v441_v7, %v438_v4  ;;  %v4762_v4 = vld [vmem:[%s5785_s1 + $0x8] sm:$0xff]  ;;  %v4768_v7 = vld [vmem:[%s5785_s1 + $0x30] sm:$0xff] }
 0x2b1   :  { %v445_v14 = vadd.f32 %v444_v10, %v443_v11 }
 0x2b2   :  { %v449_v21 = vpop.permute.xlu0 %448 }
 0x2b3   :  { %v4730_v19 = vmul.f32 %v4727_v16, %v445_v14  ;;  %v451_v26 = vmul.f32 %v449_v21, %v446_v23 }
 0x2b5   :  { %493 = vrot.lane.b32.xlu1 %v4730_v19, %s4391_s25  ;;  %v453_v32 = vadd.f32 %v452_v28, %v451_v26 }
 0x2bf   :  { %v4734_v31 = vpop.permute.xlu1 %466 }
 0x2c0   :  { %v4737_v35 = vmul.f32 %v4734_v31, %v453_v32 }
 0x327   :  { %v494_v36 = vpop.permute.xlu1 %493 }
 0x328   :  { %v496_v37 = vsel %vm135_vm0, %v494_v36, %v4737_v35 }
 0x329   :  { %3576 = vmatmul.mubr.msk.f32.vlgmr.msra.gmra.mrb[2].mxu1 %vm314_vm1, %v496_v37 }
 0x32a   :  { %3753 = vmatpush1.bf16.msra.mxu1 %v4544_v13  ;;  %914 = vmatprep.mubr.f32.mxu1 %v4387_v0 }
 0x32b   :  { %3755 = vmatprep.subr.bf16.mxu1 %v4553_v18 }
 0x32e   :  { %3757 = vmatpush1.bf16.msra.mxu1 %v4566_v25 }
 0x32f   :  { %3759 = vmatprep.subr.bf16.mxu1 %v4577_v29 }
 0x332   :  { %3761 = vmatpush1.bf16.msra.mxu1 %v4589_v33 }
 0x333   :  { %3763 = vmatprep.subr.bf16.mxu1 %v4593_v34 }
 0x336   :  { %3765 = vmatpush1.bf16.msra.mxu1 %v4609_v39 }
 0x337   :  { %3783 = vmatprep.subr.bf16.mxu1 %v4536_v8 }
 0x3fc   :  { %v566_v38 = vpop.f32.mrb[2].mxu1 }
 0x3fd   :  { %v585_v40 = vadd.f32 %v566_v38, %v4677_v57  ;;  %v568_v41 = vpop.f32.mrb[3].mxu1  ;;  %v571_v43 = vadd.f32 %v566_v38, %v4679_v58 }
 0x3fe   :  { %v597_v42 = vadd.f32 %v568_v41, %v4688_v6  ;;  %v578_v44 = vadd.f32 %v568_v41, %v4707_v27 }
 0x3ff   :  { %587 = vrot.lane.b32.xlu0 %v585_v40, %s4388_s27  ;;  %v3577_v45 = vmul.f32 -1.442695, %v571_v43 }
 0x400   :  { %599 = vrot.lane.b32.xlu1 %v597_v42, %s4388_s27  ;;  %v3578_v46 = vmul.f32 -1.442695, %v578_v44 }
 0x401   :  { %4034 = vpow2.f32 %v3577_v45 }
 0x402   :  { %4036 = vpow2.f32 %v3578_v46 }
 0x40b   :  { %v4035_v49 = vpop.eup %4034 }
 0x40c   :  { %v4037_v53 = vpop.eup %4036  ;;  %v575_v51 = vadd.f32 1.0, %v4035_v49 }
 0x40d   :  { %v582_v55 = vadd.f32 1.0, %v4037_v53 }
 0x40e   :  { %4038 = vrcp.f32 %v575_v51 }
 0x40f   :  { %4040 = vrcp.f32 %v582_v55 }
 0x418   :  { %v4039_v56 = vpop.eup %4038 }
 0x419   :  { %v4041_v61 = vpop.eup %4040  ;;  %v609_v28 = vsub.f32 1.0, %v4039_v56  ;;  %v615_v36 = vmul.f32 %v4039_v56, %v4730_v19 }
 0x41a   :  { %v617_v43 = vsub.f32 1.0, %v4041_v61  ;;  %v623_v45 = vmul.f32 %v4041_v61, %v4737_v35 }
 0x471   :  { %v588_v59 = vpop.permute.xlu0 %587 }
 0x472   :  { %v590_v62 = vmul.f32 %v4039_v56, %v588_v59  ;;  %v600_v63 = vpop.permute.xlu1 %599 }
 0x473   :  { %v602_v3 = vmul.f32 %v4041_v61, %v600_v63 }
 0x474   :  { %592 = vrot.lane.b32.xlu0 %v590_v62, %s4388_s27 }
 0x475   :  { %604 = vrot.lane.b32.xlu1 %v602_v3, %s4388_s27 }
 0x478   :  { %632 = vperm.xlu0 %4020, %v4762_v4  }
 0x47c   :  { %640 = vperm.xlu0 %4020, %v4768_v7  }
 0x4e6   :  { %v593_v10 = vpop.permute.xlu0 %592 }
 0x4e7   :  { %v595_v11 = vadd.f32 %v593_v10, %v4679_v58  ;;  %v605_v14 = vpop.permute.xlu1 %604 }
 0x4e8   :  { %v607_v21 = vadd.f32 %v605_v14, %v4707_v27 }
 0x4e9   :  { %4042 = vtanh.f32 %v595_v11 }
 0x4ea   :  { %4044 = vtanh.f32 %v607_v21 }
 0x4f3   :  { %v4043_v23 = vpop.eup %4042 }
 0x4f4   :  { %611 = vrot.lane.b32.xlu1 %v4043_v23, %s4391_s25  ;;  %v4045_v26 = vpop.eup %4044 }
 0x4f7   :  { %v4777_v58 = vpop.permute.xlu0 %632 }
 0x4f8   :  { %619 = vrot.lane.b32.xlu1 %v4045_v26, %s4391_s25 }
 0x4fb   :  { %v4787_v53 = vpop.permute.xlu0 %640 }
 0x566   :  { %v612_v32 = vpop.permute.xlu1 %611 }
 0x567   :  { %v614_v37 = vmul.f32 %v612_v32, %v609_v28 }
 0x569   :  { %v616_v38 = vadd.f32 %v615_v36, %v614_v37 }
 0x56a   :  { %v620_v42 = vpop.permute.xlu1 %619 }
 0x56b   :  { %v629_v40 = vsub.f32 %v616_v38, %v4730_v19  ;;  %v622_v44 = vmul.f32 %v620_v42, %v617_v43  ;;  %v4816_v43 = vld [vmem:[%s5785_s1 + $0x10] sm:$0xff] }
 0x56d   :  { %v635_v41 = vmul.f32 %v4777_v58, %v629_v40  ;;  %v624_v46 = vadd.f32 %v623_v45, %v622_v44  ;;  %v4822_v44 = vld [vmem:[%s5785_s1 + $0x28] sm:$0xff] }
 0x56f   :  { %v4781_v27 = vadd.f32 %v635_v41, %v4730_v19  ;;  %v637_v49 = vsub.f32 %v624_v46, %v4737_v35 }
 0x571   :  { %668 = vrot.lane.b32.xlu0 %v4781_v27, %s4391_s25  ;;  %v643_v51 = vmul.f32 %v4787_v53, %v637_v49 }
 0x573   :  { %v4791_v55 = vadd.f32 %v643_v51, %v4737_v35 }
 0x5e3   :  { %v669_v56 = vpop.permute.xlu0 %668 }
 0x5e4   :  { %v671_v59 = vsel %vm135_vm0, %v669_v56, %v4791_v55 }
 0x5e5   :  { %3581 = vmatmul.mubr.msk.f32.vlgmr.msra.gmra.mrb[16].mxu0 %vm314_vm1, %v671_v59 }
 0x5e6   :  { %3769 = vmatpush1.bf16.msra.mxu0 %v4544_v13  ;;  %1083 = vmatprep.mubr.f32.mxu0 %v4387_v0 }
 0x5e7   :  { %3771 = vmatprep.subr.bf16.mxu0 %v4553_v18 }
 0x5ea   :  { %3773 = vmatpush1.bf16.msra.mxu0 %v4566_v25 }
 0x5eb   :  { %3775 = vmatprep.subr.bf16.mxu0 %v4577_v29 }
 0x5ee   :  { %3777 = vmatpush1.bf16.msra.mxu0 %v4589_v33 }
 0x5ef   :  { %3779 = vmatprep.subr.bf16.mxu0 %v4593_v34 }
 0x5f2   :  { %3781 = vmatpush1.bf16.msra.mxu0 %v4609_v39 }
 0x5f3   :  { %3799 = vmatprep.subr.bf16.mxu0 %v4536_v8 }
 0x6b8   :  { %v741_v61 = vpop.f32.mrb[16].mxu0 }
 0x6b9   :  { %v760_v62 = vadd.f32 %v741_v61, %v4677_v57  ;;  %v743_v63 = vpop.f32.mrb[17].mxu0  ;;  %v746_v10 = vadd.f32 %v741_v61, %v4683_v1 }
 0x6ba   :  { %v772_v3 = vadd.f32 %v743_v63, %v4688_v6  ;;  %v753_v11 = vadd.f32 %v743_v63, %v4703_v22 }
 0x6bb   :  { %762 = vrot.lane.b32.xlu1 %v760_v62, %s4388_s27  ;;  %v3582_v14 = vmul.f32 -1.442695, %v746_v10 }
 0x6bc   :  { %774 = vrot.lane.b32.xlu0 %v772_v3, %s4388_s27  ;;  %v3583_v21 = vmul.f32 -1.442695, %v753_v11 }
 0x6bd   :  { %4046 = vpow2.f32 %v3582_v14 }
 0x6be   :  { %4048 = vpow2.f32 %v3583_v21 }
 0x6c7   :  { %v4047_v23 = vpop.eup %4046 }
 0x6c8   :  { %v4049_v26 = vpop.eup %4048  ;;  %v750_v28 = vadd.f32 1.0, %v4047_v23 }
 0x6c9   :  { %v757_v32 = vadd.f32 1.0, %v4049_v26 }
 0x6ca   :  { %4050 = vrcp.f32 %v750_v28 }
 0x6cb   :  { %4052 = vrcp.f32 %v757_v32 }
 0x6d4   :  { %v4051_v36 = vpop.eup %4050 }
 0x6d5   :  { %v4053_v38 = vpop.eup %4052  ;;  %v784_v61 = vsub.f32 1.0, %v4051_v36  ;;  %v790_v63 = vmul.f32 %v4051_v36, %v4781_v27 }
 0x6d6   :  { %v792_v23 = vsub.f32 1.0, %v4053_v38  ;;  %v798_v28 = vmul.f32 %v4053_v38, %v4791_v55 }
 0x72d   :  { %v763_v37 = vpop.permute.xlu1 %762 }
 0x72e   :  { %v765_v40 = vmul.f32 %v4051_v36, %v763_v37  ;;  %v775_v41 = vpop.permute.xlu0 %774 }
 0x72f   :  { %v777_v42 = vmul.f32 %v4053_v38, %v775_v41 }
 0x730   :  { %767 = vrot.lane.b32.xlu1 %v765_v40, %s4388_s27 }
 0x731   :  { %779 = vrot.lane.b32.xlu0 %v777_v42, %s4388_s27 }
 0x734   :  { %807 = vperm.xlu1 %4021, %v4816_v43  }
 0x738   :  { %815 = vperm.xlu1 %4021, %v4822_v44  }
 0x7a2   :  { %v768_v45 = vpop.permute.xlu1 %767 }
 0x7a3   :  { %v770_v46 = vadd.f32 %v768_v45, %v4683_v1  ;;  %v780_v49 = vpop.permute.xlu0 %779 }
 0x7a4   :  { %v782_v51 = vadd.f32 %v780_v49, %v4703_v22 }
 0x7a5   :  { %4054 = vtanh.f32 %v770_v46 }
 0x7a6   :  { %4056 = vtanh.f32 %v782_v51 }
 0x7af   :  { %v4055_v56 = vpop.eup %4054 }
 0x7b0   :  { %786 = vrot.lane.b32.xlu0 %v4055_v56, %s4391_s25  ;;  %v4057_v59 = vpop.eup %4056 }
 0x7b3   :  { %v4831_v1 = vpop.permute.xlu1 %807 }
 0x7b4   :  { %794 = vrot.lane.b32.xlu0 %v4057_v59, %s4391_s25 }
 0x7b7   :  { %v4841_v37 = vpop.permute.xlu1 %815 }
 0x822   :  { %v787_v62 = vpop.permute.xlu0 %786 }
 0x823   :  { %v789_v3 = vmul.f32 %v787_v62, %v784_v61 }
 0x825   :  { %v791_v10 = vadd.f32 %v790_v63, %v789_v3 }
 0x826   :  { %v795_v21 = vpop.permute.xlu0 %794 }
 0x827   :  { %v804_v11 = vsub.f32 %v791_v10, %v4781_v27  ;;  %v797_v26 = vmul.f32 %v795_v21, %v792_v23 }
 0x829   :  { %v810_v14 = vmul.f32 %v4831_v1, %v804_v11  ;;  %v799_v32 = vadd.f32 %v798_v28, %v797_v26 }
 0x82b   :  { %v4835_v22 = vadd.f32 %v810_v14, %v4781_v27  ;;  %v812_v36 = vsub.f32 %v799_v32, %v4791_v55  ;;  %v4870_v32 = vld [vmem:[%s5785_s1 + $0x18] sm:$0xff] }
 0x82d   :  { %843 = vrot.lane.b32.xlu1 %v4835_v22, %s4391_s25  ;;  %v818_v40 = vmul.f32 %v4841_v37, %v812_v36  ;;  %v4876_v36 = vld [vmem:[%s5785_s1 + $0x20] sm:$0xff] }
 0x82f   :  { %v4845_v41 = vadd.f32 %v818_v40, %v4791_v55 }
 0x89f   :  { %v844_v42 = vpop.permute.xlu1 %843 }
 0x8a0   :  { %v846_v45 = vsel %vm135_vm0, %v844_v42, %v4845_v41 }
 0x8a1   :  { %3586 = vmatmul.mubr.msk.f32.vlgmr.msra.gmra.mrb[4].mxu1 %vm314_vm1, %v846_v45 }
 0x8a2   :  { %3785 = vmatpush1.bf16.msra.mxu1 %v4544_v13  ;;  %1250 = vmatprep.mubr.f32.mxu1 %v4387_v0 }
 0x8a3   :  { %3787 = vmatprep.subr.bf16.mxu1 %v4553_v18 }
 0x8a6   :  { %3789 = vmatpush1.bf16.msra.mxu1 %v4566_v25 }
 0x8a7   :  { %3791 = vmatprep.subr.bf16.mxu1 %v4577_v29 }
 0x8aa   :  { %3793 = vmatpush1.bf16.msra.mxu1 %v4589_v33 }
 0x8ab   :  { %3795 = vmatprep.subr.bf16.mxu1 %v4593_v34 }
 0x8ae   :  { %3797 = vmatpush1.bf16.msra.mxu1 %v4609_v39 }
 0x8af   :  { %3815 = vmatprep.subr.bf16.mxu1 %v4536_v8 }
 0x974   :  { %v916_v38 = vpop.f32.mrb[4].mxu1 }
 0x975   :  { %v935_v46 = vadd.f32 %v916_v38, %v4677_v57  ;;  %v918_v49 = vpop.f32.mrb[5].mxu1  ;;  %v921_v56 = vadd.f32 %v916_v38, %v4691_v9 }
 0x976   :  { %v947_v51 = vadd.f32 %v918_v49, %v4688_v6  ;;  %v928_v59 = vadd.f32 %v918_v49, %v4699_v17 }
 0x977   :  { %937 = vrot.lane.b32.xlu0 %v935_v46, %s4388_s27  ;;  %v3587_v61 = vmul.f32 -1.442695, %v921_v56 }
 0x978   :  { %949 = vrot.lane.b32.xlu1 %v947_v51, %s4388_s27  ;;  %v3588_v62 = vmul.f32 -1.442695, %v928_v59 }
 0x979   :  { %4058 = vpow2.f32 %v3587_v61 }
 0x97a   :  { %4060 = vpow2.f32 %v3588_v62 }
 0x983   :  { %v4059_v63 = vpop.eup %4058 }
 0x984   :  { %v4061_v8 = vpop.eup %4060  ;;  %v925_v3 = vadd.f32 1.0, %v4059_v63 }
 0x985   :  { %v932_v10 = vadd.f32 1.0, %v4061_v8 }
 0x986   :  { %4062 = vrcp.f32 %v925_v3 }
 0x987   :  { %4064 = vrcp.f32 %v932_v10 }
 0x990   :  { %v4063_v11 = vpop.eup %4062 }
 0x991   :  { %v4065_v21 = vpop.eup %4064  ;;  %v959_v51 = vsub.f32 1.0, %v4063_v11  ;;  %v965_v59 = vmul.f32 %v4063_v11, %v4835_v22 }
 0x992   :  { %v967_v10 = vsub.f32 1.0, %v4065_v21 }
 0x9e9   :  { %v938_v14 = vpop.permute.xlu0 %937 }
 0x9ea   :  { %v940_v23 = vmul.f32 %v4063_v11, %v938_v14  ;;  %v950_v26 = vpop.permute.xlu1 %949 }
 0x9eb   :  { %v952_v28 = vmul.f32 %v4065_v21, %v950_v26 }
 0x9ec   :  { %942 = vrot.lane.b32.xlu0 %v940_v23, %s4388_s27  ;;  %v973_v23 = vmul.f32 %v4065_v21, %v4845_v41 }
 0x9ed   :  { %954 = vrot.lane.b32.xlu1 %v952_v28, %s4388_s27 }
 0x9f0   :  { %982 = vperm.xlu0 %4020, %v4870_v32  }
 0x9f4   :  { %990 = vperm.xlu0 %4020, %v4876_v36  }
 0xa5e   :  { %v943_v40 = vpop.permute.xlu0 %942 }
 0xa5f   :  { %v945_v42 = vadd.f32 %v943_v40, %v4691_v9  ;;  %v955_v45 = vpop.permute.xlu1 %954 }
 0xa60   :  { %v957_v38 = vadd.f32 %v955_v45, %v4699_v17 }
 0xa61   :  { %4066 = vtanh.f32 %v945_v42 }
 0xa62   :  { %4068 = vtanh.f32 %v957_v38 }
 0xa6b   :  { %v4067_v46 = vpop.eup %4066 }
 0xa6c   :  { %961 = vrot.lane.b32.xlu1 %v4067_v46, %s4391_s25  ;;  %v4069_v49 = vpop.eup %4068 }
 0xa6f   :  { %v4885_v9 = vpop.permute.xlu0 %982 }
 0xa70   :  { %969 = vrot.lane.b32.xlu1 %v4069_v49, %s4391_s25 }
 0xa73   :  { %v4895_v28 = vpop.permute.xlu0 %990 }
 0xade   :  { %v962_v56 = vpop.permute.xlu1 %961 }
 0xadf   :  { %v964_v61 = vmul.f32 %v962_v56, %v959_v51 }
 0xae1   :  { %v966_v62 = vadd.f32 %v965_v59, %v964_v61 }
 0xae2   :  { %v970_v3 = vpop.permute.xlu1 %969 }
 0xae3   :  { %v979_v63 = vsub.f32 %v966_v62, %v4835_v22  ;;  %v972_v14 = vmul.f32 %v970_v3, %v967_v10 }
 0xae5   :  { %v985_v8 = vmul.f32 %v4885_v9, %v979_v63  ;;  %v974_v11 = vadd.f32 %v973_v23, %v972_v14 }
 0xae7   :  { %v4889_v17 = vadd.f32 %v985_v8, %v4835_v22  ;;  %v987_v26 = vsub.f32 %v974_v11, %v4845_v41 }
 0xae9   :  { %1012 = vrot.lane.b32.xlu0 %v4889_v17, %s4391_s25  ;;  %v993_v40 = vmul.f32 %v4895_v28, %v987_v26 }
 0xaeb   :  { %v4899_v42 = vadd.f32 %v993_v40, %v4845_v41 }
 0xb5b   :  { %v1013_v45 = vpop.permute.xlu0 %1012 }
 0xb5c   :  { %v1015_v38 = vsel %vm135_vm0, %v1013_v45, %v4899_v42 }
 0xb5d   :  { %3591 = vmatmul.mubr.msk.f32.vlgmr.msra.gmra.mrb[18].mxu0 %vm314_vm1, %v1015_v38 }
 0xb5e   :  { %3801 = vmatpush1.bf16.msra.mxu0 %v4544_v13  ;;  %1417 = vmatprep.mubr.f32.mxu0 %v4387_v0 }
 0xb5f   :  { %3803 = vmatprep.subr.bf16.mxu0 %v4553_v18 }
 0xb62   :  { %3805 = vmatpush1.bf16.msra.mxu0 %v4566_v25 }
 0xb63   :  { %3807 = vmatprep.subr.bf16.mxu0 %v4577_v29 }
 0xb66   :  { %3809 = vmatpush1.bf16.msra.mxu0 %v4589_v33 }
 0xb67   :  { %3811 = vmatprep.subr.bf16.mxu0 %v4593_v34 }
 0xb6a   :  { %3813 = vmatpush1.bf16.msra.mxu0 %v4609_v39 }
 0xc30   :  { %v1085_v21 = vpop.f32.mrb[18].mxu0 }
 0xc31   :  { %v1104_v46 = vadd.f32 %v1085_v21, %v4677_v57  ;;  %v1087_v49 = vpop.f32.mrb[19].mxu0  ;;  %v1090_v56 = vadd.f32 %v1085_v21, %v4697_v15 }
 0xc32   :  { %v1116_v51 = vadd.f32 %v1087_v49, %v4688_v6  ;;  %v1097_v59 = vadd.f32 %v1087_v49, %v4694_v12 }
 0xc33   :  { %1106 = vrot.lane.b32.xlu1 %v1104_v46, %s4388_s27  ;;  %v3592_v61 = vmul.f32 -1.442695, %v1090_v56 }
 0xc34   :  { %1118 = vrot.lane.b32.xlu0 %v1116_v51, %s4388_s27  ;;  %v3593_v62 = vmul.f32 -1.442695, %v1097_v59 }
 0xc35   :  { %4070 = vpow2.f32 %v3592_v61 }
 0xc36   :  { %4072 = vpow2.f32 %v3593_v62 }
 0xc3f   :  { %v4071_v63 = vpop.eup %4070 }
 0xc40   :  { %v4073_v8 = vpop.eup %4072  ;;  %v1094_v3 = vadd.f32 1.0, %v4071_v63 }
 0xc41   :  { %v1101_v10 = vadd.f32 1.0, %v4073_v8 }
 0xc42   :  { %4074 = vrcp.f32 %v1094_v3 }
 0xc43   :  { %4076 = vrcp.f32 %v1101_v10 }
 0xc4c   :  { %v4075_v14 = vpop.eup %4074 }
 0xc4d   :  { %v4077_v11 = vpop.eup %4076  ;;  %v1128_v59 = vsub.f32 1.0, %v4075_v14 }
 0xc4e   :  { %v1136_v10 = vsub.f32 1.0, %v4077_v11 }
 0xca5   :  { %v1107_v23 = vpop.permute.xlu1 %1106 }
 0xca6   :  { %v1109_v26 = vmul.f32 %v4075_v14, %v1107_v23  ;;  %v1119_v40 = vpop.permute.xlu0 %1118 }
 0xca7   :  { %v1121_v45 = vmul.f32 %v4077_v11, %v1119_v40 }
 0xca8   :  { %1111 = vrot.lane.b32.xlu1 %v1109_v26, %s4388_s27  ;;  %v1142_v26 = vmul.f32 %v4077_v11, %v4899_v42 }
 0xca9   :  { %1123 = vrot.lane.b32.xlu0 %v1121_v45, %s4388_s27 }
 0xcac   :  { %1149 = vperm.xlu1 %4021, %v4876_v36   ;;  %v1134_v36 = vmul.f32 %v4075_v14, %v4889_v17 }
 0xcb0   :  { %1157 = vperm.xlu1 %4021, %v4870_v32  }
 0xd1a   :  { %v1112_v38 = vpop.permute.xlu1 %1111 }
 0xd1b   :  { %v1114_v21 = vadd.f32 %v1112_v38, %v4697_v15  ;;  %v1124_v46 = vpop.permute.xlu0 %1123 }
 0xd1c   :  { %v1126_v49 = vadd.f32 %v1124_v46, %v4694_v12 }
 0xd1d   :  { %4078 = vtanh.f32 %v1114_v21 }
 0xd1e   :  { %4080 = vtanh.f32 %v1126_v49 }
 0xd27   :  { %v4079_v51 = vpop.eup %4078 }
 0xd28   :  { %1130 = vrot.lane.b32.xlu0 %v4079_v51, %s4391_s25  ;;  %v4081_v56 = vpop.eup %4080 }
 0xd2b   :  { %v4928_v15 = vpop.permute.xlu1 %1149 }
 0xd2c   :  { %1138 = vrot.lane.b32.xlu0 %v4081_v56, %s4391_s25 }
 0xd2f   :  { %v4938_v45 = vpop.permute.xlu1 %1157 }
 0xd9a   :  { %v1131_v61 = vpop.permute.xlu0 %1130 }
 0xd9b   :  { %v1133_v62 = vmul.f32 %v1131_v61, %v1128_v59 }
 0xd9d   :  { %v1135_v32 = vadd.f32 %v1134_v36, %v1133_v62 }
 0xd9e   :  { %v1139_v3 = vpop.permute.xlu0 %1138 }
 0xd9f   :  { %v1146_v63 = vsub.f32 %v1135_v32, %v4889_v17  ;;  %v1141_v23 = vmul.f32 %v1139_v3, %v1136_v10 }
 0xda1   :  { %v1152_v8 = vmul.f32 %v4928_v15, %v1146_v63  ;;  %v1143_v14 = vadd.f32 %v1142_v26, %v1141_v23 }
 0xda3   :  { %v4932_v12 = vadd.f32 %v1152_v8, %v4889_v17  ;;  %v1154_v40 = vsub.f32 %v1143_v14, %v4899_v42 }
 0xda5   :  { %1179 = vrot.lane.b32.xlu1 %v4932_v12, %s4391_s25  ;;  %v1160_v38 = vmul.f32 %v4938_v45, %v1154_v40 }
 0xda7   :  { %v4942_v21 = vadd.f32 %v1160_v38, %v4899_v42 }
 0xe17   :  { %v1180_v46 = vpop.permute.xlu1 %1179 }
 0xe18   :  { %v1182_v49 = vsel %vm135_vm0, %v1180_v46, %v4942_v21 }
 0xe19   :  { %3596 = vmatmul.mubr.msk.f32.vlgmr.msra.gmra.mrb[6].mxu1 %vm314_vm1, %v1182_v49 }
 0xe1a   :  { %3817 = vmatpush1.bf16.msra.mxu1 %v4544_v13  ;;  %1584 = vmatprep.mubr.f32.mxu1 %v4387_v0 }
 0xe1b   :  { %3819 = vmatprep.subr.bf16.mxu1 %v4553_v18 }
 0xe1e   :  { %3821 = vmatpush1.bf16.msra.mxu1 %v4566_v25 }
 0xe1f   :  { %3823 = vmatprep.subr.bf16.mxu1 %v4577_v29 }
 0xe22   :  { %3825 = vmatpush1.bf16.msra.mxu1 %v4589_v33 }
 0xe23   :  { %3827 = vmatprep.subr.bf16.mxu1 %v4593_v34 }
 0xe26   :  { %3829 = vmatpush1.bf16.msra.mxu1 %v4609_v39 }
 0xeec   :  { %v1252_v11 = vpop.f32.mrb[6].mxu1 }
 0xeed   :  { %v1271_v51 = vadd.f32 %v1252_v11, %v4677_v57  ;;  %v1254_v56 = vpop.f32.mrb[7].mxu1  ;;  %v1257_v18 = vadd.f32 %v1252_v11, %v4701_v20 }
 0xeee   :  { %v1283_v13 = vadd.f32 %v1254_v56, %v4688_v6  ;;  %v1264_v25 = vadd.f32 %v1254_v56, %v4686_v5 }
 0xeef   :  { %1273 = vrot.lane.b32.xlu0 %v1271_v51, %s4388_s27  ;;  %v3597_v29 = vmul.f32 -1.442695, %v1257_v18 }
 0xef0   :  { %1285 = vrot.lane.b32.xlu1 %v1283_v13, %s4388_s27  ;;  %v3598_v33 = vmul.f32 -1.442695, %v1264_v25 }
 0xef1   :  { %4082 = vpow2.f32 %v3597_v29 }
 0xef2   :  { %4084 = vpow2.f32 %v3598_v33 }
 0xefb   :  { %v4083_v34 = vpop.eup %4082 }
 0xefc   :  { %v4085_v39 = vpop.eup %4084  ;;  %v1261_v59 = vadd.f32 1.0, %v4083_v34 }
 0xefd   :  { %v1268_v61 = vadd.f32 1.0, %v4085_v39 }
 0xefe   :  { %4086 = vrcp.f32 %v1261_v59 }
 0xeff   :  { %4088 = vrcp.f32 %v1268_v61 }
 0xf08   :  { %v4087_v36 = vpop.eup %4086 }
 0xf09   :  { %v4089_v32 = vpop.eup %4088  ;;  %v1295_v46 = vsub.f32 1.0, %v4087_v36 }
 0xf0a   :  { %v1303_v18 = vsub.f32 1.0, %v4089_v32  ;;  %v1309_v29 = vmul.f32 %v4089_v32, %v4942_v21 }
 0xf61   :  { %v1274_v62 = vpop.permute.xlu0 %1273 }
 0xf62   :  { %v1276_v63 = vmul.f32 %v4087_v36, %v1274_v62  ;;  %v1286_v8 = vpop.permute.xlu1 %1285 }
 0xf63   :  { %v1288_v3 = vmul.f32 %v4089_v32, %v1286_v8 }
 0xf64   :  { %1278 = vrot.lane.b32.xlu0 %v1276_v63, %s4388_s27 }
 0xf65   :  { %1290 = vrot.lane.b32.xlu1 %v1288_v3, %s4388_s27 }
 0xf68   :  { %1316 = vperm.xlu0 %4020, %v4822_v44   ;;  %v1301_v44 = vmul.f32 %v4087_v36, %v4932_v12 }
 0xf6c   :  { %1324 = vperm.xlu0 %4020, %v4816_v43  }
 0xfd6   :  { %v1279_v10 = vpop.permute.xlu0 %1278 }
 0xfd7   :  { %v1281_v23 = vadd.f32 %v1279_v10, %v4701_v20  ;;  %v1291_v26 = vpop.permute.xlu1 %1290 }
 0xfd8   :  { %v1293_v14 = vadd.f32 %v1291_v26, %v4686_v5 }
 0xfd9   :  { %4090 = vtanh.f32 %v1281_v23 }
 0xfda   :  { %4092 = vtanh.f32 %v1293_v14 }
 0xfe3   :  { %v4091_v40 = vpop.eup %4090 }
 0xfe4   :  { %1297 = vrot.lane.b32.xlu1 %v4091_v40, %s4391_s25  ;;  %v4093_v38 = vpop.eup %4092 }
 0xfe7   :  { %v4971_v20 = vpop.permute.xlu0 %1316 }
 0xfe8   :  { %1305 = vrot.lane.b32.xlu1 %v4093_v38, %s4391_s25 }
 0xfeb   :  { %v4981_v39 = vpop.permute.xlu0 %1324 }
0x1056   :  { %v1298_v49 = vpop.permute.xlu1 %1297 }
0x1057   :  { %v1300_v11 = vmul.f32 %v1298_v49, %v1295_v46 }
0x1059   :  { %v1302_v43 = vadd.f32 %v1301_v44, %v1300_v11 }
0x105a   :  { %v1306_v13 = vpop.permute.xlu1 %1305 }
0x105b   :  { %v1313_v51 = vsub.f32 %v1302_v43, %v4932_v12  ;;  %v1308_v25 = vmul.f32 %v1306_v13, %v1303_v18 }
0x105d   :  { %v1319_v56 = vmul.f32 %v4971_v20, %v1313_v51  ;;  %v1310_v33 = vadd.f32 %v1309_v29, %v1308_v25 }
0x105f   :  { %v4975_v5 = vadd.f32 %v1319_v56, %v4932_v12  ;;  %v1321_v34 = vsub.f32 %v1310_v33, %v4942_v21 }
0x1061   :  { %1346 = vrot.lane.b32.xlu0 %v4975_v5, %s4391_s25  ;;  %v1327_v59 = vmul.f32 %v4981_v39, %v1321_v34 }
0x1063   :  { %v4985_v61 = vadd.f32 %v1327_v59, %v4942_v21 }
0x10d3   :  { %v1347_v36 = vpop.permute.xlu0 %1346 }
0x10d4   :  { %v1349_v62 = vsel %vm135_vm0, %v1347_v36, %v4985_v61 }
0x10d5   :  { %3601 = vmatmul.mubr.msk.f32.vlgmr.msra.gmra.mrb[20].mxu0 %vm314_vm1, %v1349_v62 }
0x10d6   :  { %1796 = vmatprep.mubr.f32.mxu0 %v4387_v0 }
0x11a8   :  { %v1419_v63 = vpop.f32.mrb[20].mxu0 }
0x11a9   :  { %v1438_v32 = vadd.f32 %v1419_v63, %v4677_v57  ;;  %v1421_v8 = vpop.f32.mrb[21].mxu0  ;;  %v1424_v10 = vadd.f32 %v1419_v63, %v4705_v24 }
0x11aa   :  { %v1450_v3 = vadd.f32 %v1421_v8, %v4688_v6  ;;  %v1431_v23 = vadd.f32 %v1421_v8, %v4681_v60 }
0x11ab   :  { %1440 = vrot.lane.b32.xlu1 %v1438_v32, %s4388_s27  ;;  %v3602_v26 = vmul.f32 -1.442695, %v1424_v10 }
0x11ac   :  { %1452 = vrot.lane.b32.xlu0 %v1450_v3, %s4388_s27  ;;  %v3603_v14 = vmul.f32 -1.442695, %v1431_v23 }
0x11ad   :  { %4094 = vpow2.f32 %v3602_v26 }
0x11ae   :  { %4096 = vpow2.f32 %v3603_v14 }
0x11b7   :  { %v4095_v40 = vpop.eup %4094 }
0x11b8   :  { %v4097_v38 = vpop.eup %4096  ;;  %v1428_v46 = vadd.f32 1.0, %v4095_v40 }
0x11b9   :  { %v1435_v49 = vadd.f32 1.0, %v4097_v38 }
0x11ba   :  { %4098 = vrcp.f32 %v1428_v46 }
0x11bb   :  { %4100 = vrcp.f32 %v1435_v49 }
0x11c4   :  { %v4099_v44 = vpop.eup %4098 }
0x11c5   :  { %v4101_v43 = vpop.eup %4100  ;;  %v1462_v36 = vsub.f32 1.0, %v4099_v44 }
0x11c6   :  { %v1470_v10 = vsub.f32 1.0, %v4101_v43  ;;  %v1476_v26 = vmul.f32 %v4101_v43, %v4985_v61 }
0x121d   :  { %v1441_v11 = vpop.permute.xlu1 %1440 }
0x121e   :  { %v1443_v51 = vmul.f32 %v4099_v44, %v1441_v11  ;;  %v1453_v56 = vpop.permute.xlu0 %1452 }
0x121f   :  { %v1455_v13 = vmul.f32 %v4101_v43, %v1453_v56 }
0x1220   :  { %1445 = vrot.lane.b32.xlu1 %v1443_v51, %s4388_s27 }
0x1221   :  { %1457 = vrot.lane.b32.xlu0 %v1455_v13, %s4388_s27 }
0x1224   :  { %1483 = vperm.xlu1 %4021, %v4768_v7   ;;  %v1468_v7 = vmul.f32 %v4099_v44, %v4975_v5 }
0x1228   :  { %1491 = vperm.xlu1 %4021, %v4762_v4  }
0x1292   :  { %v1446_v18 = vpop.permute.xlu1 %1445 }
0x1293   :  { %v1448_v25 = vadd.f32 %v1446_v18, %v4705_v24  ;;  %v1458_v29 = vpop.permute.xlu0 %1457 }
0x1294   :  { %v1460_v33 = vadd.f32 %v1458_v29, %v4681_v60 }
0x1295   :  { %4102 = vtanh.f32 %v1448_v25 }
0x1296   :  { %4104 = vtanh.f32 %v1460_v33 }
0x129f   :  { %v4103_v34 = vpop.eup %4102 }
0x12a0   :  { %1464 = vrot.lane.b32.xlu0 %v4103_v34, %s4391_s25  ;;  %v4105_v59 = vpop.eup %4104 }
0x12a3   :  { %v5007_v24 = vpop.permute.xlu1 %1483 }
0x12a4   :  { %1472 = vrot.lane.b32.xlu0 %v4105_v59, %s4391_s25 }
0x12a7   :  { %v1492_v38 = vpop.permute.xlu1 %1491 }
0x1312   :  { %v1465_v62 = vpop.permute.xlu0 %1464 }
0x1313   :  { %v1467_v63 = vmul.f32 %v1465_v62, %v1462_v36 }
0x1315   :  { %v1469_v4 = vadd.f32 %v1468_v7, %v1467_v63 }
0x1316   :  { %v1473_v3 = vpop.permute.xlu0 %1472 }
0x1317   :  { %v1480_v32 = vsub.f32 %v1469_v4, %v4975_v5  ;;  %v1475_v23 = vmul.f32 %v1473_v3, %v1470_v10  ;;  %v1169_v3 = vmul.f32 %v4942_v21, %v4938_v45  ;;  %v477_v10 = vmul.f32 %v4737_v35, %v4734_v31 }
0x1318   :  { %v995_v45 = vmul.f32 %v4889_v17, %v4885_v9 }
0x1319   :  { %v1486_v8 = vmul.f32 %v5007_v24, %v1480_v32  ;;  %v1477_v14 = vadd.f32 %v1476_v26, %v1475_v23  ;;  %v645_v23 = vmul.f32 %v4781_v27, %v4777_v58  ;;  %v2029_v26 = vld [vmem:[#allocation11 + $0x18] sm:$0xff] }
0x131b   :  { %v5011_v60 = vadd.f32 %v1486_v8, %v4975_v5  ;;  %v1488_v40 = vsub.f32 %v1477_v14, %v4985_v61  ;;  %v2026_v14 = vld [vmem:[#allocation11] sm:$0xff] }
0x131d   :  { %1513 = vrot.lane.b32.xlu1 %v5011_v60, %s4391_s25  ;;  %v1494_v46 = vmul.f32 %v1492_v38, %v1488_v40 }
0x131f   :  { %v5018_v49 = vadd.f32 %v1494_v46, %v4985_v61  ;;  %v2031_v46 = vld [vmem:[#allocation11 + $0x28] sm:$0xff] }
0x1321   :  { %v1503_v8 = vmul.f32 %v5018_v49, %v1492_v38  ;;  %v2028_v38 = vld [vmem:[#allocation11 + $0x10] sm:$0xff] }
0x138f   :  { %v1514_v44 = vpop.permute.xlu1 %1513 }
0x1390   :  { %v1516_v11 = vsel %vm135_vm0, %v1514_v44, %v5018_v49  ;;  %v2033_v44 = vld [vmem:[#allocation11 + $0x38] sm:$0xff] }
0x1391   :  { %3606 = vmatmul.mubr.msk.f32.vlgmr.msra.gmra.mrb[8].mxu1 %vm314_vm1, %v1516_v11  ;;  %v5075_v11 = vpack.c.bf16 %v2028_v38, %v2026_v14 }
0x1392   :  { %2109 = vmatprep.mubr.f32.mxu1 %v4387_v0 }
0x1464   :  { %v1586_v51 = vpop.f32.mrb[8].mxu1 }
0x1465   :  { %v1588_v56 = vpop.f32.mrb[9].mxu1  ;;  %v1605_v13 = vadd.f32 %v1586_v51, %v4677_v57  ;;  %v1591_v29 = vadd.f32 %v1586_v51, %v4709_v30  ;;  %v5077_v51 = vpack.c.bf16 %v2033_v44, %v2031_v46  ;;  %v1685_v46 = vld [vmem:[%s5790_s6 + $0x8] sm:$0xff] }
0x1466   :  { %v1617_v43 = vadd.f32 %v1588_v56, %v4688_v6  ;;  %v1598_v18 = vadd.f32 %v1588_v56, %v4673_v54  ;;  %v2030_v56 = vld [vmem:[#allocation11 + $0x20] sm:$0xff] }
0x1467   :  { %v3607_v33 = vmul.f32 -1.442695, %v1591_v29 }
0x1468   :  { %1619 = vrot.lane.b32.xlu0 %v1617_v43, %s4388_s27  ;;  %v3608_v25 = vmul.f32 -1.442695, %v1598_v18  ;;  %v2032_v43 = vld [vmem:[#allocation11 + $0x30] sm:$0xff]  ;;  %v2037_v18 = vld [vmem:[#allocation11 + $0x58] sm:$0xff] }
0x1469   :  { %v5081_v29 = vpack.c.bf16 %v2032_v43, %v2030_v56 }
0x146a   :  { %4106 = vpow2.f32 %v3608_v25 }
0x146b   :  { %4108 = vpow2.f32 %v3607_v33  ;;  %v2034_v33 = vld [vmem:[#allocation11 + $0x40] sm:$0xff] }
0x146c   :  { %1607 = vrot.lane.b32.xlu0 %v1605_v13, %s4388_s27  ;;  %v2035_v13 = vld [vmem:[#allocation11 + $0x48] sm:$0xff] }
0x1474   :  { %v4107_v34 = vpop.eup %4106 }
0x1475   :  { %v1602_v59 = vadd.f32 1.0, %v4107_v34  ;;  %v4109_v36 = vpop.eup %4108  ;;  %v5085_v34 = vpack.c.bf16 %v2037_v18, %v2035_v13 }
0x1476   :  { %v1595_v62 = vadd.f32 1.0, %v4109_v36  ;;  %v1701_v36 = vld [vmem:[%s5790_s6 + $0x48] sm:$0xff] }
0x1477   :  { %4110 = vrcp.f32 %v1602_v59  ;;  %v2036_v59 = vld [vmem:[#allocation11 + $0x50] sm:$0xff] }
0x1478   :  { %4112 = vrcp.f32 %v1595_v62  ;;  %v1703_v62 = vld [vmem:[%s5790_s6 + $0x58] sm:$0xff] }
0x1481   :  { %v5030_v6 = vpop.eup %4110 }
0x1482   :  { %v5035_v4 = vpop.eup %4112 }
0x14da   :  { %v1620_v7 = vpop.permute.xlu0 %1619 }
0x14db   :  { %v1622_v57 = vmul.f32 %v5030_v6, %v1620_v7  ;;  %v2039_v7 = vld [vmem:[#allocation11 + $0x68] sm:$0xff] }
0x14dd   :  { %1624 = vrot.lane.b32.xlu1 %v1622_v57, %s4388_s27  ;;  %v2041_v57 = vld [vmem:[#allocation11 + $0x78] sm:$0xff] }
0x14de   :  { %v1608_v63 = vpop.permute.xlu0 %1607 }
0x14df   :  { %v1610_v32 = vmul.f32 %v5035_v4, %v1608_v63  ;;  %v3830_v63 = vpack.c.bf16 %v1703_v62, %v1701_v36 }
0x14e1   :  { %1658 = vperm.xlu1 %4021, %v4715_v52   ;;  %v827_v52 = vmul.f32 %v4845_v41, %v4841_v37  ;;  %3831 = vmatprep.subr.bf16.mxu0 %v3830_v63 }
0x14e5   :  { %1612 = vrot.lane.b32.xlu1 %v1610_v32, %s4388_s27 }
0x14e9   :  { %1505 = vrot.lane.b32.xlu1 %v1503_v8, %s4391_s25  ;;  %v5094_v8 = vpack.c.bf16 %v2036_v59, %v2034_v33  ;;  %v1336_v33 = vmul.f32 %v4985_v61, %v4981_v39  ;;  %v1002_v59 = vmul.f32 %v4899_v42, %v4895_v28  ;;  %v820_v39 = vmul.f32 %v4835_v22, %v4831_v1  ;;  %v1686_v1 = vld [vmem:[%s5790_s6 + $0x10] sm:$0xff]  ;;  %v1689_v42 = vld [vmem:[%s5790_s6 + $0x28] sm:$0xff] }
0x14ea   :  { %v1162_v28 = vmul.f32 %v4932_v12, %v4928_v15  ;;  %v1691_v15 = vld [vmem:[%s5790_s6 + $0x38] sm:$0xff] }
0x14eb   :  { %v3842_v61 = vpack.c.bf16 %v1691_v15, %v1689_v42 }
0x14ed   :  { %1171 = vrot.lane.b32.xlu1 %v1169_v3, %s4391_s25  ;;  %v5098_v3 = vpack.c.bf16 %v2041_v57, %v2039_v7  ;;  %v1629_v57 = vsub.f32 1.0, %v5035_v4 }
0x14f1   :  { %1650 = vperm.xlu1 %4021, %v4723_v2   ;;  %v1329_v2 = vmul.f32 %v4975_v5, %v4971_v20  ;;  %v2027_v5 = vld [vmem:[#allocation11 + $0x8] sm:$0xff] }
0x14f2   :  { %v5073_v40 = vpack.c.bf16 %v2029_v26, %v2027_v5  ;;  %v1704_v5 = vld [vmem:[%s5790_s6 + $0x60] sm:$0xff]  ;;  %v1706_v26 = vld [vmem:[%s5790_s6 + $0x70] sm:$0xff] }
0x14f3   :  { %v3836_v38 = vpack.c.bf16 %v1706_v26, %v1704_v5 }
0x14f4   :  { %3847 = vmatprep.subr.bf16.mxu1 %v5073_v40 }
0x14f5   :  { %829 = vrot.lane.b32.xlu1 %v827_v52, %s4391_s25  ;;  %3849 = vmatpush1.bf16.msra.mxu1 %v5075_v11  ;;  %v2038_v52 = vld [vmem:[#allocation11 + $0x60] sm:$0xff] }
0x14f6   :  { %3851 = vmatprep.subr.bf16.mxu1 %v5077_v51 }
0x14f9   :  { %479 = vrot.lane.b32.xlu1 %v477_v10, %s4391_s25  ;;  %3853 = vmatpush1.bf16.msra.mxu1 %v5081_v29  ;;  %v2040_v10 = vld [vmem:[#allocation11 + $0x70] sm:$0xff] }
0x14fa   :  { %3855 = vmatprep.subr.bf16.mxu1 %v5085_v34 }
0x14fd   :  { %647 = vrot.lane.b32.xlu1 %v645_v23, %s4391_s25  ;;  %3857 = vmatpush1.bf16.msra.mxu1 %v5094_v8  ;;  %v5101_v23 = vpack.c.bf16 %v2040_v10, %v2038_v52  ;;  %v1635_v52 = vmul.f32 %v5035_v4, %v5011_v60 }
0x14fe   :  { %3859 = vmatprep.subr.bf16.mxu1 %v5098_v3 }
0x1501   :  { %997 = vrot.lane.b32.xlu1 %v995_v45, %s4391_s25  ;;  %3861 = vmatpush1.bf16.msra.mxu1 %v5101_v23  ;;  %v1700_v45 = vld [vmem:[%s5790_s6 + $0x40] sm:$0xff] }
0x1502   :  { %3863 = vmatprep.subr.bf16.mxu1 %v5073_v40 }
0x1504   :  { %2110 = vmatmul.mubr.f32.vlgmr.msra.gmra.mrb[10].mxu1 %v4387_v0 }
0x1505   :  { %1331 = vrot.lane.b32.xlu1 %v1329_v2, %s4391_s25  ;;  %3865 = vmatpush1.bf16.msra.mxu1 %v5075_v11  ;;  %v1702_v2 = vld [vmem:[%s5790_s6 + $0x50] sm:$0xff] }
0x1506   :  { %2283 = vmatprep.mubr.f32.mxu1 %v4387_v0  ;;  %3867 = vmatprep.subr.bf16.mxu1 %v5077_v51 }
0x1509   :  { %3869 = vmatpush1.bf16.msra.mxu1 %v5081_v29 }
0x150a   :  { %3871 = vmatprep.subr.bf16.mxu1 %v5085_v34 }
0x150d   :  { %3873 = vmatpush1.bf16.msra.mxu1 %v5094_v8 }
0x150e   :  { %3875 = vmatprep.subr.bf16.mxu1 %v5098_v3 }
0x1511   :  { %3877 = vmatpush1.bf16.msra.mxu1 %v5101_v23 }
0x1512   :  { %3879 = vmatprep.subr.bf16.mxu1 %v5073_v40 }
0x154f   :  { %v1625_v37 = vpop.permute.xlu1 %1624 }
0x1550   :  { %v1627_v31 = vadd.f32 %v1625_v37, %v4673_v54  ;;  %v1637_v37 = vsub.f32 1.0, %v5030_v6 }
0x1552   :  { %4114 = vtanh.f32 %v1627_v31  ;;  %v3832_v31 = vpack.c.bf16 %v1702_v2, %v1700_v45 }
0x1554   :  { %3833 = vmatpush1.bf16.msra.mxu0 %v3832_v31 }
0x155c   :  { %v4115_v35 = vpop.eup %4114 }
0x155d   :  { %1639 = vrot.lane.b32.xlu0 %v4115_v35, %s4391_s25 }
0x1560   :  { %v5062_v58 = vpop.permute.xlu1 %1658 }
0x1564   :  { %v5064_v27 = vpop.permute.xlu1 %1612 }
0x1565   :  { %v1615_v18 = vadd.f32 %v5064_v27, %v4709_v30  ;;  %v652_v30 = vmul.f32 %v4791_v55, %v4787_v53  ;;  %v1496_v53 = vmul.f32 %v5011_v60, %v5007_v24  ;;  %v3628_v55 = vld [vmem:[#allocation13] ss:$0 sm:$0xff] }
0x1566   :  { %v1688_v24 = vld [vmem:[%s5790_s6 + $0x20] sm:$0xff] }
0x1567   :  { %4116 = vtanh.f32 %v1615_v18 }
0x1568   :  { %v1506_v41 = vpop.permute.xlu1 %1505 }
0x1569   :  { %1509 = vst.msk [vmem:[#allocation4 + $0x8] sm:$0xff] %vm135_vm0, %v1506_v41  ;;  %v1705_v41 = vld [vmem:[%s5790_s6 + $0x68] sm:$0xff] }
0x156c   :  { %v1172_v9 = vpop.permute.xlu1 %1171 }
0x156d   :  { %1175 = vst.msk [vmem:[#allocation4 + $0x18] sm:$0xff] %vm135_vm0, %v1172_v9  ;;  %v1707_v9 = vld [vmem:[%s5790_s6 + $0x78] sm:$0xff] }
0x1570   :  { %v5068_v17 = vpop.permute.xlu1 %1650 }
0x1571   :  { %v4117_v36 = vpop.eup %4116 }
0x1574   :  { %v830_v21 = vpop.permute.xlu1 %829 }
0x1575   :  { %833 = vst.msk [vmem:[#allocation4 + $0x28] sm:$0xff] %vm135_vm0, %v830_v21  ;;  %v1643_v21 = vmul.f32 %v5030_v6, %v5018_v49  ;;  %v1687_v6 = vld [vmem:[%s5790_s6 + $0x18] sm:$0xff] }
0x1576   :  { %v3838_v56 = vpack.c.bf16 %v1687_v6, %v1685_v46 }
0x1578   :  { %v480_v54 = vpop.permute.xlu1 %479 }
0x1579   :  { %483 = vst.msk [vmem:[#allocation4 + $0x38] sm:$0xff] %vm135_vm0, %v480_v54 }
0x157c   :  { %v648_v20 = vpop.permute.xlu1 %647 }
0x157d   :  { %651 = vst.msk [vmem:[#allocation3 + $0x8] sm:$0xff] %vm135_vm0, %v648_v20  ;;  %v3834_v20 = vpack.c.bf16 %v1707_v9, %v1705_v41  ;;  %v1695_v41 = vld [vmem:[#allocation4 + $0x18] sm:$0xff] }
0x157f   :  { %3835 = vmatprep.subr.bf16.mxu0 %v3834_v20 }
0x1580   :  { %v998_v25 = vpop.permute.xlu1 %997  ;;  %3837 = vmatpush1.bf16.msra.mxu0 %v3836_v38  ;;  %v1697_v38 = vld [vmem:[#allocation4 + $0x28] sm:$0xff]  ;;  %v1699_v46 = vld [vmem:[#allocation4 + $0x38] sm:$0xff] }
0x1581   :  { %1001 = vst.msk [vmem:[#allocation3 + $0x18] sm:$0xff] %vm135_vm0, %v998_v25  ;;  %3839 = vmatprep.subr.bf16.mxu0 %v3838_v56 }
0x1584   :  { %v1332_v32 = vpop.permute.xlu1 %1331 }
0x1585   :  { %1335 = vst.msk [vmem:[#allocation3 + $0x28] sm:$0xff] %vm135_vm0, %v1332_v32  ;;  %v1693_v32 = vld [vmem:[#allocation4 + $0x8] sm:$0xff] }
0x1588   :  { %v1679_v18 = vld [vmem:[#allocation3 + $0x18] sm:$0xff] }
0x15cf   :  { %v1640_v35 = vpop.permute.xlu0 %1639 }
0x15d0   :  { %v1642_v54 = vmul.f32 %v1640_v35, %v1637_v37 }
0x15d2   :  { %v1644_v14 = vadd.f32 %v1643_v21, %v1642_v54 }
0x15d4   :  { %v1655_v44 = vsub.f32 %v1644_v14, %v5018_v49 }
0x15d6   :  { %v1661_v43 = vmul.f32 %v5062_v58, %v1655_v44 }
0x15d7   :  { %v5207_v9 = vpop.f32.mrb[10].mxu1 }
0x15d8   :  { %v1662_v13 = vadd.f32 %v1661_v43, %v5018_v49  ;;  %v471_v49 = vmul.f32 %v4730_v19, %v4727_v16  ;;  %v1684_v19 = vld [vmem:[%s5790_s6] sm:$0xff]  ;;  %v5212_v54 = vpop.f32.mrb[11].mxu1  ;;  %v1677_v43 = vld [vmem:[#allocation3 + $0x8] sm:$0xff] }
0x15d9   :  { %v3840_v12 = vpack.c.bf16 %v1686_v1, %v1684_v19 }
0x15da   :  { %v1670_v25 = vmul.f32 %v1662_v13, %v5062_v58  ;;  %v1690_v58 = vld [vmem:[%s5790_s6 + $0x30] sm:$0xff] }
0x15db   :  { %v3844_v7 = vpack.c.bf16 %v1690_v58, %v1688_v24 }
0x15dc   :  { %1672 = vrot.lane.b32.xlu0 %v1670_v25, %s4391_s25 }
0x15e0   :  { %1338 = vrot.lane.b32.xlu0 %v1336_v33, %s4391_s25  ;;  %v1681_v33 = vld [vmem:[#allocation3 + $0x28] sm:$0xff] }
0x15e4   :  { %1004 = vrot.lane.b32.xlu0 %v1002_v59, %s4391_s25 }
0x15e8   :  { %1631 = vrot.lane.b32.xlu0 %v4117_v36, %s4391_s25 }
0x15ec   :  { %654 = vrot.lane.b32.xlu0 %v652_v30, %s4391_s25 }
0x15f0   :  { %473 = vrot.lane.b32.xlu0 %v471_v49, %s4391_s25 }
0x15f4   :  { %822 = vrot.lane.b32.xlu0 %v820_v39, %s4391_s25 }
0x15f8   :  { %1164 = vrot.lane.b32.xlu0 %v1162_v28, %s4391_s25  ;;  %v1982_v28 = vld [vmem:[#allocation10] sm:$0x3] }
0x15fc   :  { %1498 = vrot.lane.b32.xlu0 %v1496_v53, %s4391_s25  ;;  %v5266_v53 = vrot.slane %v1982_v28, %v127_v50 }
0x1600   :  { %2135 = vrot.lane.b32.xlu0 %v3628_v55, %s4388_s27 }
0x164e   :  { %v1673_v16 = vpop.permute.xlu0 %1672 }
0x164f   :  { %1675 = vst.msk [vmem:[#allocation4] sm:$0xff] %vm135_vm0, %v1673_v16 }
0x1652   :  { %v1339_v22 = vpop.permute.xlu0 %1338 }
0x1653   :  { %1342 = vst.msk [vmem:[#allocation4 + $0x10] sm:$0xff] %vm135_vm0, %v1339_v22 }
0x1656   :  { %v1005_v27 = vpop.permute.xlu0 %1004  ;;  %v1692_v62 = vld [vmem:[#allocation4] sm:$0xff] }
0x1657   :  { %1008 = vst.msk [vmem:[#allocation4 + $0x20] sm:$0xff] %vm135_vm0, %v1005_v27  ;;  %3610 = vmatmul.mubr.msk.f32.vlgmr.msra.gmra.mrb[22].mxu0 %vm135_vm0, %v1692_v62 }
0x1658   :  { %3841 = vmatpush1.bf16.msra.mxu0 %v3840_v12  ;;  %1802 = vmatprep.mubr.f32.mxu0 %v4387_v0 }
0x1659   :  { %3843 = vmatprep.subr.bf16.mxu0 %v3842_v61 }
0x165a   :  { %v1632_v63 = vpop.permute.xlu0 %1631  ;;  %v1694_v37 = vld [vmem:[#allocation4 + $0x10] sm:$0xff] }
0x165b   :  { %v1634_v10 = vmul.f32 %v1632_v63, %v1629_v57  ;;  %3611 = vmatmul.mubr.msk.f32.gmra.mrb[24].mxu0 %vm135_vm0, %v1693_v32 }
0x165c   :  { %1808 = vmatprep.mubr.f32.mxu0 %v4387_v0  ;;  %3845 = vmatpush1.bf16.msra.mxu0 %v3844_v7 }
0x165d   :  { %v1636_v45 = vadd.f32 %v1635_v52, %v1634_v10  ;;  %3895 = vmatprep.subr.bf16.mxu0 %v5073_v40 }
0x165e   :  { %v655_v2 = vpop.permute.xlu0 %654  ;;  %v1696_v26 = vld [vmem:[#allocation4 + $0x20] sm:$0xff] }
0x165f   :  { %v1647_v31 = vsub.f32 %v1636_v45, %v5011_v60  ;;  %658 = vst.msk [vmem:[#allocation4 + $0x30] sm:$0xff] %vm135_vm0, %v655_v2  ;;  %3612 = vmatmul.mubr.msk.f32.gmra.mrb[26].mxu0 %vm135_vm0, %v1694_v37  ;;  %v5300_v37 = vld [vmem:[%s5785_s1] sm:$0xff] }
0x1660   :  { %1814 = vmatprep.mubr.f32.mxu0 %v4387_v0 }
0x1661   :  { %v1653_v4 = vmul.f32 %v5068_v17, %v1647_v31  ;;  %v5306_v31 = vld [vmem:[%s5785_s1 + $0x38] sm:$0xff] }
0x1662   :  { %v474_v35 = vpop.permute.xlu0 %473 }
0x1663   :  { %476 = vst.msk [vmem:[#allocation3] sm:$0xff] %vm135_vm0, %v474_v35  ;;  %3613 = vmatmul.mubr.msk.f32.gmra.mrb[28].mxu0 %vm135_vm0, %v1695_v41  ;;  %v1654_v21 = vadd.f32 %v1653_v4, %v5011_v60  ;;  %v5311_v4 = vrot.slane %v1982_v28, %v131_v48 }
0x1664   :  { %1820 = vmatprep.mubr.f32.mxu0 %v4387_v0 }
0x1665   :  { %v1663_v20 = vmul.f32 %v1654_v21, %v5068_v17 }
0x1666   :  { %v823_v5 = vpop.permute.xlu0 %822  ;;  %v1698_v17 = vld [vmem:[#allocation4 + $0x30] sm:$0xff] }
0x1667   :  { %826 = vst.msk [vmem:[#allocation3 + $0x10] sm:$0xff] %vm135_vm0, %v823_v5  ;;  %3614 = vmatmul.mubr.msk.f32.gmra.mrb[30].mxu0 %vm135_vm0, %v1696_v26  ;;  %1665 = vrot.lane.b32.xlu1 %v1663_v20, %s4391_s25 }
0x1668   :  { %1826 = vmatprep.mubr.f32.mxu0 %v4387_v0 }
0x166a   :  { %v1165_v14 = vpop.permute.xlu0 %1164  ;;  %v1676_v56 = vld [vmem:[#allocation3] sm:$0xff] }
0x166b   :  { %1168 = vst.msk [vmem:[#allocation3 + $0x20] sm:$0xff] %vm135_vm0, %v1165_v14  ;;  %3615 = vmatmul.mubr.msk.f32.gmra.mrb[32].mxu0 %vm135_vm0, %v1697_v38  ;;  %2150 = vrot.lane.b32.xlu1 %v3628_v55, %s4389_s4 }
0x166c   :  { %1832 = vmatprep.mubr.f32.mxu0 %v4387_v0 }
0x166e   :  { %v1499_v60 = vpop.permute.xlu0 %1498  ;;  %v1678_v13 = vld [vmem:[#allocation3 + $0x10] sm:$0xff] }
0x166f   :  { %1502 = vst.msk [vmem:[#allocation3 + $0x30] sm:$0xff] %vm135_vm0, %v1499_v60  ;;  %3616 = vmatmul.mubr.msk.f32.gmra.mrb[34].mxu0 %vm135_vm0, %v1698_v17 }
0x1670   :  { %1838 = vmatprep.mubr.f32.mxu0 %v4387_v0 }
0x1672   :  { %v5227_v6 = vpop.permute.xlu0 %2135  ;;  %v1680_v25 = vld [vmem:[#allocation3 + $0x20] sm:$0xff] }
0x1673   :  { %3617 = vmatmul.mubr.msk.f32.gmra.mrb[36].mxu0 %vm135_vm0, %v1699_v46  ;;  %v2138_v44 = vadd.f32 %v5227_v6, %v5207_v9 }
0x1674   :  { %1933 = vmatprep.mubr.f32.mxu0 %v4387_v0 }
0x1675   :  { %2140 = vrot.lane.b32.xlu0 %v2138_v44, %s4388_s27 }
0x1676   :  { %v1682_v59 = vld [vmem:[#allocation3 + $0x30] sm:$0xff] }
0x1677   :  { %3618 = vmatmul.mubr.msk.f32.vlgmr.msra.gmra.mrb[22].mxu0 %vm135_vm0, %v1676_v56 }
0x1678   :  { %1939 = vmatprep.mubr.f32.mxu0 %v4387_v0  ;;  %3897 = vmatpush1.bf16.msra.mxu0 %v5075_v11 }
0x1679   :  { %3899 = vmatprep.subr.bf16.mxu0 %v5077_v51 }
0x167b   :  { %3619 = vmatmul.mubr.msk.f32.gmra.mrb[24].mxu0 %vm135_vm0, %v1677_v43 }
0x167c   :  { %1945 = vmatprep.mubr.f32.mxu0 %v4387_v0  ;;  %3901 = vmatpush1.bf16.msra.mxu0 %v5081_v29 }
0x167d   :  { %3903 = vmatprep.subr.bf16.mxu0 %v5085_v34 }
0x167f   :  { %3620 = vmatmul.mubr.msk.f32.gmra.mrb[26].mxu0 %vm135_vm0, %v1678_v13 }
0x1680   :  { %1951 = vmatprep.mubr.f32.mxu0 %v4387_v0  ;;  %3905 = vmatpush1.bf16.msra.mxu0 %v5094_v8 }
0x1681   :  { %3907 = vmatprep.subr.bf16.mxu0 %v5098_v3 }
0x1683   :  { %3621 = vmatmul.mubr.msk.f32.gmra.mrb[28].mxu0 %vm135_vm0, %v1679_v18 }
0x1684   :  { %1957 = vmatprep.mubr.f32.mxu0 %v4387_v0  ;;  %3909 = vmatpush1.bf16.msra.mxu0 %v5101_v23 }
0x1685   :  { %3927 = vmatprep.subr.bf16.mxu0 %v5073_v40 }
0x1687   :  { %3622 = vmatmul.mubr.msk.f32.gmra.mrb[30].mxu0 %vm135_vm0, %v1680_v25 }
0x1688   :  { %1963 = vmatprep.mubr.f32.mxu0 %v4387_v0 }
0x168b   :  { %3623 = vmatmul.mubr.msk.f32.gmra.mrb[32].mxu0 %vm135_vm0, %v1681_v33 }
0x168c   :  { %1969 = vmatprep.mubr.f32.mxu0 %v4387_v0 }
0x168f   :  { %3624 = vmatmul.mubr.msk.f32.gmra.mrb[34].mxu0 %vm135_vm0, %v1682_v59 }
0x1690   :  { %1975 = vmatprep.mubr.f32.mxu0 %v4387_v0 }
0x16d9   :  { %v1666_v36 = vpop.permute.xlu1 %1665 }
0x16da   :  { %1669 = vst.msk [vmem:[#allocation3 + $0x38] sm:$0xff] %vm135_vm0, %v1666_v36 }
0x16dd   :  { %v5257_v30 = vpop.permute.xlu1 %2150 }
0x16de   :  { %v2153_v49 = vadd.f32 %v5257_v30, %v5212_v54 }
0x16e0   :  { %2155 = vrot.lane.b32.xlu1 %v2153_v49, %s4388_s27 }
0x16e1   :  { %v1683_v39 = vld [vmem:[#allocation3 + $0x38] sm:$0xff] }
0x16e2   :  { %3625 = vmatmul.mubr.msk.f32.gmra.mrb[36].mxu0 %vm135_vm0, %v1683_v39 }
0x16e3   :  { %2613 = vmatprep.mubr.f32.mxu0 %v4387_v0 }
0x16e7   :  { %v2141_v10 = vpop.permute.xlu0 %2140 }
0x174a   :  { %v1935_v55 = vpop.f32.mrb[22].mxu0 }
0x174b   :  { %v1994_v16 = vadd.f32 %v5266_v53, %v1935_v55  ;;  %v5269_v19 = vpop.f32.mrb[23].mxu0 }
0x174d   :  { %v2116_v1 = vadd.f32 %v5207_v9, %v1994_v16 }
0x174e   :  { %v5272_v22 = vpop.f32.mrb[24].mxu0 }
0x174f   :  { %v3626_v42 = vmul.f32 -1.442695, %v2116_v1  ;;  %v5274_v15 = vpop.f32.mrb[25].mxu0 }
0x1751   :  { %4118 = vpow2.f32 %v3626_v42 }
0x1752   :  { %v5276_v12 = vpop.f32.mrb[26].mxu0  ;;  %v2156_v38 = vpop.permute.xlu1 %2155 }
0x1753   :  { %v5278_v61 = vpop.f32.mrb[27].mxu0 }
0x1756   :  { %v5280_v24 = vpop.f32.mrb[28].mxu0 }
0x1757   :  { %v5282_v50 = vpop.f32.mrb[29].mxu0 }
0x175a   :  { %v5284_v58 = vpop.f32.mrb[30].mxu0 }
0x175b   :  { %v4119_v27 = vpop.eup %4118  ;;  %v5286_v62 = vpop.f32.mrb[31].mxu0 }
0x175c   :  { %v2120_v7 = vadd.f32 1.0, %v4119_v27 }
0x175e   :  { %4120 = vrcp.f32 %v2120_v7  ;;  %v5288_v57 = vpop.f32.mrb[32].mxu0 }
0x175f   :  { %v5290_v63 = vpop.f32.mrb[33].mxu0 }
0x1762   :  { %v5292_v32 = vpop.f32.mrb[34].mxu0 }
0x1763   :  { %v5294_v52 = vpop.f32.mrb[35].mxu0 }
0x1768   :  { %v4121_v45 = vpop.eup %4120 }
0x1769   :  { %v2143_v2 = vmul.f32 %v4121_v45, %v2141_v10  ;;  %v2165_v56 = vsub.f32 1.0, %v4121_v45  ;;  %v2171_v13 = vmul.f32 0.0, %v4121_v45 }
0x176b   :  { %2145 = vrot.lane.b32.xlu0 %v2143_v2, %s4388_s27 }
0x176f   :  { %2185 = vperm.xlu0 %4020, %v5300_v37  }
0x1773   :  { %2192 = vperm.xlu0 %4020, %v5306_v31  }
0x17b5   :  { %v5313_v35 = vpop.f32.mrb[36].mxu0 }
0x17b6   :  { %v1979_v41 = vpop.f32.mrb[37].mxu0 }
0x17b7   :  { %v2009_v9 = vadd.f32 %v5311_v4, %v1979_v41  ;;  %v1996_v41 = vadd.f32 %v5266_v53, %v5272_v22 }
0x17b9   :  { %v2123_v21 = vadd.f32 %v5212_v54, %v2009_v9 }
0x17bb   :  { %v3627_v20 = vmul.f32 -1.442695, %v2123_v21 }
0x17bd   :  { %4122 = vpow2.f32 %v3627_v20 }
0x17c7   :  { %v4123_v5 = vpop.eup %4122 }
0x17c8   :  { %v2127_v26 = vadd.f32 1.0, %v4123_v5 }
0x17ca   :  { %4124 = vrcp.f32 %v2127_v26 }
0x17d4   :  { %v4125_v14 = vpop.eup %4124 }
0x17d5   :  { %v2158_v60 = vmul.f32 %v4125_v14, %v2156_v38  ;;  %v2173_v49 = vsub.f32 1.0, %v4125_v14  ;;  %v2179_v28 = vmul.f32 0.0, %v4125_v14 }
0x17d7   :  { %2160 = vrot.lane.b32.xlu1 %v2158_v60, %s4388_s27 }
0x17dd   :  { %v2146_v47 = vpop.permute.xlu0 %2145 }
0x17de   :  { %v2148_v48 = vadd.f32 %v2146_v47, %v1994_v16 }
0x17e0   :  { %4126 = vtanh.f32 %v2148_v48 }
0x17ea   :  { %v4127_v17 = vpop.eup %4126 }
0x17eb   :  { %2167 = vrot.lane.b32.xlu1 %v4127_v17, %s4391_s25 }
0x17ee   :  { %v5320_v33 = vpop.permute.xlu0 %2185 }
0x17f2   :  { %v5327_v16 = vpop.permute.xlu0 %2192 }
0x1849   :  { %v2161_v46 = vpop.permute.xlu1 %2160 }
0x184a   :  { %v2163_v44 = vadd.f32 %v2161_v46, %v2009_v9  ;;  %v2007_v9 = vadd.f32 %v5311_v4, %v5294_v52  ;;  %v5357_v52 = vld [vmem:[%s5785_s1 + $0x8] sm:$0xff] }
0x184c   :  { %4128 = vtanh.f32 %v2163_v44 }
0x1856   :  { %v4129_v54 = vpop.eup %4128 }
0x1857   :  { %2175 = vrot.lane.b32.xlu1 %v4129_v54, %s4391_s25 }
0x185d   :  { %v2168_v43 = vpop.permute.xlu1 %2167 }
0x185e   :  { %v2170_v18 = vmul.f32 %v2168_v43, %v2165_v56  ;;  %v5363_v56 = vld [vmem:[%s5785_s1 + $0x30] sm:$0xff] }
0x1860   :  { %v2172_v25 = vadd.f32 %v2171_v13, %v2170_v18 }
0x1862   :  { %v5323_v59 = vmul.f32 %v5320_v33, %v2172_v25 }
0x1864   :  { %2212 = vrot.lane.b32.xlu0 %v5323_v59, %s4391_s25 }
0x18c9   :  { %v2176_v36 = vpop.permute.xlu1 %2175 }
0x18ca   :  { %v2178_v39 = vmul.f32 %v2176_v36, %v2173_v49 }
0x18cc   :  { %v2180_v55 = vadd.f32 %v2179_v28, %v2178_v39 }
0x18ce   :  { %v5330_v1 = vmul.f32 %v5327_v16, %v2180_v55 }
0x18d6   :  { %v2213_v42 = vpop.permute.xlu0 %2212 }
0x18d7   :  { %v2215_v27 = vsel %vm135_vm0, %v2213_v42, %v5330_v1 }
0x18d8   :  { %3630 = vmatmul.mubr.msk.f32.vlgmr.msra.gmra.mrb[12].mxu1 %vm314_vm1, %v2215_v27 }
0x18d9   :  { %3881 = vmatpush1.bf16.msra.mxu1 %v5075_v11  ;;  %2448 = vmatprep.mubr.f32.mxu1 %v4387_v0 }
0x18da   :  { %3883 = vmatprep.subr.bf16.mxu1 %v5077_v51 }
0x18dd   :  { %3885 = vmatpush1.bf16.msra.mxu1 %v5081_v29 }
0x18de   :  { %3887 = vmatprep.subr.bf16.mxu1 %v5085_v34 }
0x18e1   :  { %3889 = vmatpush1.bf16.msra.mxu1 %v5094_v8 }
0x18e2   :  { %3891 = vmatprep.subr.bf16.mxu1 %v5098_v3 }
0x18e5   :  { %3893 = vmatpush1.bf16.msra.mxu1 %v5101_v23 }
0x18e6   :  { %3911 = vmatprep.subr.bf16.mxu1 %v5073_v40 }
0x19ab   :  { %v2285_v7 = vpop.f32.mrb[12].mxu1 }
0x19ac   :  { %v2304_v10 = vadd.f32 %v2285_v7, %v5227_v6  ;;  %v2287_v45 = vpop.f32.mrb[13].mxu1  ;;  %v2290_v21 = vadd.f32 %v2285_v7, %v1996_v41 }
0x19ad   :  { %v2316_v2 = vadd.f32 %v2287_v45, %v5257_v30  ;;  %v2297_v20 = vadd.f32 %v2287_v45, %v2007_v9 }
0x19ae   :  { %2306 = vrot.lane.b32.xlu1 %v2304_v10, %s4388_s27  ;;  %v3631_v5 = vmul.f32 -1.442695, %v2290_v21 }
0x19af   :  { %2318 = vrot.lane.b32.xlu0 %v2316_v2, %s4388_s27  ;;  %v3632_v26 = vmul.f32 -1.442695, %v2297_v20 }
0x19b0   :  { %4130 = vpow2.f32 %v3631_v5 }
0x19b1   :  { %4132 = vpow2.f32 %v3632_v26 }
0x19ba   :  { %v4131_v14 = vpop.eup %4130 }
0x19bb   :  { %v4133_v38 = vpop.eup %4132  ;;  %v2294_v60 = vadd.f32 1.0, %v4131_v14 }
0x19bc   :  { %v2301_v47 = vadd.f32 1.0, %v4133_v38 }
0x19bd   :  { %4134 = vrcp.f32 %v2294_v60 }
0x19be   :  { %4136 = vrcp.f32 %v2301_v47 }
0x19c7   :  { %v4135_v48 = vpop.eup %4134 }
0x19c8   :  { %v4137_v46 = vpop.eup %4136  ;;  %v2328_v39 = vsub.f32 1.0, %v4135_v48  ;;  %v2334_v55 = vmul.f32 %v4135_v48, %v5323_v59 }
0x19c9   :  { %v2342_v20 = vmul.f32 %v4137_v46, %v5330_v1 }
0x1a20   :  { %v2307_v17 = vpop.permute.xlu1 %2306 }
0x1a21   :  { %v2309_v44 = vmul.f32 %v4135_v48, %v2307_v17  ;;  %v2319_v22 = vpop.permute.xlu0 %2318 }
0x1a22   :  { %v2321_v54 = vmul.f32 %v4137_v46, %v2319_v22 }
0x1a23   :  { %2311 = vrot.lane.b32.xlu1 %v2309_v44, %s4388_s27 }
0x1a24   :  { %2323 = vrot.lane.b32.xlu0 %v2321_v54, %s4388_s27  ;;  %v1998_v54 = vadd.f32 %v5266_v53, %v5276_v12 }
0x1a27   :  { %2349 = vperm.xlu1 %4021, %v5357_v52  }
0x1a2b   :  { %2357 = vperm.xlu1 %4021, %v5363_v56  }
0x1a95   :  { %v2312_v43 = vpop.permute.xlu1 %2311 }
0x1a96   :  { %v2314_v13 = vadd.f32 %v2312_v43, %v1996_v41  ;;  %v2324_v18 = vpop.permute.xlu0 %2323  ;;  %v2005_v43 = vadd.f32 %v5311_v4, %v5290_v63  ;;  %v5411_v63 = vld [vmem:[%s5785_s1 + $0x10] sm:$0xff] }
0x1a97   :  { %v2326_v25 = vadd.f32 %v2324_v18, %v2007_v9  ;;  %v2336_v9 = vsub.f32 1.0, %v4137_v46 }
0x1a98   :  { %4138 = vtanh.f32 %v2314_v13 }
0x1a99   :  { %4140 = vtanh.f32 %v2326_v25 }
0x1aa2   :  { %v4139_v36 = vpop.eup %4138 }
0x1aa3   :  { %2330 = vrot.lane.b32.xlu0 %v4139_v36, %s4391_s25  ;;  %v4141_v49 = vpop.eup %4140 }
0x1aa6   :  { %v5370_v10 = vpop.permute.xlu1 %2349 }
0x1aa7   :  { %2338 = vrot.lane.b32.xlu0 %v4141_v49, %s4391_s25 }
0x1aaa   :  { %v5380_v14 = vpop.permute.xlu1 %2357 }
0x1b15   :  { %v2331_v28 = vpop.permute.xlu0 %2330 }
0x1b16   :  { %v2333_v42 = vmul.f32 %v2331_v28, %v2328_v39 }
0x1b18   :  { %v2335_v27 = vadd.f32 %v2334_v55, %v2333_v42 }
0x1b19   :  { %v2339_v41 = vpop.permute.xlu0 %2338 }
0x1b1a   :  { %v2346_v7 = vsub.f32 %v2335_v27, %v5323_v59  ;;  %v2341_v21 = vmul.f32 %v2339_v41, %v2336_v9  ;;  %v5417_v9 = vld [vmem:[%s5785_s1 + $0x28] sm:$0xff] }
0x1b1c   :  { %v2352_v45 = vmul.f32 %v5370_v10, %v2346_v7  ;;  %v2343_v5 = vadd.f32 %v2342_v20, %v2341_v21 }
0x1b1e   :  { %v5374_v2 = vadd.f32 %v2352_v45, %v5323_v59  ;;  %v2354_v26 = vsub.f32 %v2343_v5, %v5330_v1 }
0x1b20   :  { %2377 = vrot.lane.b32.xlu1 %v5374_v2, %s4391_s25  ;;  %v2360_v38 = vmul.f32 %v5380_v14, %v2354_v26 }
0x1b22   :  { %v5384_v60 = vadd.f32 %v2360_v38, %v5330_v1 }
0x1b92   :  { %v2378_v47 = vpop.permute.xlu1 %2377 }
0x1b93   :  { %v2380_v48 = vsel %vm135_vm0, %v2378_v47, %v5384_v60 }
0x1b94   :  { %3635 = vmatmul.mubr.msk.f32.vlgmr.msra.gmra.mrb[14].mxu1 %vm314_vm1, %v2380_v48 }
0x1b95   :  { %3913 = vmatpush1.bf16.msra.mxu1 %v5075_v11  ;;  %2778 = vmatprep.mubr.f32.mxu1 %v4387_v0 }
0x1b96   :  { %3915 = vmatprep.subr.bf16.mxu1 %v5077_v51 }
0x1b99   :  { %3917 = vmatpush1.bf16.msra.mxu1 %v5081_v29 }
0x1b9a   :  { %3919 = vmatprep.subr.bf16.mxu1 %v5085_v34 }
0x1b9d   :  { %3921 = vmatpush1.bf16.msra.mxu1 %v5094_v8 }
0x1b9e   :  { %3923 = vmatprep.subr.bf16.mxu1 %v5098_v3 }
0x1ba1   :  { %3925 = vmatpush1.bf16.msra.mxu1 %v5101_v23 }
0x1ba2   :  { %3943 = vmatprep.subr.bf16.mxu1 %v5073_v40 }
0x1c67   :  { %v2450_v17 = vpop.f32.mrb[14].mxu1 }
0x1c68   :  { %v2469_v46 = vadd.f32 %v2450_v17, %v5227_v6  ;;  %v2452_v44 = vpop.f32.mrb[15].mxu1  ;;  %v2455_v13 = vadd.f32 %v2450_v17, %v1998_v54 }
0x1c69   :  { %v2481_v22 = vadd.f32 %v2452_v44, %v5257_v30  ;;  %v2462_v18 = vadd.f32 %v2452_v44, %v2005_v43 }
0x1c6a   :  { %2471 = vrot.lane.b32.xlu0 %v2469_v46, %s4388_s27  ;;  %v3636_v25 = vmul.f32 -1.442695, %v2455_v13 }
0x1c6b   :  { %2483 = vrot.lane.b32.xlu1 %v2481_v22, %s4388_s27  ;;  %v3637_v36 = vmul.f32 -1.442695, %v2462_v18 }
0x1c6c   :  { %4142 = vpow2.f32 %v3636_v25 }
0x1c6d   :  { %4144 = vpow2.f32 %v3637_v36 }
0x1c76   :  { %v4143_v49 = vpop.eup %4142 }
0x1c77   :  { %v4145_v39 = vpop.eup %4144  ;;  %v2459_v28 = vadd.f32 1.0, %v4143_v49 }
0x1c78   :  { %v2466_v55 = vadd.f32 1.0, %v4145_v39 }
0x1c79   :  { %4146 = vrcp.f32 %v2459_v28 }
0x1c7a   :  { %4148 = vrcp.f32 %v2466_v55 }
0x1c83   :  { %v4147_v42 = vpop.eup %4146 }
0x1c84   :  { %v4149_v7 = vpop.eup %4148  ;;  %v2493_v48 = vsub.f32 1.0, %v4147_v42  ;;  %v2499_v46 = vmul.f32 %v4147_v42, %v5374_v2 }
0x1c85   :  { %v2501_v36 = vsub.f32 1.0, %v4149_v7  ;;  %v2507_v39 = vmul.f32 %v4149_v7, %v5384_v60 }
0x1cdc   :  { %v2472_v27 = vpop.permute.xlu0 %2471 }
0x1cdd   :  { %v2474_v45 = vmul.f32 %v4147_v42, %v2472_v27  ;;  %v2484_v12 = vpop.permute.xlu1 %2483 }
0x1cde   :  { %v2486_v41 = vmul.f32 %v4149_v7, %v2484_v12 }
0x1cdf   :  { %2476 = vrot.lane.b32.xlu0 %v2474_v45, %s4388_s27 }
0x1ce0   :  { %2488 = vrot.lane.b32.xlu1 %v2486_v41, %s4388_s27 }
0x1ce3   :  { %2514 = vperm.xlu0 %4020, %v5411_v63  }
0x1ce7   :  { %2522 = vperm.xlu0 %4020, %v5417_v9  }
0x1d51   :  { %v2477_v21 = vpop.permute.xlu0 %2476 }
0x1d52   :  { %v2479_v20 = vadd.f32 %v2477_v21, %v1998_v54  ;;  %v2489_v5 = vpop.permute.xlu1 %2488 }
0x1d53   :  { %v2491_v26 = vadd.f32 %v2489_v5, %v2005_v43 }
0x1d54   :  { %4150 = vtanh.f32 %v2479_v20 }
0x1d55   :  { %4152 = vtanh.f32 %v2491_v26  ;;  %v2000_v26 = vadd.f32 %v5266_v53, %v5280_v24 }
0x1d5e   :  { %v4151_v38 = vpop.eup %4150 }
0x1d5f   :  { %2495 = vrot.lane.b32.xlu1 %v4151_v38, %s4391_s25  ;;  %v4153_v47 = vpop.eup %4152  ;;  %v2003_v38 = vadd.f32 %v5311_v4, %v5286_v62  ;;  %v5465_v62 = vld [vmem:[%s5785_s1 + $0x18] sm:$0xff] }
0x1d62   :  { %v5424_v18 = vpop.permute.xlu0 %2514 }
0x1d63   :  { %2503 = vrot.lane.b32.xlu1 %v4153_v47, %s4391_s25 }
0x1d66   :  { %v5434_v42 = vpop.permute.xlu0 %2522 }
0x1dd1   :  { %v2496_v17 = vpop.permute.xlu1 %2495 }
0x1dd2   :  { %v2498_v44 = vmul.f32 %v2496_v17, %v2493_v48 }
0x1dd4   :  { %v2500_v22 = vadd.f32 %v2499_v46, %v2498_v44 }
0x1dd5   :  { %v2504_v25 = vpop.permute.xlu1 %2503 }
0x1dd6   :  { %v2511_v13 = vsub.f32 %v2500_v22, %v5374_v2  ;;  %v2506_v49 = vmul.f32 %v2504_v25, %v2501_v36 }
0x1dd8   :  { %v2517_v54 = vmul.f32 %v5424_v18, %v2511_v13  ;;  %v2508_v28 = vadd.f32 %v2507_v39, %v2506_v49 }
0x1dda   :  { %v5428_v43 = vadd.f32 %v2517_v54, %v5374_v2  ;;  %v2519_v55 = vsub.f32 %v2508_v28, %v5384_v60  ;;  %v5471_v28 = vld [vmem:[%s5785_s1 + $0x20] sm:$0xff] }
0x1ddc   :  { %2542 = vrot.lane.b32.xlu0 %v5428_v43, %s4391_s25  ;;  %v2525_v27 = vmul.f32 %v5434_v42, %v2519_v55 }
0x1dde   :  { %v5438_v45 = vadd.f32 %v2525_v27, %v5384_v60 }
0x1e4e   :  { %v2543_v12 = vpop.permute.xlu0 %2542 }
0x1e4f   :  { %v2545_v41 = vsel %vm135_vm0, %v2543_v12, %v5438_v45 }
0x1e50   :  { %3640 = vmatmul.mubr.msk.f32.vlgmr.msra.gmra.mrb[38].mxu0 %vm314_vm1, %v2545_v41 }
0x1e51   :  { %3929 = vmatpush1.bf16.msra.mxu0 %v5075_v11  ;;  %2943 = vmatprep.mubr.f32.mxu0 %v4387_v0 }
0x1e52   :  { %3931 = vmatprep.subr.bf16.mxu0 %v5077_v51 }
0x1e55   :  { %3933 = vmatpush1.bf16.msra.mxu0 %v5081_v29 }
0x1e56   :  { %3935 = vmatprep.subr.bf16.mxu0 %v5085_v34 }
0x1e59   :  { %3937 = vmatpush1.bf16.msra.mxu0 %v5094_v8 }
0x1e5a   :  { %3939 = vmatprep.subr.bf16.mxu0 %v5098_v3 }
0x1e5d   :  { %3941 = vmatpush1.bf16.msra.mxu0 %v5101_v23 }
0x1e5e   :  { %3959 = vmatprep.subr.bf16.mxu0 %v5073_v40 }
0x1f23   :  { %v2615_v7 = vpop.f32.mrb[38].mxu0 }
0x1f24   :  { %v2634_v21 = vadd.f32 %v2615_v7, %v5227_v6  ;;  %v2617_v20 = vpop.f32.mrb[39].mxu0  ;;  %v2620_v47 = vadd.f32 %v2615_v7, %v2000_v26 }
0x1f25   :  { %v2646_v5 = vadd.f32 %v2617_v20, %v5257_v30  ;;  %v2627_v48 = vadd.f32 %v2617_v20, %v2003_v38 }
0x1f26   :  { %2636 = vrot.lane.b32.xlu1 %v2634_v21, %s4388_s27  ;;  %v3641_v17 = vmul.f32 -1.442695, %v2620_v47 }
0x1f27   :  { %2648 = vrot.lane.b32.xlu0 %v2646_v5, %s4388_s27  ;;  %v3642_v40 = vmul.f32 -1.442695, %v2627_v48 }
0x1f28   :  { %4154 = vpow2.f32 %v3641_v17 }
0x1f29   :  { %4156 = vpow2.f32 %v3642_v40 }
0x1f32   :  { %v4155_v46 = vpop.eup %4154 }
0x1f33   :  { %v4157_v44 = vpop.eup %4156  ;;  %v2624_v22 = vadd.f32 1.0, %v4155_v46 }
0x1f34   :  { %v2631_v13 = vadd.f32 1.0, %v4157_v44 }
0x1f35   :  { %4158 = vrcp.f32 %v2624_v22 }
0x1f36   :  { %4160 = vrcp.f32 %v2631_v13 }
0x1f3f   :  { %v4159_v54 = vpop.eup %4158 }
0x1f40   :  { %v4161_v36 = vpop.eup %4160  ;;  %v2658_v20 = vsub.f32 1.0, %v4159_v54  ;;  %v2664_v47 = vmul.f32 %v4159_v54, %v5428_v43 }
0x1f41   :  { %v2666_v22 = vsub.f32 1.0, %v4161_v36 }
0x1f98   :  { %v2637_v25 = vpop.permute.xlu1 %2636 }
0x1f99   :  { %v2639_v49 = vmul.f32 %v4159_v54, %v2637_v25  ;;  %v2649_v24 = vpop.permute.xlu0 %2648  ;;  %v2672_v25 = vmul.f32 %v4161_v36, %v5438_v45 }
0x1f9a   :  { %v2651_v39 = vmul.f32 %v4161_v36, %v2649_v24 }
0x1f9b   :  { %2641 = vrot.lane.b32.xlu1 %v2639_v49, %s4388_s27 }
0x1f9c   :  { %2653 = vrot.lane.b32.xlu0 %v2651_v39, %s4388_s27 }
0x1f9f   :  { %2679 = vperm.xlu1 %4021, %v5465_v62  }
0x1fa3   :  { %2687 = vperm.xlu1 %4021, %v5471_v28  }
0x200d   :  { %v2642_v55 = vpop.permute.xlu1 %2641 }
0x200e   :  { %v2644_v27 = vadd.f32 %v2642_v55, %v2000_v26  ;;  %v2654_v12 = vpop.permute.xlu0 %2653 }
0x200f   :  { %v2656_v41 = vadd.f32 %v2654_v12, %v2003_v38 }
0x2010   :  { %4162 = vtanh.f32 %v2644_v27 }
0x2011   :  { %4164 = vtanh.f32 %v2656_v41 }
0x201a   :  { %v4163_v7 = vpop.eup %4162 }
0x201b   :  { %2660 = vrot.lane.b32.xlu0 %v4163_v7, %s4391_s25  ;;  %v4165_v21 = vpop.eup %4164 }
0x201e   :  { %v5478_v46 = vpop.permute.xlu1 %2679 }
0x201f   :  { %2668 = vrot.lane.b32.xlu0 %v4165_v21, %s4391_s25 }
0x2022   :  { %v5488_v24 = vpop.permute.xlu1 %2687 }
0x208d   :  { %v2661_v5 = vpop.permute.xlu0 %2660 }
0x208e   :  { %v2663_v48 = vmul.f32 %v2661_v5, %v2658_v20  ;;  %v2002_v20 = vadd.f32 %v5266_v53, %v5284_v58  ;;  %v2001_v5 = vadd.f32 %v5311_v4, %v5282_v50 }
0x2090   :  { %v2665_v17 = vadd.f32 %v2664_v47, %v2663_v48 }
0x2091   :  { %v2669_v44 = vpop.permute.xlu0 %2668 }
0x2092   :  { %v2676_v40 = vsub.f32 %v2665_v17, %v5428_v43  ;;  %v2671_v13 = vmul.f32 %v2669_v44, %v2666_v22 }
0x2094   :  { %v2682_v26 = vmul.f32 %v5478_v46, %v2676_v40  ;;  %v2673_v54 = vadd.f32 %v2672_v25, %v2671_v13 }
0x2096   :  { %v5482_v38 = vadd.f32 %v2682_v26, %v5428_v43  ;;  %v2684_v49 = vsub.f32 %v2673_v54, %v5438_v45 }
0x2098   :  { %2707 = vrot.lane.b32.xlu1 %v5482_v38, %s4391_s25  ;;  %v2690_v39 = vmul.f32 %v5488_v24, %v2684_v49 }
0x209a   :  { %v5492_v55 = vadd.f32 %v2690_v39, %v5438_v45 }
0x210a   :  { %v2708_v27 = vpop.permute.xlu1 %2707 }
0x210b   :  { %v2710_v12 = vsel %vm135_vm0, %v2708_v27, %v5492_v55 }
0x210c   :  { %3645 = vmatmul.mubr.msk.f32.vlgmr.msra.gmra.mrb[16].mxu1 %vm314_vm1, %v2710_v12 }
0x210d   :  { %3945 = vmatpush1.bf16.msra.mxu1 %v5075_v11  ;;  %3108 = vmatprep.mubr.f32.mxu1 %v4387_v0 }
0x210e   :  { %3947 = vmatprep.subr.bf16.mxu1 %v5077_v51 }
0x2111   :  { %3949 = vmatpush1.bf16.msra.mxu1 %v5081_v29 }
0x2112   :  { %3951 = vmatprep.subr.bf16.mxu1 %v5085_v34 }
0x2115   :  { %3953 = vmatpush1.bf16.msra.mxu1 %v5094_v8 }
0x2116   :  { %3955 = vmatprep.subr.bf16.mxu1 %v5098_v3 }
0x2119   :  { %3957 = vmatpush1.bf16.msra.mxu1 %v5101_v23 }
0x21df   :  { %v2780_v36 = vpop.f32.mrb[16].mxu1 }
0x21e0   :  { %v2799_v41 = vadd.f32 %v2780_v36, %v5227_v6  ;;  %v2782_v7 = vpop.f32.mrb[17].mxu1  ;;  %v2785_v47 = vadd.f32 %v2780_v36, %v2002_v20 }
0x21e1   :  { %v2811_v21 = vadd.f32 %v2782_v7, %v5257_v30  ;;  %v2792_v48 = vadd.f32 %v2782_v7, %v2001_v5 }
0x21e2   :  { %2801 = vrot.lane.b32.xlu0 %v2799_v41, %s4388_s27  ;;  %v3646_v17 = vmul.f32 -1.442695, %v2785_v47 }
0x21e3   :  { %2813 = vrot.lane.b32.xlu1 %v2811_v21, %s4388_s27  ;;  %v3647_v40 = vmul.f32 -1.442695, %v2792_v48 }
0x21e4   :  { %4166 = vpow2.f32 %v3646_v17 }
0x21e5   :  { %4168 = vpow2.f32 %v3647_v40 }
0x21ee   :  { %v4167_v26 = vpop.eup %4166 }
0x21ef   :  { %v4169_v44 = vpop.eup %4168  ;;  %v2789_v22 = vadd.f32 1.0, %v4167_v26 }
0x21f0   :  { %v2796_v13 = vadd.f32 1.0, %v4169_v44 }
0x21f1   :  { %4170 = vrcp.f32 %v2789_v22 }
0x21f2   :  { %4172 = vrcp.f32 %v2796_v13 }
0x21fb   :  { %v4171_v25 = vpop.eup %4170 }
0x21fc   :  { %v4173_v49 = vpop.eup %4172  ;;  %v2823_v47 = vsub.f32 1.0, %v4171_v25  ;;  %v2829_v17 = vmul.f32 %v4171_v25, %v5482_v38 }
0x21fd   :  { %v2831_v22 = vsub.f32 1.0, %v4173_v49 }
0x2254   :  { %v2802_v54 = vpop.permute.xlu0 %2801 }
0x2255   :  { %v2804_v39 = vmul.f32 %v4171_v25, %v2802_v54  ;;  %v2814_v58 = vpop.permute.xlu1 %2813  ;;  %v2837_v54 = vmul.f32 %v4173_v49, %v5492_v55 }
0x2256   :  { %v2816_v27 = vmul.f32 %v4173_v49, %v2814_v58 }
0x2257   :  { %2806 = vrot.lane.b32.xlu0 %v2804_v39, %s4388_s27 }
0x2258   :  { %2818 = vrot.lane.b32.xlu1 %v2816_v27, %s4388_s27 }
0x225b   :  { %2844 = vperm.xlu0 %4020, %v5471_v28  }
0x225f   :  { %2852 = vperm.xlu0 %4020, %v5465_v62  }
0x22c9   :  { %v2807_v50 = vpop.permute.xlu0 %2806 }
0x22ca   :  { %v2809_v12 = vadd.f32 %v2807_v50, %v2002_v20  ;;  %v2819_v36 = vpop.permute.xlu1 %2818 }
0x22cb   :  { %v2821_v41 = vadd.f32 %v2819_v36, %v2001_v5 }
0x22cc   :  { %4174 = vtanh.f32 %v2809_v12 }
0x22cd   :  { %4176 = vtanh.f32 %v2821_v41 }
0x22d6   :  { %v4175_v7 = vpop.eup %4174 }
0x22d7   :  { %2825 = vrot.lane.b32.xlu1 %v4175_v7, %s4391_s25  ;;  %v4177_v21 = vpop.eup %4176 }
0x22da   :  { %v5521_v26 = vpop.permute.xlu0 %2844 }
0x22db   :  { %2833 = vrot.lane.b32.xlu1 %v4177_v21, %s4391_s25 }
0x22de   :  { %v5531_v58 = vpop.permute.xlu0 %2852 }
0x2349   :  { %v2826_v48 = vpop.permute.xlu1 %2825 }
0x234a   :  { %v2828_v40 = vmul.f32 %v2826_v48, %v2823_v47 }
0x234c   :  { %v2830_v28 = vadd.f32 %v2829_v17, %v2828_v40 }
0x234d   :  { %v2834_v44 = vpop.permute.xlu1 %2833 }
0x234e   :  { %v2841_v62 = vsub.f32 %v2830_v28, %v5482_v38  ;;  %v2836_v13 = vmul.f32 %v2834_v44, %v2831_v22 }
0x2350   :  { %v2847_v20 = vmul.f32 %v5521_v26, %v2841_v62  ;;  %v2838_v25 = vadd.f32 %v2837_v54, %v2836_v13 }
0x2352   :  { %v5525_v5 = vadd.f32 %v2847_v20, %v5482_v38  ;;  %v2849_v39 = vsub.f32 %v2838_v25, %v5492_v55 }
0x2354   :  { %2872 = vrot.lane.b32.xlu0 %v5525_v5, %s4391_s25  ;;  %v2855_v27 = vmul.f32 %v5531_v58, %v2849_v39 }
0x2356   :  { %v5535_v50 = vadd.f32 %v2855_v27, %v5492_v55 }
0x23c6   :  { %v2873_v12 = vpop.permute.xlu0 %2872 }
0x23c7   :  { %v2875_v36 = vsel %vm135_vm0, %v2873_v12, %v5535_v50 }
0x23c8   :  { %3650 = vmatmul.mubr.msk.f32.vlgmr.msra.gmra.mrb[40].mxu0 %vm314_vm1, %v2875_v36 }
0x23c9   :  { %3961 = vmatpush1.bf16.msra.mxu0 %v5075_v11  ;;  %3273 = vmatprep.mubr.f32.mxu0 %v4387_v0 }
0x23ca   :  { %3963 = vmatprep.subr.bf16.mxu0 %v5077_v51  ;;  %v2004_v51 = vadd.f32 %v5266_v53, %v5288_v57 }
0x23cd   :  { %3965 = vmatpush1.bf16.msra.mxu0 %v5081_v29  ;;  %v1999_v29 = vadd.f32 %v5311_v4, %v5278_v61 }
0x23ce   :  { %3967 = vmatprep.subr.bf16.mxu0 %v5085_v34 }
0x23d1   :  { %3969 = vmatpush1.bf16.msra.mxu0 %v5094_v8 }
0x23d2   :  { %3971 = vmatprep.subr.bf16.mxu0 %v5098_v3 }
0x23d5   :  { %3973 = vmatpush1.bf16.msra.mxu0 %v5101_v23 }
0x249b   :  { %v2945_v49 = vpop.f32.mrb[40].mxu0 }
0x249c   :  { %v2964_v41 = vadd.f32 %v2945_v49, %v5227_v6  ;;  %v2947_v7 = vpop.f32.mrb[41].mxu0  ;;  %v2950_v34 = vadd.f32 %v2945_v49, %v2004_v51 }
0x249d   :  { %v2976_v11 = vadd.f32 %v2947_v7, %v5257_v30  ;;  %v2957_v8 = vadd.f32 %v2947_v7, %v1999_v29 }
0x249e   :  { %2966 = vrot.lane.b32.xlu1 %v2964_v41, %s4388_s27  ;;  %v3651_v3 = vmul.f32 -1.442695, %v2950_v34 }
0x249f   :  { %2978 = vrot.lane.b32.xlu0 %v2976_v11, %s4388_s27  ;;  %v3652_v23 = vmul.f32 -1.442695, %v2957_v8 }
0x24a0   :  { %4178 = vpow2.f32 %v3651_v3 }
0x24a1   :  { %4180 = vpow2.f32 %v3652_v23 }
0x24aa   :  { %v4179_v21 = vpop.eup %4178 }
0x24ab   :  { %v4181_v47 = vpop.eup %4180  ;;  %v2954_v48 = vadd.f32 1.0, %v4179_v21 }
0x24ac   :  { %v2961_v17 = vadd.f32 1.0, %v4181_v47 }
0x24ad   :  { %4182 = vrcp.f32 %v2954_v48 }
0x24ae   :  { %4184 = vrcp.f32 %v2961_v17 }
0x24b7   :  { %v4183_v40 = vpop.eup %4182 }
0x24b8   :  { %v4185_v62 = vpop.eup %4184  ;;  %v2988_v27 = vsub.f32 1.0, %v4183_v40  ;;  %v2994_v36 = vmul.f32 %v4183_v40, %v5525_v5 }
0x24b9   :  { %v3002_v8 = vmul.f32 %v4185_v62, %v5535_v50 }
0x2510   :  { %v2967_v28 = vpop.permute.xlu1 %2966 }
0x2511   :  { %v2969_v20 = vmul.f32 %v4183_v40, %v2967_v28  ;;  %v2979_v57 = vpop.permute.xlu0 %2978 }
0x2512   :  { %v2981_v44 = vmul.f32 %v4185_v62, %v2979_v57 }
0x2513   :  { %2971 = vrot.lane.b32.xlu1 %v2969_v20, %s4388_s27 }
0x2514   :  { %2983 = vrot.lane.b32.xlu0 %v2981_v44, %s4388_s27  ;;  %v2006_v44 = vadd.f32 %v5266_v53, %v5292_v32 }
0x2517   :  { %3009 = vperm.xlu1 %4021, %v5417_v9  }
0x251b   :  { %3017 = vperm.xlu1 %4021, %v5411_v63  }
0x2585   :  { %v2972_v61 = vpop.permute.xlu1 %2971 }
0x2586   :  { %v2974_v22 = vadd.f32 %v2972_v61, %v2004_v51  ;;  %v2984_v13 = vpop.permute.xlu0 %2983  ;;  %v1997_v61 = vadd.f32 %v5311_v4, %v5274_v15 }
0x2587   :  { %v2986_v54 = vadd.f32 %v2984_v13, %v1999_v29  ;;  %v2996_v29 = vsub.f32 1.0, %v4185_v62 }
0x2588   :  { %4186 = vtanh.f32 %v2974_v22 }
0x2589   :  { %4188 = vtanh.f32 %v2986_v54 }
0x2592   :  { %v4187_v25 = vpop.eup %4186 }
0x2593   :  { %2990 = vrot.lane.b32.xlu0 %v4187_v25, %s4391_s25  ;;  %v4189_v39 = vpop.eup %4188 }
0x2596   :  { %v5564_v41 = vpop.permute.xlu1 %3009 }
0x2597   :  { %2998 = vrot.lane.b32.xlu0 %v4189_v39, %s4391_s25 }
0x259a   :  { %v5574_v21 = vpop.permute.xlu1 %3017 }
0x2605   :  { %v2991_v12 = vpop.permute.xlu0 %2990 }
0x2606   :  { %v2993_v49 = vmul.f32 %v2991_v12, %v2988_v27 }
0x2608   :  { %v2995_v9 = vadd.f32 %v2994_v36, %v2993_v49 }
0x2609   :  { %v2999_v51 = vpop.permute.xlu0 %2998 }
0x260a   :  { %v3006_v63 = vsub.f32 %v2995_v9, %v5525_v5  ;;  %v3001_v34 = vmul.f32 %v2999_v51, %v2996_v29 }
0x260c   :  { %v3012_v7 = vmul.f32 %v5564_v41, %v3006_v63  ;;  %v3003_v3 = vadd.f32 %v3002_v8, %v3001_v34 }
0x260e   :  { %v5568_v11 = vadd.f32 %v3012_v7, %v5525_v5  ;;  %v3014_v23 = vsub.f32 %v3003_v3, %v5535_v50 }
0x2610   :  { %3037 = vrot.lane.b32.xlu1 %v5568_v11, %s4391_s25  ;;  %v3020_v47 = vmul.f32 %v5574_v21, %v3014_v23 }
0x2612   :  { %v5578_v48 = vadd.f32 %v3020_v47, %v5535_v50 }
0x2682   :  { %v3038_v17 = vpop.permute.xlu1 %3037 }
0x2683   :  { %v3040_v40 = vsel %vm135_vm0, %v3038_v17, %v5578_v48 }
0x2684   :  { %3655 = vmatmul.mubr.msk.f32.vlgmr.msra.gmra.mrb[18].mxu1 %vm314_vm1, %v3040_v40 }
0x2685   :  { %3691 = vmatprep.mubr.msk.f32.mxu1 %vm4393_vm2, %v4387_v0 }
0x2757   :  { %v3110_v28 = vpop.f32.mrb[18].mxu1 }
0x2758   :  { %v3129_v20 = vadd.f32 %v3110_v28, %v5227_v6  ;;  %v3112_v62 = vpop.f32.mrb[19].mxu1  ;;  %v3115_v22 = vadd.f32 %v3110_v28, %v2006_v44 }
0x2759   :  { %v3141_v57 = vadd.f32 %v3112_v62, %v5257_v30  ;;  %v3122_v13 = vadd.f32 %v3112_v62, %v1997_v61 }
0x275a   :  { %3131 = vrot.lane.b32.xlu0 %v3129_v20, %s4388_s27  ;;  %v3656_v54 = vmul.f32 -1.442695, %v3115_v22 }
0x275b   :  { %3143 = vrot.lane.b32.xlu1 %v3141_v57, %s4388_s27  ;;  %v3657_v25 = vmul.f32 -1.442695, %v3122_v13 }
0x275c   :  { %4190 = vpow2.f32 %v3656_v54 }
0x275d   :  { %4192 = vpow2.f32 %v3657_v25 }
0x2766   :  { %v4191_v39 = vpop.eup %4190 }
0x2767   :  { %v4193_v27 = vpop.eup %4192  ;;  %v3119_v12 = vadd.f32 1.0, %v4191_v39 }
0x2768   :  { %v3126_v36 = vadd.f32 1.0, %v4193_v27 }
0x2769   :  { %4194 = vrcp.f32 %v3119_v12 }
0x276a   :  { %4196 = vrcp.f32 %v3126_v36 }
0x2773   :  { %v4195_v49 = vpop.eup %4194 }
0x2774   :  { %v4197_v63 = vpop.eup %4196  ;;  %v3153_v47 = vsub.f32 1.0, %v4195_v49  ;;  %v3159_v40 = vmul.f32 %v4195_v49, %v5568_v11 }
0x2775   :  { %v3167_v13 = vmul.f32 %v4197_v63, %v5578_v48 }
0x27cc   :  { %v3132_v9 = vpop.permute.xlu0 %3131 }
0x27cd   :  { %v3134_v7 = vmul.f32 %v4195_v49, %v3132_v9  ;;  %v3144_v32 = vpop.permute.xlu1 %3143 }
0x27ce   :  { %v3146_v51 = vmul.f32 %v4197_v63, %v3144_v32 }
0x27cf   :  { %3136 = vrot.lane.b32.xlu0 %v3134_v7, %s4388_s27 }
0x27d0   :  { %3148 = vrot.lane.b32.xlu1 %v3146_v51, %s4388_s27  ;;  %v2008_v51 = vadd.f32 %v5266_v53, %v5313_v35 }
0x27d3   :  { %3174 = vperm.xlu0 %4020, %v5363_v56  }
0x27d7   :  { %3182 = vperm.xlu0 %4020, %v5357_v52  }
0x2841   :  { %v3137_v15 = vpop.permute.xlu0 %3136 }
0x2842   :  { %v3139_v29 = vadd.f32 %v3137_v15, %v2006_v44  ;;  %v3149_v34 = vpop.permute.xlu1 %3148  ;;  %v1995_v15 = vadd.f32 %v5311_v4, %v5269_v19 }
0x2843   :  { %v3151_v8 = vadd.f32 %v3149_v34, %v1997_v61  ;;  %v3161_v61 = vsub.f32 1.0, %v4197_v63 }
0x2844   :  { %4198 = vtanh.f32 %v3139_v29 }
0x2845   :  { %4200 = vtanh.f32 %v3151_v8 }
0x284e   :  { %v4199_v3 = vpop.eup %4198 }
0x284f   :  { %3155 = vrot.lane.b32.xlu1 %v4199_v3, %s4391_s25  ;;  %v4201_v23 = vpop.eup %4200 }
0x2852   :  { %v5599_v20 = vpop.permute.xlu0 %3174 }
0x2853   :  { %3163 = vrot.lane.b32.xlu1 %v4201_v23, %s4391_s25 }
0x2856   :  { %v3183_v39 = vpop.permute.xlu0 %3182 }
0x28c1   :  { %v3156_v17 = vpop.permute.xlu1 %3155 }
0x28c2   :  { %v3158_v28 = vmul.f32 %v3156_v17, %v3153_v47 }
0x28c4   :  { %v3160_v56 = vadd.f32 %v3159_v40, %v3158_v28 }
0x28c5   :  { %v3164_v44 = vpop.permute.xlu1 %3163 }
0x28c6   :  { %v3171_v52 = vsub.f32 %v3160_v56, %v5568_v11  ;;  %v3166_v22 = vmul.f32 %v3164_v44, %v3161_v61 }
0x28c8   :  { %v3177_v62 = vmul.f32 %v5599_v20, %v3171_v52  ;;  %v3168_v54 = vadd.f32 %v3167_v13, %v3166_v22  ;;  %v2203_v22 = vmul.f32 %v5330_v1, %v5327_v16  ;;  %v2527_v16 = vmul.f32 %v5428_v43, %v5424_v18  ;;  %v3436_v18 = vld [vmem:[%s5794_s10 + $0x10] sm:$0xff] }
0x28c9   :  { %v2857_v1 = vmul.f32 %v5525_v5, %v5521_v26  ;;  %v4392_v43 = vmov 0.0|0.0   ;;  %v3437_v26 = vld [vmem:[%s5794_s10 + $0x18] sm:$0xff] }
0x28ca   :  { %v5603_v57 = vadd.f32 %v3177_v62, %v5568_v11  ;;  %v3179_v25 = vsub.f32 %v3168_v54, %v5578_v48  ;;  %v2197_v54 = vmul.f32 %v5323_v59, %v5320_v33  ;;  %v3434_v33 = vld [vmem:[%s5794_s10] sm:$0xff]  ;;  %v3435_v59 = vld [vmem:[%s5794_s10 + $0x8] sm:$0xff]  ;;  %3974 = vmatprep.subr.bf16.mxu1 %v4392_v43  ;;  %v3978_v5 = vpack.c.bf16 %v3437_v26, %v3436_v18 }
0x28cc   :  { %3202 = vrot.lane.b32.xlu0 %v5603_v57, %s4391_s25  ;;  %v3185_v27 = vmul.f32 %v3183_v39, %v3179_v25  ;;  %v3440_v25 = vld [vmem:[%s5794_s10 + $0x30] sm:$0xff] }
0x28ce   :  { %v5610_v12 = vadd.f32 %v3185_v27, %v5578_v48 }
0x28d0   :  { %v3193_v13 = vmul.f32 %v5610_v12, %v3183_v39  ;;  %v3441_v39 = vld [vmem:[%s5794_s10 + $0x38] sm:$0xff] }
0x28d1   :  { %v3984_v27 = vpack.c.bf16 %v3441_v39, %v3440_v25 }
0x293e   :  { %v3203_v36 = vpop.permute.xlu0 %3202 }
0x293f   :  { %v3205_v49 = vsel %vm135_vm0, %v3203_v36, %v5610_v12 }
0x2940   :  { %3660 = vmatmul.mubr.msk.f32.vlgmr.msra.gmra.mrb[42].mxu0 %vm314_vm1, %v3205_v49 }
0x2a13   :  { %v3275_v9 = vpop.f32.mrb[42].mxu0 }
0x2a14   :  { %v3294_v7 = vadd.f32 %v3275_v9, %v5227_v6  ;;  %v3277_v32 = vpop.f32.mrb[43].mxu0  ;;  %v3280_v29 = vadd.f32 %v3275_v9, %v2008_v51 }
0x2a15   :  { %v3306_v63 = vadd.f32 %v3277_v32, %v5257_v30  ;;  %v3287_v34 = vadd.f32 %v3277_v32, %v1995_v15 }
0x2a16   :  { %3296 = vrot.lane.b32.xlu1 %v3294_v7, %s4388_s27  ;;  %v3661_v8 = vmul.f32 -1.442695, %v3280_v29 }
0x2a17   :  { %3308 = vrot.lane.b32.xlu0 %v3306_v63, %s4388_s27  ;;  %v3662_v3 = vmul.f32 -1.442695, %v3287_v34 }
0x2a18   :  { %4202 = vpow2.f32 %v3661_v8 }
0x2a19   :  { %4204 = vpow2.f32 %v3662_v3 }
0x2a22   :  { %v4203_v6 = vpop.eup %4202 }
0x2a23   :  { %v4205_v23 = vpop.eup %4204  ;;  %v3284_v47 = vadd.f32 1.0, %v4203_v6 }
0x2a24   :  { %v3291_v30 = vadd.f32 1.0, %v4205_v23 }
0x2a25   :  { %4206 = vrcp.f32 %v3284_v47 }
0x2a26   :  { %4208 = vrcp.f32 %v3291_v30 }
0x2a2f   :  { %v5623_v17 = vpop.eup %4206 }
0x2a30   :  { %v5625_v28 = vpop.eup %4208  ;;  %v3318_v36 = vsub.f32 1.0, %v5623_v17  ;;  %v3324_v9 = vmul.f32 %v5623_v17, %v5603_v57 }
0x2a31   :  { %v3326_v63 = vsub.f32 1.0, %v5625_v28  ;;  %v3332_v3 = vmul.f32 %v5625_v28, %v5610_v12 }
0x2a88   :  { %v3297_v40 = vpop.permute.xlu1 %3296 }
0x2a89   :  { %v3299_v53 = vmul.f32 %v5623_v17, %v3297_v40  ;;  %v3309_v19 = vpop.permute.xlu0 %3308  ;;  %v2368_v17 = vmul.f32 %v5384_v60, %v5380_v14  ;;  %v3028_v14 = vmul.f32 %v5578_v48, %v5574_v21  ;;  %v2692_v21 = vmul.f32 %v5482_v38, %v5478_v46 }
0x2a8a   :  { %v3311_v4 = vmul.f32 %v5625_v28, %v3309_v19 }
0x2a8b   :  { %3301 = vrot.lane.b32.xlu1 %v3299_v53, %s4388_s27 }
0x2a8c   :  { %3313 = vrot.lane.b32.xlu0 %v3311_v4, %s4388_s27 }
0x2a8f   :  { %3339 = vperm.xlu1 %4021, %v5306_v31   ;;  %v2863_v31 = vmul.f32 %v5535_v50, %v5531_v58  ;;  %v3438_v58 = vld [vmem:[%s5794_s10 + $0x20] sm:$0xff]  ;;  %v3439_v50 = vld [vmem:[%s5794_s10 + $0x28] sm:$0xff]  ;;  %s4394_s10 = smov [#allocation14]  }
0x2a93   :  { %3347 = vperm.xlu1 %4021, %v5300_v37   ;;  %v2533_v37 = vmul.f32 %v5438_v45, %v5434_v42  ;;  %v3187_v42 = vmul.f32 %v5603_v57, %v5599_v20  ;;  %v3975_v45 = vpack.c.bf16 %v3435_v59, %v3434_v33  ;;  %v3981_v20 = vpack.c.bf16 %v3439_v50, %v3438_v58 }
0x2a95   :  { %3976 = vmatpush3.bf16.msra.mxu1 %v3975_v45 }
0x2a96   :  { %3977 = vmatprep.subr.bf16.mxu1 %v4392_v43 }
0x2a99   :  { %3979 = vmatpush3.bf16.msra.mxu1 %v3978_v5 }
0x2a9a   :  { %3980 = vmatprep.subr.bf16.mxu1 %v4392_v43 }
0x2a9d   :  { %3982 = vmatpush3.bf16.msra.mxu1 %v3981_v20 }
0x2a9e   :  { %3983 = vmatprep.subr.bf16.mxu1 %v4392_v43 }
0x2aa1   :  { %3985 = vmatpush3.bf16.msra.mxu1 %v3984_v27 }
0x2afd   :  { %v3302_v35 = vpop.permute.xlu1 %3301 }
0x2afe   :  { %v3304_v56 = vadd.f32 %v3302_v35, %v2008_v51  ;;  %v3314_v52 = vpop.permute.xlu0 %3313 }
0x2aff   :  { %v3316_v62 = vadd.f32 %v3314_v52, %v1995_v15 }
0x2b00   :  { %4210 = vtanh.f32 %v3304_v56 }
0x2b01   :  { %4212 = vtanh.f32 %v3316_v62 }
0x2b0a   :  { %v4211_v44 = vpop.eup %4210 }
0x2b0b   :  { %3320 = vrot.lane.b32.xlu0 %v4211_v44, %s4391_s25  ;;  %v4213_v61 = vpop.eup %4212 }
0x2b0e   :  { %v3340_v34 = vpop.permute.xlu1 %3339 }
0x2b0f   :  { %3328 = vrot.lane.b32.xlu0 %v4213_v61, %s4391_s25 }
0x2b12   :  { %v3348_v40 = vpop.permute.xlu1 %3347 }
0x2b13   :  { %2205 = vrot.lane.b32.xlu0 %v2203_v22, %s4391_s25 }
0x2b17   :  { %2535 = vrot.lane.b32.xlu0 %v2533_v37, %s4391_s25 }
0x2b1b   :  { %2865 = vrot.lane.b32.xlu0 %v2863_v31, %s4391_s25 }
0x2b1f   :  { %3195 = vrot.lane.b32.xlu0 %v3193_v13, %s4391_s25 }
0x2b23   :  { %2199 = vrot.lane.b32.xlu0 %v2197_v54, %s4391_s25 }
0x2b27   :  { %2529 = vrot.lane.b32.xlu0 %v2527_v16, %s4391_s25 }
0x2b2b   :  { %2859 = vrot.lane.b32.xlu0 %v2857_v1, %s4391_s25 }
0x2b2f   :  { %3189 = vrot.lane.b32.xlu0 %v3187_v42, %s4391_s25 }
0x2b7d   :  { %v3321_v49 = vpop.permute.xlu0 %3320 }
0x2b7e   :  { %v3323_v7 = vmul.f32 %v3321_v49, %v3318_v36 }
0x2b80   :  { %v3325_v32 = vadd.f32 %v3324_v9, %v3323_v7 }
0x2b81   :  { %v3329_v51 = vpop.permute.xlu0 %3328 }
0x2b82   :  { %v3336_v15 = vsub.f32 %v3325_v32, %v5603_v57  ;;  %v3331_v29 = vmul.f32 %v3329_v51, %v3326_v63 }
0x2b84   :  { %v3342_v8 = vmul.f32 %v3340_v34, %v3336_v15  ;;  %v3333_v23 = vadd.f32 %v3332_v3, %v3331_v29 }
0x2b85   :  { %v2206_v6 = vpop.permute.xlu0 %2205 }
0x2b86   :  { %2208 = vst.msk [vmem:[#allocation4 + $0x38] sm:$0xff] %vm135_vm0, %v2206_v6  ;;  %v3343_v0 = vadd.f32 %v3342_v8, %v5603_v57  ;;  %v3344_v30 = vsub.f32 %v3333_v23, %v5610_v12  ;;  %v2698_v57 = vmul.f32 %v5492_v55, %v5488_v24  ;;  %v2362_v24 = vmul.f32 %v5374_v2, %v5370_v10 }
0x2b87   :  { %v3022_v10 = vmul.f32 %v5568_v11, %v5564_v41 }
0x2b88   :  { %3430 = vrot.lane.b32.xlu1 %v3343_v0, %s4391_s25  ;;  %v3350_v53 = vmul.f32 %v3348_v40, %v3344_v30  ;;  %v3352_v62 = vmul.f32 %v3343_v0, %v3340_v34 }
0x2b89   :  { %v2536_v47 = vpop.permute.xlu0 %2535 }
0x2b8a   :  { %2538 = vst.msk [vmem:[#allocation4 + $0x28] sm:$0xff] %vm135_vm0, %v2536_v47  ;;  %v3351_v4 = vadd.f32 %v3350_v53, %v5610_v12 }
0x2b8c   :  { %2370 = vrot.lane.b32.xlu1 %v2368_v17, %s4391_s25  ;;  %v3358_v35 = vmul.f32 %v3351_v4, %v3348_v40 }
0x2b8d   :  { %v2866_v28 = vpop.permute.xlu0 %2865  ;;  %v3387_v11 = vld [vmem:[#allocation4 + $0x38] sm:$0xff] }
0x2b8e   :  { %2868 = vst.msk [vmem:[#allocation4 + $0x18] sm:$0xff] %vm135_vm0, %v2866_v28 }
0x2b90   :  { %2700 = vrot.lane.b32.xlu1 %v2698_v57, %s4391_s25 }
0x2b91   :  { %v3196_v19 = vpop.permute.xlu0 %3195  ;;  %v3385_v41 = vld [vmem:[#allocation4 + $0x28] sm:$0xff] }
0x2b92   :  { %3198 = vst.msk [vmem:[#allocation4 + $0x8] sm:$0xff] %vm135_vm0, %v3196_v19 }
0x2b94   :  { %3030 = vrot.lane.b32.xlu1 %v3028_v14, %s4391_s25 }
0x2b95   :  { %v2200_v60 = vpop.permute.xlu0 %2199  ;;  %v3383_v44 = vld [vmem:[#allocation4 + $0x18] sm:$0xff] }
0x2b96   :  { %2202 = vst.msk [vmem:[#allocation3] sm:$0xff] %vm135_vm0, %v2200_v60 }
0x2b98   :  { %3360 = vrot.lane.b32.xlu1 %v3358_v35, %s4391_s25 }
0x2b99   :  { %v2530_v56 = vpop.permute.xlu0 %2529  ;;  %v3381_v38 = vld [vmem:[#allocation4 + $0x8] sm:$0xff] }
0x2b9a   :  { %2532 = vst.msk [vmem:[#allocation3 + $0x10] sm:$0xff] %vm135_vm0, %v2530_v56 }
0x2b9c   :  { %2364 = vrot.lane.b32.xlu1 %v2362_v24, %s4391_s25 }
0x2b9d   :  { %v2860_v55 = vpop.permute.xlu0 %2859  ;;  %v3364_v12 = vld [vmem:[#allocation3] sm:$0xff] }
0x2b9e   :  { %2862 = vst.msk [vmem:[#allocation3 + $0x20] sm:$0xff] %vm135_vm0, %v2860_v55  ;;  %3372 = vst.msk [vmem:[#allocation14] sm:$0xff] %vm135_vm0, %v3364_v12 }
0x2ba0   :  { %2694 = vrot.lane.b32.xlu1 %v2692_v21, %s4391_s25 }
0x2ba1   :  { %v3190_v48 = vpop.permute.xlu0 %3189  ;;  %v3366_v52 = vld [vmem:[#allocation3 + $0x10] sm:$0xff] }
0x2ba2   :  { %3192 = vst.msk [vmem:[#allocation3 + $0x30] sm:$0xff] %vm135_vm0, %v3190_v48  ;;  %3374 = vst.msk [vmem:[#allocation14 + $0x10] sm:$0xff] %vm135_vm0, %v3366_v52 }
0x2ba4   :  { %3024 = vrot.lane.b32.xlu1 %v3022_v10, %s4391_s25 }
0x2ba5   :  { %v3368_v2 = vld [vmem:[#allocation3 + $0x20] sm:$0xff] }
0x2ba6   :  { %3376 = vst.msk [vmem:[#allocation14 + $0x20] sm:$0xff] %vm135_vm0, %v3368_v2 }
0x2ba8   :  { %3354 = vrot.lane.b32.xlu1 %v3352_v62, %s4391_s25 }
0x2ba9   :  { %v3370_v46 = vld [vmem:[#allocation3 + $0x30] sm:$0xff] }
0x2baa   :  { %3378 = vst.msk [vmem:[#allocation14 + $0x30] sm:$0xff] %vm135_vm0, %v3370_v46 }
0x2bac   :  { %3398 = vrot.lane.b32.xlu1 %v3381_v38, %s4389_s4 }
0x2bb0   :  { %3402 = vrot.lane.b32.xlu1 %v3383_v44, %s4389_s4 }
0x2bb4   :  { %3406 = vrot.lane.b32.xlu1 %v3385_v41, %s4389_s4 }
0x2bb8   :  { %3410 = vrot.lane.b32.xlu1 %v3387_v11, %s4389_s4 }
0x2bfa   :  { %v3431_v61 = vpop.permute.xlu1 %3430 }
0x2bfb   :  { %v3433_v22 = vsel %vm135_vm0, %v3431_v61, %v3351_v4 }
0x2bfc   :  { %3692 = vmatmul.mubr.msk.f32.vlgmr.msra.gmra.mrb[20].mxu1 %vm314_vm1, %v3433_v22 }
0x2bfe   :  { %v2371_v37 = vpop.permute.xlu1 %2370 }
0x2bff   :  { %2373 = vst.msk [vmem:[#allocation4 + $0x30] sm:$0xff] %vm135_vm0, %v2371_v37 }
0x2c02   :  { %v2701_v31 = vpop.permute.xlu1 %2700 }
0x2c03   :  { %2703 = vst.msk [vmem:[#allocation4 + $0x20] sm:$0xff] %vm135_vm0, %v2701_v31 }
0x2c06   :  { %v3031_v13 = vpop.permute.xlu1 %3030  ;;  %v3386_v26 = vld [vmem:[#allocation4 + $0x30] sm:$0xff] }
0x2c07   :  { %3033 = vst.msk [vmem:[#allocation4 + $0x10] sm:$0xff] %vm135_vm0, %v3031_v13 }
0x2c0a   :  { %v3361_v54 = vpop.permute.xlu1 %3360  ;;  %v3384_v33 = vld [vmem:[#allocation4 + $0x20] sm:$0xff] }
0x2c0b   :  { %3363 = vst.msk [vmem:[#allocation4] sm:$0xff] %vm135_vm0, %v3361_v54 }
0x2c0e   :  { %v2365_v16 = vpop.permute.xlu1 %2364  ;;  %v3382_v1 = vld [vmem:[#allocation4 + $0x10] sm:$0xff] }
0x2c0f   :  { %2367 = vst.msk [vmem:[#allocation3 + $0x8] sm:$0xff] %vm135_vm0, %v2365_v16  ;;  %3400 = vrot.lane.b32.xlu0 %v3382_v1, %s4389_s4 }
0x2c12   :  { %v2695_v42 = vpop.permute.xlu1 %2694  ;;  %v3380_v18 = vld [vmem:[#allocation4] sm:$0xff] }
0x2c13   :  { %2697 = vst.msk [vmem:[#allocation3 + $0x18] sm:$0xff] %vm135_vm0, %v2695_v42  ;;  %3404 = vrot.lane.b32.xlu0 %v3384_v33, %s4389_s4 }
0x2c16   :  { %v3025_v59 = vpop.permute.xlu1 %3024  ;;  %v3365_v43 = vld [vmem:[#allocation3 + $0x8] sm:$0xff] }
0x2c17   :  { %3027 = vst.msk [vmem:[#allocation3 + $0x28] sm:$0xff] %vm135_vm0, %v3025_v59  ;;  %3396 = vrot.lane.b32.xlu0 %v3380_v18, %s4389_s4  ;;  %3373 = vst.msk [vmem:[#allocation14 + $0x8] sm:$0xff] %vm135_vm0, %v3365_v43 }
0x2c1a   :  { %v3355_v45 = vpop.permute.xlu1 %3354  ;;  %v3367_v5 = vld [vmem:[#allocation3 + $0x18] sm:$0xff] }
0x2c1b   :  { %3357 = vst.msk [vmem:[#allocation3 + $0x38] sm:$0xff] %vm135_vm0, %v3355_v45  ;;  %3408 = vrot.lane.b32.xlu0 %v3386_v26, %s4389_s4  ;;  %3375 = vst.msk [vmem:[#allocation14 + $0x18] sm:$0xff] %vm135_vm0, %v3367_v5  ;;  %s3529_s4 = sshll.u32 %s4394_s10, 4  ;;  %s3530_s4 = int_to_ptr.vmem [resolvable:$true] %s3529_s4 }
0x2c1c   :  { %s4326_s25 = scalar_lea.vmem %s3530_s4, 1024  ;;  %p4331_p13 = scmp.lt.s32.totalorder %s3530_s4, %s3530_s4 }
0x2c1d   :  { %p4327_p12 = scmp.ne.s32.totalorder %s3530_s4, %s4326_s25  ;;  %p4332_p0 = scmp.lt.s32.totalorder %s4326_s25, %s4326_s25 }
0x2c1e   :  { %v3399_v58 = vpop.permute.xlu1 %3398  ;;  %v3369_v50 = vld [vmem:[#allocation3 + $0x28] sm:$0xff] }
0x2c1f   :  { %3422 = vst.msk [vmem:[#allocation14 + $0x8] sm:$0xff] %vm3420_vm3, %v3399_v58  ;;  %p4333_p1 = por %p4332_p0, %p4331_p13 }
0x2c20   :  { %3377 = vst.msk [vmem:[#allocation14 + $0x28] sm:$0xff] %vm135_vm0, %v3369_v50 }
0x2c21   :  { %p4334_p2 = pnand %p4333_p1, %p4327_p12 }
0x2c22   :  { %v3403_v20 = vpop.permute.xlu1 %3402  ;;  %v3371_v25 = vld [vmem:[#allocation3 + $0x38] sm:$0xff] }
0x2c23   :  { %3424 = vst.msk [vmem:[#allocation14 + $0x18] sm:$0xff] %vm3420_vm3, %v3403_v20 }
0x2c24   :  { %3379 = vst.msk [vmem:[#allocation14 + $0x38] sm:$0xff] %vm135_vm0, %v3371_v25 }
0x2c26   :  { %v3407_v39 = vpop.permute.xlu1 %3406 }
0x2c27   :  { %3426 = vst.msk [vmem:[#allocation14 + $0x28] sm:$0xff] %vm3420_vm3, %v3407_v39 }
0x2c2a   :  { %v3411_v27 = vpop.permute.xlu1 %3410 }
0x2c2b   :  { %3428 = vst.msk [vmem:[#allocation14 + $0x38] sm:$0xff] %vm3420_vm3, %v3411_v27 }
0x2c81   :  { %v3401_v36 = vpop.permute.xlu0 %3400 }
0x2c82   :  { %3423 = vst.msk [vmem:[#allocation14 + $0x10] sm:$0xff] %vm3420_vm3, %v3401_v36 }
0x2c85   :  { %v3405_v49 = vpop.permute.xlu0 %3404 }
0x2c86   :  { %3425 = vst.msk [vmem:[#allocation14 + $0x20] sm:$0xff] %vm3420_vm3, %v3405_v49 }
0x2c89   :  { %v3397_v9 = vpop.permute.xlu0 %3396 }
0x2c8a   :  { %3421 = vst.msk [vmem:[#allocation14] sm:$0xff] %vm3420_vm3, %v3397_v9 }
0x2c8d   :  { %v3409_v7 = vpop.permute.xlu0 %3408 }
0x2c8e   :  { %3427 = vst.msk [vmem:[#allocation14 + $0x30] sm:$0xff] %vm3420_vm3, %v3409_v7 }
0x2c8f   :  { %4337 = shalt.err (!%p4334_p2)
}
0x2c90   :  { %s4338_s17 = scalar_lea.hbm %s5796_s12, 1024 }
0x2c91   :  { %p4339_p3 = scmp.ne.s32.totalorder %s5796_s12, %s4338_s17  ;;  %p4342_p4 = scmp.lt.u32.totalorder %s4338_s17, %s5796_s12 }
0x2c93   :  { %p4344_p5 = pnand %p4342_p4, %p4339_p3 }
0x2c95   :  { %4347 = shalt.err (!%p4344_p5)
}
0x2c96   :  { %s4395_s20 = smov 128   ;;  %s4396_s9 = smov 8   ;;  %v3664_v32 = vld [vmem:[%s5795_s11] ss:$0 sm:$0xff] }
0x2c97   :  { %3535 = dma.vmem_to_hbm [thread:$0]  %s3530_s4, 1024, %s5796_s12, [#allocation7], %s4395_s20, %s4395_s20, %s4396_s9  }
0x2c98   :  { %s4397_s23 = smov [#allocation15]  }
0x2c99   :  { %s3542_s0 = sshll.u32 %s4397_s23, 4  ;;  %s3543_s0 = int_to_ptr.vmem [resolvable:$true] %s3542_s0 }
0x2c9a   :  { %s4348_s3 = scalar_lea.vmem %s3543_s0, 128  ;;  %p4353_p7 = scmp.lt.s32.totalorder %s3543_s0, %s3543_s0 }
0x2c9b   :  { %p4349_p6 = scmp.ne.s32.totalorder %s3543_s0, %s4348_s3  ;;  %p4354_p8 = scmp.lt.s32.totalorder %s4348_s3, %s4348_s3 }
0x2c9d   :  { %p4355_p9 = por %p4354_p8, %p4353_p7 }
0x2c9f   :  { %p4356_p10 = pnand %p4355_p9, %p4349_p6 }
0x2ccf   :  { %v3518_v63 = vpop.f32.mrb[20].mxu1 }
0x2cd0   :  { %v3519_v51 = vadd.f32 %v3664_v32, %v3518_v63  ;;  %v3693_v15 = vpop.f32.mrb[21].mxu1 }
0x2cd2   :  { %4214 = vtanh.f32 %v3519_v51 }
0x2cdc   :  { %v4215_v29 = vpop.eup %4214 }
0x2cdd   :  { %3523 = vst.msk [vmem:[#allocation15] sm:$0xff] %vm135_vm0, %v4215_v29 }
0x2cde   :  { %4359 = shalt.err (!%p4356_p10)
}
0x2cdf   :  { %s4360_s11 = scalar_lea.hbm %s5797_s13, 128 }
0x2ce0   :  { %p4361_p11 = scmp.ne.s32.totalorder %s5797_s13, %s4360_s11  ;;  %p4364_p12 = scmp.lt.u32.totalorder %s4360_s11, %s5797_s13 }
0x2ce2   :  { %p4366_p13 = pnand %p4364_p12, %p4361_p11 }
0x2ce4   :  { %4369 = shalt.err (!%p4366_p13)
}
0x2ce5   :  { %3545 = dma.vmem_to_hbm [thread:$0]  %s3543_s0, 128, %s5797_s13, [#allocation16]  }
0x2ce6   :  { %4376 = dma.done.wait [#allocation7], 1024  }
0x2ce7   :  { %4377 = vsyncadd [#allocation7], 4294966272 }
0x2ce8   :  { %4378 = dma.done.wait [#allocation16], 128  }
0x2ce9   :  { %4379 = vsyncadd [#allocation16], 4294967168 }
0x2cea   :  { %3552 = vsyncpa [#allocation6], 1 }
0x2ceb   :  { %3553 = vsyncpa [#allocation9], 1 }
0x2cec   :  { %3554 = vsyncpa [#allocation12], 1 }
0x2ced   :  { %3555 = vsyncpa [#allocation7], 1 }
0x2cee   :  { %3556 = vsyncpa [#allocation16], 1 }

</bundles_post_ra>
